<compile_context>
chip_gen: v6e
topology: v6e:2x2x1
jax: 0.10.0
libtpu: 0.0.40
codegen_flags: <defaults>
</compile_context>

<pallas_src>
import functools
import math

import jax
import jax.numpy as jnp
from jax import lax
from jax.experimental import pallas as pl
from jax.experimental.pallas import tpu as pltpu

_VMEM_LIMIT = 48 * 1024 * 1024
_NEG_INF = -1e9


# ----------------------------------------------------------------------------
# Tiling helpers
# ----------------------------------------------------------------------------

def _pick_tile(dim, max_tile, align):
    """Largest multiple of `align` <= max_tile that divides dim, else full dim."""
    if dim <= max_tile:
        return dim
    t = (max_tile // align) * align
    while t >= align:
        if dim % t == 0:
            return t
        t -= align
    return dim


def _tile_dim(dim, max_tile, align):
    """Return (tile, padded_dim) with padded_dim % tile == 0 and tile aligned."""
    if dim <= max_tile:
        return dim, dim
    t = (max_tile // align) * align
    cand = t
    while cand >= align:
        if dim % cand == 0:
            return cand, dim
        cand -= align
    # No aligned divisor (e.g. odd vocab): pad up to a multiple of the max tile.
    return t, ((dim + t - 1) // t) * t


# ----------------------------------------------------------------------------
# Grouped tiled linear:  out[g] = act(x @ w[g] + b[g]) (+ residual)
# ----------------------------------------------------------------------------

def _linear_kernel(*refs, activation, has_residual):
    if has_residual:
        x_ref, w_ref, b_ref, r_ref, o_ref, acc_ref = refs
    else:
        x_ref, w_ref, b_ref, o_ref, acc_ref = refs

    @pl.when(pl.program_id(3) == 0)
    def _():
        acc_ref[...] = jnp.zeros_like(acc_ref)

    acc_ref[...] += jnp.dot(x_ref[...], w_ref[0],
                            preferred_element_type=jnp.float32)

    @pl.when(pl.program_id(3) == pl.num_programs(3) - 1)
    def _():
        acc = acc_ref[...] + b_ref[0]
        if activation == "relu":
            acc = jnp.maximum(acc, 0.0)
        if has_residual:
            acc = acc + r_ref[...].astype(jnp.float32)
        o_ref[0] = acc.astype(o_ref.dtype)


def grouped_linear(x, w, b, activation=None, residual=None,
                   out_dtype=jnp.bfloat16):
    """x: (M, K); w: (G, K, N) bf16; b: (G, 1, N) f32; residual: (M, N) or None.

    Returns (G, M, N) in out_dtype.  G=1 is a plain linear layer; G=3/2 fuses
    the QKV / KV projections so attention can slice them via BlockSpec only.
    """
    x = x.astype(jnp.bfloat16)
    M, K = x.shape
    G, _, N = w.shape

    tm, Mp = _tile_dim(M, 512, 128)
    tk, Kp = _tile_dim(K, 512, 128)
    tn, Np = _tile_dim(N, 512, 128)

    if (Mp, Kp) != (M, K):
        x = jnp.pad(x, ((0, Mp - M), (0, Kp - K)))
    if (Kp, Np) != (K, N):
        w = jnp.pad(w, ((0, 0), (0, Kp - K), (0, Np - N)))
    if Np != N:
        b = jnp.pad(b, ((0, 0), (0, 0), (0, Np - N)))

    has_res = residual is not None
    args = [x, w, b]
    in_specs = [
        pl.BlockSpec((tm, tk), lambda g, i, j, k: (i, k)),
        pl.BlockSpec((1, tk, tn), lambda g, i, j, k: (g, k, j)),
        pl.BlockSpec((1, 1, tn), lambda g, i, j, k: (g, 0, j)),
    ]
    if has_res:
        r = residual.astype(jnp.bfloat16)
        if (Mp, Np) != (M, N):
            r = jnp.pad(r, ((0, Mp - M), (0, Np - N)))
        args.append(r)
        in_specs.append(pl.BlockSpec((tm, tn), lambda g, i, j, k: (i, j)))

    grid = (G, Mp // tm, Np // tn, Kp // tk)

    cost = pl.CostEstimate(
        flops=int(2 * G * Mp * Np * Kp),
        transcendentals=0,
        bytes_accessed=int(Mp * Kp * 2 * (Np // tn)          # x re-read per N tile
                           + G * Kp * Np * 2 * (Mp // tm)    # w re-read per M tile
                           + G * Np * 4
                           + G * Mp * Np * jnp.dtype(out_dtype).itemsize))

    out = pl.pallas_call(
        functools.partial(_linear_kernel, activation=activation,
                          has_residual=has_res),
        out_shape=jax.ShapeDtypeStruct((G, Mp, Np), out_dtype),
        grid=grid,
        in_specs=in_specs,
        out_specs=pl.BlockSpec((1, tm, tn), lambda g, i, j, k: (g, i, j)),
        scratch_shapes=[pltpu.VMEM((tm, tn), jnp.float32)],
        compiler_params=pltpu.CompilerParams(
            dimension_semantics=("parallel", "parallel", "parallel", "arbitrary"),
            vmem_limit_bytes=_VMEM_LIMIT),
        cost_estimate=cost,
    )(*args)

    if (Mp, Np) != (M, N):
        out = out[:, :M, :N]
    return out


# ----------------------------------------------------------------------------
# LayerNorm (row-tiled, bf16 in/out, f32 math)
# ----------------------------------------------------------------------------

def _layernorm_kernel(x_ref, g_ref, b_ref, o_ref, *, eps):
    x = x_ref[...].astype(jnp.float32)
    mean = jnp.mean(x, axis=-1, keepdims=True)
    var = jnp.mean(jnp.square(x - mean), axis=-1, keepdims=True)
    y = (x - mean) * lax.rsqrt(var + eps)
    o_ref[...] = (y * g_ref[...] + b_ref[...]).astype(o_ref.dtype)


def layernorm(x2d, gamma, beta, eps=1e-5):
    """x2d: (M, D) -> (M, D) bf16; gamma/beta: (1, D) f32."""
    x2d = x2d.astype(jnp.bfloat16)
    M, D = x2d.shape
    tm = _pick_tile(M, 1024, 8)
    cost = pl.CostEstimate(flops=int(10 * M * D), transcendentals=int(M),
                           bytes_accessed=int(2 * M * D * 2 + 2 * D * 4))
    return pl.pallas_call(
        functools.partial(_layernorm_kernel, eps=eps),
        out_shape=jax.ShapeDtypeStruct((M, D), jnp.bfloat16),
        grid=(M // tm,),
        in_specs=[
            pl.BlockSpec((tm, D), lambda i: (i, 0)),
            pl.BlockSpec((1, D), lambda i: (0, 0)),
            pl.BlockSpec((1, D), lambda i: (0, 0)),
        ],
        out_specs=pl.BlockSpec((tm, D), lambda i: (i, 0)),
        compiler_params=pltpu.CompilerParams(
            dimension_semantics=("parallel",),
            vmem_limit_bytes=_VMEM_LIMIT),
        cost_estimate=cost,
    )(x2d, gamma, beta)


# ----------------------------------------------------------------------------
# Multi-head attention, tiled over (batch, q-rows); Q/K/V selected from fused
# projection outputs via BlockSpec leading index; masks built in-kernel.
# ----------------------------------------------------------------------------

def _mha_kernel(*refs, n_heads, scale, causal, has_kpad):
    if has_kpad:
        q_ref, k_ref, v_ref, m_ref, o_ref, o_acc = refs
    else:
        q_ref, k_ref, v_ref, o_ref, o_acc = refs

    q = q_ref[0, 0] * scale                  # (tq, D) bf16, pre-scaled once
    k = k_ref[0, 0]                          # (Sk, D) bf16
    v = v_ref[0, 0]                          # (Sk, D) bf16
    tq, D = q.shape
    Sk = k.shape[0]
    dh = D // n_heads

    bias = None
    if has_kpad:
        bias = m_ref[0]                      # (1, Sk) additive f32 row bias
    if causal:
        q0 = pl.program_id(1) * tq
        rows = lax.broadcasted_iota(jnp.int32, (tq, Sk), 0) + q0
        cols = lax.broadcasted_iota(jnp.int32, (tq, Sk), 1)
        cmask = jnp.where(rows >= cols, 0.0, _NEG_INF).astype(jnp.float32)
        bias = cmask if bias is None else bias + cmask

    for h in range(n_heads):                 # static unroll over heads
        qh = q[:, h * dh:(h + 1) * dh]
        kh = k[:, h * dh:(h + 1) * dh]
        vh = v[:, h * dh:(h + 1) * dh]
        # QK^T without an explicit transpose: contract last dims of both.
        s = lax.dot_general(qh, kh, (((1,), (1,)), ((), ())),
                            preferred_element_type=jnp.float32)
        if bias is not None:
            s = s + bias
        s = s - jnp.max(s, axis=-1, keepdims=True)
        p = jnp.exp(s)
        inv = pl.reciprocal(jnp.sum(p, axis=-1, keepdims=True), approx=True)
        p = (p * inv).astype(jnp.bfloat16)
        o_acc[:, h * dh:(h + 1) * dh] = jnp.dot(
            p, vh, preferred_element_type=jnp.float32)

    o_ref[0] = o_acc[...].astype(o_ref.dtype)   # single lane-dense store


def multihead_attention(q_arr, q_idx, kv_arr, k_idx, v_idx, n_heads,
                        kpad_bias=None, causal=False):
    """q_arr: (Gq, B, Sq, D); kv_arr: (Gk, B, Sk, D) (fused projection outputs).
    kpad_bias: (B, 1, Sk) additive f32 row mask or None.  Returns (B, Sq, D) bf16."""
    _, B, Sq, D = q_arr.shape
    Sk = kv_arr.shape[2]
    scale = 1.0 / math.sqrt(D // n_heads)

    # TODO(synk): for very long Sk, switch to a flash-style inner loop over Sk
    # (m/l/acc scratch) to bound VMEM; whole-Sk-per-step is fine at these sizes.
    tq = _pick_tile(Sq, 256, 8)

    q_arr = q_arr.astype(jnp.bfloat16)
    kv_arr = kv_arr.astype(jnp.bfloat16)

    in_specs = [
        pl.BlockSpec((1, 1, tq, D), lambda b, qi: (q_idx, b, qi, 0)),
        pl.BlockSpec((1, 1, Sk, D), lambda b, qi: (k_idx, b, 0, 0)),
        pl.BlockSpec((1, 1, Sk, D), lambda b, qi: (v_idx, b, 0, 0)),
    ]
    args = [q_arr, kv_arr, kv_arr]
    has_kpad = kpad_bias is not None
    if has_kpad:
        in_specs.append(pl.BlockSpec((1, 1, Sk), lambda b, qi: (b, 0, 0)))
        args.append(kpad_bias.astype(jnp.float32))

    cost = pl.CostEstimate(
        flops=int(4 * B * Sq * Sk * D),
        transcendentals=int(B * n_heads * Sq * Sk),
        bytes_accessed=int(B * Sq * D * 2
                           + 2 * B * (Sq // tq) * Sk * D * 2
                           + (B * Sk * 4 if has_kpad else 0)
                           + B * Sq * D * 2))

    kernel = functools.partial(_mha_kernel, n_heads=n_heads, scale=scale,
                               causal=causal, has_kpad=has_kpad)
    return pl.pallas_call(
        kernel,
        out_shape=jax.ShapeDtypeStruct((B, Sq, D), jnp.bfloat16),
        grid=(B, Sq // tq),
        in_specs=in_specs,
        out_specs=pl.BlockSpec((1, tq, D), lambda b, qi: (b, qi, 0)),
        scratch_shapes=[pltpu.VMEM((tq, D), jnp.float32)],
        compiler_params=pltpu.CompilerParams(
            dimension_semantics=("parallel", "parallel"),
            vmem_limit_bytes=_VMEM_LIMIT),
        cost_estimate=cost,
    )(*args)


# ----------------------------------------------------------------------------
# Transformer assembly (pre-norm sublayers + final LayerNorm)
# ----------------------------------------------------------------------------

def apply_layernorm(x, p):
    B, S, D = x.shape
    return layernorm(x.reshape(B * S, D), p["g"], p["b"]).reshape(B, S, D)


def self_attention_sublayer(x, attn_p, ln_p, n_heads, kpad_bias=None,
                            causal=False):
    B, S, D = x.shape
    xn = apply_layernorm(x, ln_p)
    qkv = grouped_linear(xn.reshape(B * S, D), attn_p["w_qkv"], attn_p["b_qkv"])
    qkv = qkv.reshape(3, B, S, D)                    # contiguous, no HBM split
    attn = multihead_attention(qkv, 0, qkv, 1, 2, n_heads,
                               kpad_bias=kpad_bias, causal=causal)
    out = grouped_linear(attn.reshape(B * S, D), attn_p["wo"], attn_p["bo"],
                         residual=x.reshape(B * S, D))      # fused residual add
    return out.reshape(B, S, D)


def cross_attention_sublayer(x, enc_out, attn_p, ln_p, n_heads, kpad_bias=None):
    B, Sq, D = x.shape
    Sk = enc_out.shape[1]
    xn = apply_layernorm(x, ln_p)
    q = grouped_linear(xn.reshape(B * Sq, D), attn_p["wq"], attn_p["bq"])
    q = q.reshape(1, B, Sq, D)
    kv = grouped_linear(enc_out.reshape(B * Sk, D), attn_p["w_kv"], attn_p["b_kv"])
    kv = kv.reshape(2, B, Sk, D)
    attn = multihead_attention(q, 0, kv, 0, 1, n_heads, kpad_bias=kpad_bias)
    out = grouped_linear(attn.reshape(B * Sq, D), attn_p["wo"], attn_p["bo"],
                         residual=x.reshape(B * Sq, D))
    return out.reshape(B, Sq, D)


def feed_forward_sublayer(x, ff_p, ln_p):
    B, S, D = x.shape
    xn = apply_layernorm(x, ln_p)
    h = grouped_linear(xn.reshape(B * S, D), ff_p["w1"], ff_p["b1"],
                       activation="relu")
    d_ff = h.shape[-1]
    out = grouped_linear(h.reshape(B * S, d_ff), ff_p["w2"], ff_p["b2"],
                         residual=x.reshape(B * S, D))
    return out.reshape(B, S, D)


def encoder_block(x, blk, n_heads, src_kpad_bias):
    x = self_attention_sublayer(x, blk["self_attn"], blk["ln1"], n_heads,
                                kpad_bias=src_kpad_bias)
    x = feed_forward_sublayer(x, blk["ff"], blk["ln2"])
    return x


def decoder_block(x, enc_out, blk, n_heads, src_kpad_bias, tgt_kpad_bias):
    x = self_attention_sublayer(x, blk["self_attn"], blk["ln1"], n_heads,
                                kpad_bias=tgt_kpad_bias, causal=True)
    x = cross_attention_sublayer(x, enc_out, blk["cross_attn"], blk["ln2"],
                                 n_heads, kpad_bias=src_kpad_bias)
    x = feed_forward_sublayer(x, blk["ff"], blk["ln3"])
    return x


def positional_encoding(max_len, d_model):
    assert d_model % 2 == 0, "positional encoding requires even d_model"
    pos = jnp.arange(max_len, dtype=jnp.float32)[:, None]
    div = jnp.exp(jnp.arange(0, d_model, 2, dtype=jnp.float32)
                  * (-math.log(10000.0) / d_model))
    pe = jnp.zeros((max_len, d_model), jnp.float32)
    pe = pe.at[:, 0::2].set(jnp.sin(pos * div))
    pe = pe.at[:, 1::2].set(jnp.cos(pos * div))
    return pe


def unified_transformer_forward(params, src, tgt, src_kpad_bias=None,
                                tgt_kpad_bias=None, *, n_heads,
                                return_embeddings=False):
    D = params["src_emb"].shape[1]
    # ---- encode ----  (embedding gather + PE add: plain-JAX glue)
    x = params["src_emb"][src] * math.sqrt(D) + params["pe"][: src.shape[1]][None]
    x = x.astype(jnp.bfloat16)
    for blk in params["encoder"]:
        x = encoder_block(x, blk, n_heads, src_kpad_bias)
    enc_out = apply_layernorm(x, params["enc_norm"])
    # ---- decode ----
    y = params["tgt_emb"][tgt] * math.sqrt(D) + params["pe"][: tgt.shape[1]][None]
    y = y.astype(jnp.bfloat16)
    for blk in params["decoder"]:
        y = decoder_block(y, enc_out, blk, n_heads, src_kpad_bias, tgt_kpad_bias)
    dec_out = apply_layernorm(y, params["dec_norm"])
    if return_embeddings:
        return dec_out
    # ---- project ----
    B, St, _ = dec_out.shape
    V = params["proj_w"].shape[-1]
    logits = grouped_linear(dec_out.reshape(B * St, D), params["proj_w"],
                            params["proj_b"], out_dtype=jnp.float32)
    return logits.reshape(B, St, V)


# ----------------------------------------------------------------------------
# Parameters (weights bf16, biases / LN params f32) and mask helpers
# ----------------------------------------------------------------------------

def init_params(key, vocab, d_model, d_ff, n_heads, n_layers, max_len,
                shared_embeddings=True):
    ks = iter(jax.random.split(key, 512))

    def w(*shape):
        return (jax.random.normal(next(ks), shape, jnp.float32) * 0.02
                ).astype(jnp.bfloat16)

    def zf32(*shape):
        return jnp.zeros(shape, jnp.float32)

    def ln():
        return {"g": jnp.ones((1, d_model), jnp.float32),
                "b": jnp.zeros((1, d_model), jnp.float32)}

    def self_attn():
        return {"w_qkv": w(3, d_model, d_model), "b_qkv": zf32(3, 1, d_model),
                "wo": w(1, d_model, d_model), "bo": zf32(1, 1, d_model)}

    def cross_attn():
        return {"wq": w(1, d_model, d_model), "bq": zf32(1, 1, d_model),
                "w_kv": w(2, d_model, d_model), "b_kv": zf32(2, 1, d_model),
                "wo": w(1, d_model, d_model), "bo": zf32(1, 1, d_model)}

    def ff():
        return {"w1": w(1, d_model, d_ff), "b1": zf32(1, 1, d_ff),
                "w2": w(1, d_ff, d_model), "b2": zf32(1, 1, d_model)}

    src_emb = jax.random.normal(next(ks), (vocab, d_model), jnp.float32) * 0.02
    tgt_emb = jax.random.normal(next(ks), (vocab, d_model), jnp.float32) * 0.02

    params = {
        "src_emb": src_emb, "tgt_emb": tgt_emb,
        "pe": positional_encoding(max_len, d_model),
        "encoder": [{"self_attn": self_attn(), "ff": ff(),
                     "ln1": ln(), "ln2": ln()} for _ in range(n_layers)],
        "decoder": [{"self_attn": self_attn(), "cross_attn": cross_attn(),
                     "ff": ff(), "ln1": ln(), "ln2": ln(), "ln3": ln()}
                    for _ in range(n_layers)],
        "enc_norm": ln(), "dec_norm": ln(),
    }
    if shared_embeddings:
        # projection_layer.proj.weight tied to src_embed.embedding.weight
        params["proj_w"] = src_emb.T[None].astype(jnp.bfloat16)   # (1, D, V)
    else:
        params["proj_w"] = w(1, d_model, vocab)
    params["proj_b"] = zf32(1, 1, vocab)
    return params


def padding_to_row_bias(keep_mask):
    """(B, S) bool, True = real token -> (B, 1, S) additive f32 row bias."""
    return jnp.where(keep_mask, 0.0, _NEG_INF).astype(jnp.float32)[:, None, :]


# ----------------------------------------------------------------------------

if __name__ == "__main__":
    B, S_SRC, S_TGT = 2, 8, 8
    VOCAB, D_MODEL, D_FF, N_HEADS, N_LAYERS = 64, 32, 64, 4, 2

    key = jax.random.PRNGKey(0)
    k_par, k_src, k_tgt = jax.random.split(key, 3)

    params = init_params(k_par, VOCAB, D_MODEL, D_FF, N_HEADS, N_LAYERS,
                         max_len=max(S_SRC, S_TGT), shared_embeddings=True)

    src = jax.random.randint(k_src, (B, S_SRC), 0, VOCAB, dtype=jnp.int32)
    tgt = jax.random.randint(k_tgt, (B, S_TGT), 0, VOCAB, dtype=jnp.int32)
    src_keep = jnp.ones((B, S_SRC), jnp.bool_)   # no padding in this demo
    tgt_keep = jnp.ones((B, S_TGT), jnp.bool_)
    src_bias = padding_to_row_bias(src_keep)     # (B, 1, S_src) additive
    tgt_bias = padding_to_row_bias(tgt_keep)     # (B, 1, S_tgt) additive

    fwd = jax.jit(functools.partial(unified_transformer_forward,
                                    n_heads=N_HEADS, return_embeddings=False))
    logits = fwd(params, src, tgt, src_bias, tgt_bias)
    jax.block_until_ready(logits)

    assert logits.shape == (B, S_TGT, VOCAB), logits.shape
    assert bool(jnp.all(jnp.isfinite(logits)))
    print("KERNEL_OK")
</pallas_src>

<mosaic_0001>
module attributes {stable_mosaic.version = 11 : i64} {
  func.func @_linear_kernel(%arg0: i32, %arg1: i32, %arg2: i32, %arg3: i32, %arg4: memref<16x32xbf16, #tpu.memory_space<vmem>>, %arg5: memref<1x32x32xbf16, #tpu.memory_space<vmem>>, %arg6: memref<1x1x32xf32, #tpu.memory_space<vmem>>, %arg7: memref<1x16x32xbf16, #tpu.memory_space<vmem>>, %arg8: memref<16x32xf32, #tpu.memory_space<vmem>>) attributes {dimension_semantics = [#tpu.dimension_semantics<parallel>, #tpu.dimension_semantics<parallel>, #tpu.dimension_semantics<parallel>, #tpu.dimension_semantics<arbitrary>], iteration_bounds = array<i64: 3, 1, 1, 1>, scalar_prefetch = 0 : i64, scratch_operands = 1 : i64, tpu.core_type = #tpu.core_type<tc>, window_params = [{transform_indices = @transform_0, window_bounds = array<i64: 16, 32>}, {transform_indices = @transform_1, window_bounds = array<i64: 1, 32, 32>}, {transform_indices = @transform_2, window_bounds = array<i64: 1, 1, 32>}, {transform_indices = @transform_3, window_bounds = array<i64: 1, 16, 32>}]} {
    %c0_i32 = arith.constant 0 : i32
    %0 = arith.cmpi eq, %arg3, %c0_i32 : i32
    %1 = arith.extui %0 : i1 to i32
    %c0_i32_0 = arith.constant 0 : i32
    %2 = arith.cmpi ne, %1, %c0_i32_0 : i32
    scf.if %2 {
      %cst_11 = arith.constant 0.000000e+00 : f32
      %13 = vector.broadcast %cst_11 : f32 to vector<16x32xf32>
      %c0_12 = arith.constant 0 : index
      %c0_13 = arith.constant 0 : index
      %14 = vector.load %arg8[%c0_12, %c0_13] : memref<16x32xf32, #tpu.memory_space<vmem>>, vector<16x32xf32>
      tpu.vector_store %arg8[%c0_12, %c0_13], %13 {strides = array<i32>} : memref<16x32xf32, #tpu.memory_space<vmem>>, vector<16x32xf32>,
    } else {
    }
    %c0 = arith.constant 0 : index
    %c0_1 = arith.constant 0 : index
    %3 = vector.load %arg8[%c0, %c0_1] : memref<16x32xf32, #tpu.memory_space<vmem>>, vector<16x32xf32>
    %c0_2 = arith.constant 0 : index
    %c0_3 = arith.constant 0 : index
    %4 = vector.load %arg4[%c0_2, %c0_3] : memref<16x32xbf16, #tpu.memory_space<vmem>>, vector<16x32xbf16>
    %c0_4 = arith.constant 0 : index
    %c0_5 = arith.constant 0 : index
    %c0_6 = arith.constant 0 : index
    %5 = vector.load %arg5[%c0_4, %c0_5, %c0_6] : memref<1x32x32xbf16, #tpu.memory_space<vmem>>, vector<1x32x32xbf16>
    %6 = vector.shape_cast %5 : vector<1x32x32xbf16> to vector<32x32xbf16>
    %cst = arith.constant dense<0.000000e+00> : vector<16x32xf32>
    %7 = tpu.matmul %4, %6, %cst {dimension_numbers = #tpu.dot_dimension_numbers<[1], [0], [0], [1], [0, 0, 1, 1], [], []>} : vector<16x32xbf16>, vector<32x32xbf16>, vector<16x32xf32> -> vector<16x32xf32>
    %8 = arith.addf %3, %7 : vector<16x32xf32>
    %c0_7 = arith.constant 0 : index
    %c0_8 = arith.constant 0 : index
    %9 = vector.load %arg8[%c0_7, %c0_8] : memref<16x32xf32, #tpu.memory_space<vmem>>, vector<16x32xf32>
    tpu.vector_store %arg8[%c0_7, %c0_8], %8 {strides = array<i32>} : memref<16x32xf32, #tpu.memory_space<vmem>>, vector<16x32xf32>,
    %c0_i32_9 = arith.constant 0 : i32
    %10 = arith.cmpi eq, %arg3, %c0_i32_9 : i32
    %11 = arith.extui %10 : i1 to i32
    %c0_i32_10 = arith.constant 0 : i32
    %12 = arith.cmpi ne, %11, %c0_i32_10 : i32
    scf.if %12 {
      %c0_11 = arith.constant 0 : index
      %c0_12 = arith.constant 0 : index
      %13 = vector.load %arg8[%c0_11, %c0_12] : memref<16x32xf32, #tpu.memory_space<vmem>>, vector<16x32xf32>
      %c0_13 = arith.constant 0 : index
      %c0_14 = arith.constant 0 : index
      %c0_15 = arith.constant 0 : index
      %14 = vector.load %arg6[%c0_13, %c0_14, %c0_15] : memref<1x1x32xf32, #tpu.memory_space<vmem>>, vector<1x1x32xf32>
      %15 = vector.shape_cast %14 : vector<1x1x32xf32> to vector<1x32xf32>
      %16 = vector.broadcast %15 : vector<1x32xf32> to vector<16x32xf32>
      %17 = arith.addf %13, %16 : vector<16x32xf32>
      %18 = arith.truncf %17 : vector<16x32xf32> to vector<16x32xbf16>
      %c0_16 = arith.constant 0 : index
      %c0_17 = arith.constant 0 : index
      %c0_18 = arith.constant 0 : index
      %19 = vector.load %arg7[%c0_16, %c0_17, %c0_18] : memref<1x16x32xbf16, #tpu.memory_space<vmem>>, vector<1x16x32xbf16>
      %20 = vector.shape_cast %19 : vector<1x16x32xbf16> to vector<16x32xbf16>
      %21 = vector.shape_cast %18 : vector<16x32xbf16> to vector<1x16x32xbf16>
      tpu.vector_store %arg7[%c0_16, %c0_17, %c0_18], %21 {strides = array<i32>} : memref<1x16x32xbf16, #tpu.memory_space<vmem>>, vector<1x16x32xbf16>,
    } else {
    }
    return
  }
  func.func @transform_0(%arg0: i32, %arg1: i32, %arg2: i32, %arg3: i32) -> (i32, i32) {
    %c0_i32 = arith.constant 0 : i32
    return %arg1, %arg3 : i32, i32
  }
  func.func @transform_1(%arg0: i32, %arg1: i32, %arg2: i32, %arg3: i32) -> (i32, i32, i32) {
    %c0_i32 = arith.constant 0 : i32
    return %arg0, %arg3, %arg2 : i32, i32, i32
  }
  func.func @transform_2(%arg0: i32, %arg1: i32, %arg2: i32, %arg3: i32) -> (i32, i32, i32) {
    %c0_i32 = arith.constant 0 : i32
    %c0_i32_0 = arith.constant 0 : i32
    return %arg0, %c0_i32, %arg2 : i32, i32, i32
  }
  func.func @transform_3(%arg0: i32, %arg1: i32, %arg2: i32, %arg3: i32) -> (i32, i32, i32) {
    %c0_i32 = arith.constant 0 : i32
    return %arg0, %arg1, %arg2 : i32, i32, i32
  }
}

module attributes {stable_mosaic.version = 11 : i64} {
  func.func @_mha_kernel(%arg0: i32, %arg1: i32, %arg2: memref<1x1x8x32xbf16, #tpu.memory_space<vmem>>, %arg3: memref<1x1x8x32xbf16, #tpu.memory_space<vmem>>, %arg4: memref<1x1x8x32xbf16, #tpu.memory_space<vmem>>, %arg5: memref<1x1x8xf32, #tpu.memory_space<vmem>>, %arg6: memref<1x8x32xbf16, #tpu.memory_space<vmem>>, %arg7: memref<8x32xf32, #tpu.memory_space<vmem>>) attributes {dimension_semantics = [#tpu.dimension_semantics<parallel>, #tpu.dimension_semantics<parallel>], iteration_bounds = array<i64: 2, 1>, scalar_prefetch = 0 : i64, scratch_operands = 1 : i64, tpu.core_type = #tpu.core_type<tc>, window_params = [{transform_indices = @transform_0, window_bounds = array<i64: 1, 1, 8, 32>}, {transform_indices = @transform_1, window_bounds = array<i64: 1, 1, 8, 32>}, {transform_indices = @transform_2, window_bounds = array<i64: 1, 1, 8, 32>}, {transform_indices = @transform_3, window_bounds = array<i64: 1, 1, 8>}, {transform_indices = @transform_4, window_bounds = array<i64: 1, 8, 32>}]} {
    %c0 = arith.constant 0 : index
    %c0_0 = arith.constant 0 : index
    %c0_1 = arith.constant 0 : index
    %c0_2 = arith.constant 0 : index
    %0 = vector.load %arg2[%c0, %c0_0, %c0_1, %c0_2] : memref<1x1x8x32xbf16, #tpu.memory_space<vmem>>, vector<1x1x8x32xbf16>
    %1 = vector.shape_cast %0 : vector<1x1x8x32xbf16> to vector<8x32xbf16>
    %cst = arith.constant 3.535160e-01 : bf16
    %2 = vector.broadcast %cst : bf16 to vector<8x32xbf16>
    %3 = arith.mulf %1, %2 : vector<8x32xbf16>
    %c0_3 = arith.constant 0 : index
    %c0_4 = arith.constant 0 : index
    %c0_5 = arith.constant 0 : index
    %c0_6 = arith.constant 0 : index
    %4 = vector.load %arg3[%c0_3, %c0_4, %c0_5, %c0_6] : memref<1x1x8x32xbf16, #tpu.memory_space<vmem>>, vector<1x1x8x32xbf16>
    %5 = vector.shape_cast %4 : vector<1x1x8x32xbf16> to vector<8x32xbf16>
    %c0_7 = arith.constant 0 : index
    %c0_8 = arith.constant 0 : index
    %c0_9 = arith.constant 0 : index
    %c0_10 = arith.constant 0 : index
    %6 = vector.load %arg4[%c0_7, %c0_8, %c0_9, %c0_10] : memref<1x1x8x32xbf16, #tpu.memory_space<vmem>>, vector<1x1x8x32xbf16>
    %7 = vector.shape_cast %6 : vector<1x1x8x32xbf16> to vector<8x32xbf16>
    %c0_11 = arith.constant 0 : index
    %c0_12 = arith.constant 0 : index
    %c0_13 = arith.constant 0 : index
    %8 = vector.load %arg5[%c0_11, %c0_12, %c0_13] : memref<1x1x8xf32, #tpu.memory_space<vmem>>, vector<1x1x8xf32>
    %9 = vector.shape_cast %8 : vector<1x1x8xf32> to vector<1x8xf32>
    %10 = vector.extract_strided_slice %3 {offsets = [0, 0], sizes = [8, 8], strides = [1, 1]} : vector<8x32xbf16> to vector<8x8xbf16>
    %11 = vector.extract_strided_slice %5 {offsets = [0, 0], sizes = [8, 8], strides = [1, 1]} : vector<8x32xbf16> to vector<8x8xbf16>
    %12 = vector.extract_strided_slice %7 {offsets = [0, 0], sizes = [8, 8], strides = [1, 1]} : vector<8x32xbf16> to vector<8x8xbf16>
    %cst_14 = arith.constant dense<0.000000e+00> : vector<8x8xf32>
    %13 = tpu.matmul %10, %11, %cst_14 {dimension_numbers = #tpu.dot_dimension_numbers<[1], [1], [0], [0], [0, 0, 1, 0], [], []>} : vector<8x8xbf16>, vector<8x8xbf16>, vector<8x8xf32> -> vector<8x8xf32>
    %14 = vector.broadcast %9 : vector<1x8xf32> to vector<8x8xf32>
    %15 = arith.addf %13, %14 : vector<8x8xf32>
    %cst_15 = arith.constant dense<0xFF800000> : vector<8xf32>
    %16 = vector.multi_reduction <maximumf>, %15, %cst_15 [1] : vector<8x8xf32> to vector<8xf32>
    %17 = vector.shape_cast %16 : vector<8xf32> to vector<8x1xf32>
    %18 = vector.broadcast %17 : vector<8x1xf32> to vector<8x8xf32>
    %19 = arith.subf %15, %18 : vector<8x8xf32>
    %20 = math.exp %19 : vector<8x8xf32>
    %cst_16 = arith.constant dense<0.000000e+00> : vector<8xf32>
    %21 = vector.multi_reduction <add>, %20, %cst_16 [1] : vector<8x8xf32> to vector<8xf32>
    %22 = vector.shape_cast %21 : vector<8xf32> to vector<8x1xf32>
    %23 = tpu.reciprocal %22 {approx = true} : vector<8x1xf32> -> vector<8x1xf32>
    %24 = vector.broadcast %23 : vector<8x1xf32> to vector<8x8xf32>
    %25 = arith.mulf %20, %24 : vector<8x8xf32>
    %26 = arith.truncf %25 : vector<8x8xf32> to vector<8x8xbf16>
    %cst_17 = arith.constant dense<0.000000e+00> : vector<8x8xf32>
    %27 = tpu.matmul %26, %12, %cst_17 {dimension_numbers = #tpu.dot_dimension_numbers<[1], [0], [0], [1], [0, 0, 1, 1], [], []>} : vector<8x8xbf16>, vector<8x8xbf16>, vector<8x8xf32> -> vector<8x8xf32>
    %c0_18 = arith.constant 0 : index
    %c0_19 = arith.constant 0 : index
    %28 = vector.load %arg7[%c0_18, %c0_19] : memref<8x32xf32, #tpu.memory_space<vmem>>, vector<8x8xf32>
    tpu.vector_store %arg7[%c0_18, %c0_19], %27 {strides = array<i32>} : memref<8x32xf32, #tpu.memory_space<vmem>>, vector<8x8xf32>,
    %29 = vector.extract_strided_slice %3 {offsets = [0, 8], sizes = [8, 8], strides = [1, 1]} : vector<8x32xbf16> to vector<8x8xbf16>
    %30 = vector.extract_strided_slice %5 {offsets = [0, 8], sizes = [8, 8], strides = [1, 1]} : vector<8x32xbf16> to vector<8x8xbf16>
    %31 = vector.extract_strided_slice %7 {offsets = [0, 8], sizes = [8, 8], strides = [1, 1]} : vector<8x32xbf16> to vector<8x8xbf16>
    %cst_20 = arith.constant dense<0.000000e+00> : vector<8x8xf32>
    %32 = tpu.matmul %29, %30, %cst_20 {dimension_numbers = #tpu.dot_dimension_numbers<[1], [1], [0], [0], [0, 0, 1, 0], [], []>} : vector<8x8xbf16>, vector<8x8xbf16>, vector<8x8xf32> -> vector<8x8xf32>
    %33 = vector.broadcast %9 : vector<1x8xf32> to vector<8x8xf32>
    %34 = arith.addf %32, %33 : vector<8x8xf32>
    %cst_21 = arith.constant dense<0xFF800000> : vector<8xf32>
    %35 = vector.multi_reduction <maximumf>, %34, %cst_21 [1] : vector<8x8xf32> to vector<8xf32>
    %36 = vector.shape_cast %35 : vector<8xf32> to vector<8x1xf32>
    %37 = vector.broadcast %36 : vector<8x1xf32> to vector<8x8xf32>
    %38 = arith.subf %34, %37 : vector<8x8xf32>
    %39 = math.exp %38 : vector<8x8xf32>
    %cst_22 = arith.constant dense<0.000000e+00> : vector<8xf32>
    %40 = vector.multi_reduction <add>, %39, %cst_22 [1] : vector<8x8xf32> to vector<8xf32>
    %41 = vector.shape_cast %40 : vector<8xf32> to vector<8x1xf32>
    %42 = tpu.reciprocal %41 {approx = true} : vector<8x1xf32> -> vector<8x1xf32>
    %43 = vector.broadcast %42 : vector<8x1xf32> to vector<8x8xf32>
    %44 = arith.mulf %39, %43 : vector<8x8xf32>
    %45 = arith.truncf %44 : vector<8x8xf32> to vector<8x8xbf16>
    %cst_23 = arith.constant dense<0.000000e+00> : vector<8x8xf32>
    %46 = tpu.matmul %45, %31, %cst_23 {dimension_numbers = #tpu.dot_dimension_numbers<[1], [0], [0], [1], [0, 0, 1, 1], [], []>} : vector<8x8xbf16>, vector<8x8xbf16>, vector<8x8xf32> -> vector<8x8xf32>
    %c0_24 = arith.constant 0 : index
    %c8 = arith.constant 8 : index
    %47 = vector.load %arg7[%c0_24, %c8] : memref<8x32xf32, #tpu.memory_space<vmem>>, vector<8x8xf32>
    tpu.vector_store %arg7[%c0_24, %c8], %46 {strides = array<i32>} : memref<8x32xf32, #tpu.memory_space<vmem>>, vector<8x8xf32>,
    %48 = vector.extract_strided_slice %3 {offsets = [0, 16], sizes = [8, 8], strides = [1, 1]} : vector<8x32xbf16> to vector<8x8xbf16>
    %49 = vector.extract_strided_slice %5 {offsets = [0, 16], sizes = [8, 8], strides = [1, 1]} : vector<8x32xbf16> to vector<8x8xbf16>
    %50 = vector.extract_strided_slice %7 {offsets = [0, 16], sizes = [8, 8], strides = [1, 1]} : vector<8x32xbf16> to vector<8x8xbf16>
    %cst_25 = arith.constant dense<0.000000e+00> : vector<8x8xf32>
    %51 = tpu.matmul %48, %49, %cst_25 {dimension_numbers = #tpu.dot_dimension_numbers<[1], [1], [0], [0], [0, 0, 1, 0], [], []>} : vector<8x8xbf16>, vector<8x8xbf16>, vector<8x8xf32> -> vector<8x8xf32>
    %52 = vector.broadcast %9 : vector<1x8xf32> to vector<8x8xf32>
    %53 = arith.addf %51, %52 : vector<8x8xf32>
    %cst_26 = arith.constant dense<0xFF800000> : vector<8xf32>
    %54 = vector.multi_reduction <maximumf>, %53, %cst_26 [1] : vector<8x8xf32> to vector<8xf32>
    %55 = vector.shape_cast %54 : vector<8xf32> to vector<8x1xf32>
    %56 = vector.broadcast %55 : vector<8x1xf32> to vector<8x8xf32>
    %57 = arith.subf %53, %56 : vector<8x8xf32>
    %58 = math.exp %57 : vector<8x8xf32>
    %cst_27 = arith.constant dense<0.000000e+00> : vector<8xf32>
    %59 = vector.multi_reduction <add>, %58, %cst_27 [1] : vector<8x8xf32> to vector<8xf32>
    %60 = vector.shape_cast %59 : vector<8xf32> to vector<8x1xf32>
    %61 = tpu.reciprocal %60 {approx = true} : vector<8x1xf32> -> vector<8x1xf32>
    %62 = vector.broadcast %61 : vector<8x1xf32> to vector<8x8xf32>
    %63 = arith.mulf %58, %62 : vector<8x8xf32>
    %64 = arith.truncf %63 : vector<8x8xf32> to vector<8x8xbf16>
    %cst_28 = arith.constant dense<0.000000e+00> : vector<8x8xf32>
    %65 = tpu.matmul %64, %50, %cst_28 {dimension_numbers = #tpu.dot_dimension_numbers<[1], [0], [0], [1], [0, 0, 1, 1], [], []>} : vector<8x8xbf16>, vector<8x8xbf16>, vector<8x8xf32> -> vector<8x8xf32>
    %c0_29 = arith.constant 0 : index
    %c16 = arith.constant 16 : index
    %66 = vector.load %arg7[%c0_29, %c16] : memref<8x32xf32, #tpu.memory_space<vmem>>, vector<8x8xf32>
    tpu.vector_store %arg7[%c0_29, %c16], %65 {strides = array<i32>} : memref<8x32xf32, #tpu.memory_space<vmem>>, vector<8x8xf32>,
    %67 = vector.extract_strided_slice %3 {offsets = [0, 24], sizes = [8, 8], strides = [1, 1]} : vector<8x32xbf16> to vector<8x8xbf16>
    %68 = vector.extract_strided_slice %5 {offsets = [0, 24], sizes = [8, 8], strides = [1, 1]} : vector<8x32xbf16> to vector<8x8xbf16>
    %69 = vector.extract_strided_slice %7 {offsets = [0, 24], sizes = [8, 8], strides = [1, 1]} : vector<8x32xbf16> to vector<8x8xbf16>
    %cst_30 = arith.constant dense<0.000000e+00> : vector<8x8xf32>
    %70 = tpu.matmul %67, %68, %cst_30 {dimension_numbers = #tpu.dot_dimension_numbers<[1], [1], [0], [0], [0, 0, 1, 0], [], []>} : vector<8x8xbf16>, vector<8x8xbf16>, vector<8x8xf32> -> vector<8x8xf32>
    %71 = vector.broadcast %9 : vector<1x8xf32> to vector<8x8xf32>
    %72 = arith.addf %70, %71 : vector<8x8xf32>
    %cst_31 = arith.constant dense<0xFF800000> : vector<8xf32>
    %73 = vector.multi_reduction <maximumf>, %72, %cst_31 [1] : vector<8x8xf32> to vector<8xf32>
    %74 = vector.shape_cast %73 : vector<8xf32> to vector<8x1xf32>
    %75 = vector.broadcast %74 : vector<8x1xf32> to vector<8x8xf32>
    %76 = arith.subf %72, %75 : vector<8x8xf32>
    %77 = math.exp %76 : vector<8x8xf32>
    %cst_32 = arith.constant dense<0.000000e+00> : vector<8xf32>
    %78 = vector.multi_reduction <add>, %77, %cst_32 [1] : vector<8x8xf32> to vector<8xf32>
    %79 = vector.shape_cast %78 : vector<8xf32> to vector<8x1xf32>
    %80 = tpu.reciprocal %79 {approx = true} : vector<8x1xf32> -> vector<8x1xf32>
    %81 = vector.broadcast %80 : vector<8x1xf32> to vector<8x8xf32>
    %82 = arith.mulf %77, %81 : vector<8x8xf32>
    %83 = arith.truncf %82 : vector<8x8xf32> to vector<8x8xbf16>
    %cst_33 = arith.constant dense<0.000000e+00> : vector<8x8xf32>
    %84 = tpu.matmul %83, %69, %cst_33 {dimension_numbers = #tpu.dot_dimension_numbers<[1], [0], [0], [1], [0, 0, 1, 1], [], []>} : vector<8x8xbf16>, vector<8x8xbf16>, vector<8x8xf32> -> vector<8x8xf32>
    %c0_34 = arith.constant 0 : index
    %c24 = arith.constant 24 : index
    %85 = vector.load %arg7[%c0_34, %c24] : memref<8x32xf32, #tpu.memory_space<vmem>>, vector<8x8xf32>
    tpu.vector_store %arg7[%c0_34, %c24], %84 {strides = array<i32>} : memref<8x32xf32, #tpu.memory_space<vmem>>, vector<8x8xf32>,
    %c0_35 = arith.constant 0 : index
    %c0_36 = arith.constant 0 : index
    %86 = vector.load %arg7[%c0_35, %c0_36] : memref<8x32xf32, #tpu.memory_space<vmem>>, vector<8x32xf32>
    %87 = arith.truncf %86 : vector<8x32xf32> to vector<8x32xbf16>
    %c0_37 = arith.constant 0 : index
    %c0_38 = arith.constant 0 : index
    %c0_39 = arith.constant 0 : index
    %88 = vector.load %arg6[%c0_37, %c0_38, %c0_39] : memref<1x8x32xbf16, #tpu.memory_space<vmem>>, vector<1x8x32xbf16>
    %89 = vector.shape_cast %88 : vector<1x8x32xbf16> to vector<8x32xbf16>
    %90 = vector.shape_cast %87 : vector<8x32xbf16> to vector<1x8x32xbf16>
    tpu.vector_store %arg6[%c0_37, %c0_38, %c0_39], %90 {strides = array<i32>} : memref<1x8x32xbf16, #tpu.memory_space<vmem>>, vector<1x8x32xbf16>,
    return
  }
  func.func @transform_0(%arg0: i32, %arg1: i32) -> (i32, i32, i32, i32) {
    %c0_i32 = arith.constant 0 : i32
    %c0_i32_0 = arith.constant 0 : i32
    %c0_i32_1 = arith.constant 0 : i32
    return %c0_i32, %arg0, %arg1, %c0_i32_0 : i32, i32, i32, i32
  }
  func.func @transform_1(%arg0: i32, %arg1: i32) -> (i32, i32, i32, i32) {
    %c1_i32 = arith.constant 1 : i32
    %c0_i32 = arith.constant 0 : i32
    %c0_i32_0 = arith.constant 0 : i32
    %c0_i32_1 = arith.constant 0 : i32
    return %c1_i32, %arg0, %c0_i32, %c0_i32_0 : i32, i32, i32, i32
  }
  func.func @transform_2(%arg0: i32, %arg1: i32) -> (i32, i32, i32, i32) {
    %c2_i32 = arith.constant 2 : i32
    %c0_i32 = arith.constant 0 : i32
    %c0_i32_0 = arith.constant 0 : i32
    %c0_i32_1 = arith.constant 0 : i32
    return %c2_i32, %arg0, %c0_i32, %c0_i32_0 : i32, i32, i32, i32
  }
  func.func @transform_3(%arg0: i32, %arg1: i32) -> (i32, i32, i32) {
    %c0_i32 = arith.constant 0 : i32
    %c0_i32_0 = arith.constant 0 : i32
    %c0_i32_1 = arith.constant 0 : i32
    return %arg0, %c0_i32, %c0_i32_0 : i32, i32, i32
  }
  func.func @transform_4(%arg0: i32, %arg1: i32) -> (i32, i32, i32) {
    %c0_i32 = arith.constant 0 : i32
    %c0_i32_0 = arith.constant 0 : i32
    return %arg0, %arg1, %c0_i32 : i32, i32, i32
  }
}

module attributes {stable_mosaic.version = 11 : i64} {
  func.func @_layernorm_kernel(%arg0: i32, %arg1: memref<16x32xbf16, #tpu.memory_space<vmem>>, %arg2: memref<1x32xf32, #tpu.memory_space<vmem>>, %arg3: memref<1x32xf32, #tpu.memory_space<vmem>>, %arg4: memref<16x32xbf16, #tpu.memory_space<vmem>>) attributes {dimension_semantics = [#tpu.dimension_semantics<parallel>], iteration_bounds = array<i64: 1>, scalar_prefetch = 0 : i64, scratch_operands = 0 : i64, tpu.core_type = #tpu.core_type<tc>, window_params = [{transform_indices = @transform_0, window_bounds = array<i64: 16, 32>}, {pipeline_mode = #tpu.pipeline_mode<synchronous>, transform_indices = @transform_1, window_bounds = array<i64: 1, 32>}, {pipeline_mode = #tpu.pipeline_mode<synchronous>, transform_indices = @transform_2, window_bounds = array<i64: 1, 32>}, {transform_indices = @transform_3, window_bounds = array<i64: 16, 32>}]} {
    %c0 = arith.constant 0 : index
    %c0_0 = arith.constant 0 : index
    %0 = vector.load %arg1[%c0, %c0_0] : memref<16x32xbf16, #tpu.memory_space<vmem>>, vector<16x32xbf16>
    %1 = arith.extf %0 : vector<16x32xbf16> to vector<16x32xf32>
    %cst = arith.constant dense<0.000000e+00> : vector<16xf32>
    %2 = vector.multi_reduction <add>, %1, %cst [1] : vector<16x32xf32> to vector<16xf32>
    %3 = vector.shape_cast %2 : vector<16xf32> to vector<16x1xf32>
    %cst_1 = arith.constant 3.200000e+01 : f32
    %4 = vector.broadcast %cst_1 : f32 to vector<16x1xf32>
    %5 = arith.divf %3, %4 : vector<16x1xf32>
    %6 = vector.broadcast %5 : vector<16x1xf32> to vector<16x32xf32>
    %7 = arith.subf %1, %6 : vector<16x32xf32>
    %8 = arith.mulf %7, %7 : vector<16x32xf32>
    %cst_2 = arith.constant dense<0.000000e+00> : vector<16xf32>
    %9 = vector.multi_reduction <add>, %8, %cst_2 [1] : vector<16x32xf32> to vector<16xf32>
    %10 = vector.shape_cast %9 : vector<16xf32> to vector<16x1xf32>
    %cst_3 = arith.constant 3.200000e+01 : f32
    %11 = vector.broadcast %cst_3 : f32 to vector<16x1xf32>
    %12 = arith.divf %10, %11 : vector<16x1xf32>
    %13 = vector.broadcast %5 : vector<16x1xf32> to vector<16x32xf32>
    %14 = arith.subf %1, %13 : vector<16x32xf32>
    %cst_4 = arith.constant 9.99999974E-6 : f32
    %15 = vector.broadcast %cst_4 : f32 to vector<16x1xf32>
    %16 = arith.addf %12, %15 : vector<16x1xf32>
    %17 = math.rsqrt %16 : vector<16x1xf32>
    %18 = vector.broadcast %17 : vector<16x1xf32> to vector<16x32xf32>
    %19 = arith.mulf %14, %18 : vector<16x32xf32>
    %c0_5 = arith.constant 0 : index
    %c0_6 = arith.constant 0 : index
    %20 = vector.load %arg2[%c0_5, %c0_6] : memref<1x32xf32, #tpu.memory_space<vmem>>, vector<1x32xf32>
    %21 = vector.broadcast %20 : vector<1x32xf32> to vector<16x32xf32>
    %22 = arith.mulf %19, %21 : vector<16x32xf32>
    %c0_7 = arith.constant 0 : index
    %c0_8 = arith.constant 0 : index
    %23 = vector.load %arg3[%c0_7, %c0_8] : memref<1x32xf32, #tpu.memory_space<vmem>>, vector<1x32xf32>
    %24 = vector.broadcast %23 : vector<1x32xf32> to vector<16x32xf32>
    %25 = arith.addf %22, %24 : vector<16x32xf32>
    %26 = arith.truncf %25 : vector<16x32xf32> to vector<16x32xbf16>
    %c0_9 = arith.constant 0 : index
    %c0_10 = arith.constant 0 : index
    %27 = vector.load %arg4[%c0_9, %c0_10] : memref<16x32xbf16, #tpu.memory_space<vmem>>, vector<16x32xbf16>
    tpu.vector_store %arg4[%c0_9, %c0_10], %26 {strides = array<i32>} : memref<16x32xbf16, #tpu.memory_space<vmem>>, vector<16x32xbf16>,
    return
  }
  func.func @transform_0(%arg0: i32) -> (i32, i32) {
    %c0_i32 = arith.constant 0 : i32
    %c0_i32_0 = arith.constant 0 : i32
    return %arg0, %c0_i32 : i32, i32
  }
  func.func @transform_1(%arg0: i32) -> (i32, i32) {
    %c0_i32 = arith.constant 0 : i32
    %c0_i32_0 = arith.constant 0 : i32
    %c0_i32_1 = arith.constant 0 : i32
    return %c0_i32, %c0_i32_0 : i32, i32
  }
  func.func @transform_2(%arg0: i32) -> (i32, i32) {
    %c0_i32 = arith.constant 0 : i32
    %c0_i32_0 = arith.constant 0 : i32
    %c0_i32_1 = arith.constant 0 : i32
    return %c0_i32, %c0_i32_0 : i32, i32
  }
  func.func @transform_3(%arg0: i32) -> (i32, i32) {
    %c0_i32 = arith.constant 0 : i32
    %c0_i32_0 = arith.constant 0 : i32
    return %arg0, %c0_i32 : i32, i32
  }
}

module attributes {stable_mosaic.version = 11 : i64} {
  func.func @_linear_kernel(%arg0: i32, %arg1: i32, %arg2: i32, %arg3: i32, %arg4: memref<16x32xbf16, #tpu.memory_space<vmem>>, %arg5: memref<1x32x32xbf16, #tpu.memory_space<vmem>>, %arg6: memref<1x1x32xf32, #tpu.memory_space<vmem>>, %arg7: memref<16x32xbf16, #tpu.memory_space<vmem>>, %arg8: memref<1x16x32xbf16, #tpu.memory_space<vmem>>, %arg9: memref<16x32xf32, #tpu.memory_space<vmem>>) attributes {dimension_semantics = [#tpu.dimension_semantics<parallel>, #tpu.dimension_semantics<parallel>, #tpu.dimension_semantics<parallel>, #tpu.dimension_semantics<arbitrary>], iteration_bounds = array<i64: 1, 1, 1, 1>, scalar_prefetch = 0 : i64, scratch_operands = 1 : i64, tpu.core_type = #tpu.core_type<tc>, window_params = [{transform_indices = @transform_0, window_bounds = array<i64: 16, 32>}, {transform_indices = @transform_1, window_bounds = array<i64: 1, 32, 32>}, {transform_indices = @transform_2, window_bounds = array<i64: 1, 1, 32>}, {transform_indices = @transform_3, window_bounds = array<i64: 16, 32>}, {transform_indices = @transform_4, window_bounds = array<i64: 1, 16, 32>}]} {
    %c0_i32 = arith.constant 0 : i32
    %0 = arith.cmpi eq, %arg3, %c0_i32 : i32
    %1 = arith.extui %0 : i1 to i32
    %c0_i32_0 = arith.constant 0 : i32
    %2 = arith.cmpi ne, %1, %c0_i32_0 : i32
    scf.if %2 {
      %cst_11 = arith.constant 0.000000e+00 : f32
      %13 = vector.broadcast %cst_11 : f32 to vector<16x32xf32>
      %c0_12 = arith.constant 0 : index
      %c0_13 = arith.constant 0 : index
      %14 = vector.load %arg9[%c0_12, %c0_13] : memref<16x32xf32, #tpu.memory_space<vmem>>, vector<16x32xf32>
      tpu.vector_store %arg9[%c0_12, %c0_13], %13 {strides = array<i32>} : memref<16x32xf32, #tpu.memory_space<vmem>>, vector<16x32xf32>,
    } else {
    }
    %c0 = arith.constant 0 : index
    %c0_1 = arith.constant 0 : index
    %3 = vector.load %arg9[%c0, %c0_1] : memref<16x32xf32, #tpu.memory_space<vmem>>, vector<16x32xf32>
    %c0_2 = arith.constant 0 : index
    %c0_3 = arith.constant 0 : index
    %4 = vector.load %arg4[%c0_2, %c0_3] : memref<16x32xbf16, #tpu.memory_space<vmem>>, vector<16x32xbf16>
    %c0_4 = arith.constant 0 : index
    %c0_5 = arith.constant 0 : index
    %c0_6 = arith.constant 0 : index
    %5 = vector.load %arg5[%c0_4, %c0_5, %c0_6] : memref<1x32x32xbf16, #tpu.memory_space<vmem>>, vector<1x32x32xbf16>
    %6 = vector.shape_cast %5 : vector<1x32x32xbf16> to vector<32x32xbf16>
    %cst = arith.constant dense<0.000000e+00> : vector<16x32xf32>
    %7 = tpu.matmul %4, %6, %cst {dimension_numbers = #tpu.dot_dimension_numbers<[1], [0], [0], [1], [0, 0, 1, 1], [], []>} : vector<16x32xbf16>, vector<32x32xbf16>, vector<16x32xf32> -> vector<16x32xf32>
    %8 = arith.addf %3, %7 : vector<16x32xf32>
    %c0_7 = arith.constant 0 : index
    %c0_8 = arith.constant 0 : index
    %9 = vector.load %arg9[%c0_7, %c0_8] : memref<16x32xf32, #tpu.memory_space<vmem>>, vector<16x32xf32>
    tpu.vector_store %arg9[%c0_7, %c0_8], %8 {strides = array<i32>} : memref<16x32xf32, #tpu.memory_space<vmem>>, vector<16x32xf32>,
    %c0_i32_9 = arith.constant 0 : i32
    %10 = arith.cmpi eq, %arg3, %c0_i32_9 : i32
    %11 = arith.extui %10 : i1 to i32
    %c0_i32_10 = arith.constant 0 : i32
    %12 = arith.cmpi ne, %11, %c0_i32_10 : i32
    scf.if %12 {
      %c0_11 = arith.constant 0 : index
      %c0_12 = arith.constant 0 : index
      %13 = vector.load %arg9[%c0_11, %c0_12] : memref<16x32xf32, #tpu.memory_space<vmem>>, vector<16x32xf32>
      %c0_13 = arith.constant 0 : index
      %c0_14 = arith.constant 0 : index
      %c0_15 = arith.constant 0 : index
      %14 = vector.load %arg6[%c0_13, %c0_14, %c0_15] : memref<1x1x32xf32, #tpu.memory_space<vmem>>, vector<1x1x32xf32>
      %15 = vector.shape_cast %14 : vector<1x1x32xf32> to vector<1x32xf32>
      %16 = vector.broadcast %15 : vector<1x32xf32> to vector<16x32xf32>
      %17 = arith.addf %13, %16 : vector<16x32xf32>
      %c0_16 = arith.constant 0 : index
      %c0_17 = arith.constant 0 : index
      %18 = vector.load %arg7[%c0_16, %c0_17] : memref<16x32xbf16, #tpu.memory_space<vmem>>, vector<16x32xbf16>
      %19 = arith.extf %18 : vector<16x32xbf16> to vector<16x32xf32>
      %20 = arith.addf %17, %19 : vector<16x32xf32>
      %21 = arith.truncf %20 : vector<16x32xf32> to vector<16x32xbf16>
      %c0_18 = arith.constant 0 : index
      %c0_19 = arith.constant 0 : index
      %c0_20 = arith.constant 0 : index
      %22 = vector.load %arg8[%c0_18, %c0_19, %c0_20] : memref<1x16x32xbf16, #tpu.memory_space<vmem>>, vector<1x16x32xbf16>
      %23 = vector.shape_cast %22 : vector<1x16x32xbf16> to vector<16x32xbf16>
      %24 = vector.shape_cast %21 : vector<16x32xbf16> to vector<1x16x32xbf16>
      tpu.vector_store %arg8[%c0_18, %c0_19, %c0_20], %24 {strides = array<i32>} : memref<1x16x32xbf16, #tpu.memory_space<vmem>>, vector<1x16x32xbf16>,
    } else {
    }
    return
  }
  func.func @transform_0(%arg0: i32, %arg1: i32, %arg2: i32, %arg3: i32) -> (i32, i32) {
    %c0_i32 = arith.constant 0 : i32
    return %arg1, %arg3 : i32, i32
  }
  func.func @transform_1(%arg0: i32, %arg1: i32, %arg2: i32, %arg3: i32) -> (i32, i32, i32) {
    %c0_i32 = arith.constant 0 : i32
    return %arg0, %arg3, %arg2 : i32, i32, i32
  }
  func.func @transform_2(%arg0: i32, %arg1: i32, %arg2: i32, %arg3: i32) -> (i32, i32, i32) {
    %c0_i32 = arith.constant 0 : i32
    %c0_i32_0 = arith.constant 0 : i32
    return %arg0, %c0_i32, %arg2 : i32, i32, i32
  }
  func.func @transform_3(%arg0: i32, %arg1: i32, %arg2: i32, %arg3: i32) -> (i32, i32) {
    %c0_i32 = arith.constant 0 : i32
    return %arg1, %arg2 : i32, i32
  }
  func.func @transform_4(%arg0: i32, %arg1: i32, %arg2: i32, %arg3: i32) -> (i32, i32, i32) {
    %c0_i32 = arith.constant 0 : i32
    return %arg0, %arg1, %arg2 : i32, i32, i32
  }
}

module attributes {stable_mosaic.version = 11 : i64} {
  func.func @_linear_kernel(%arg0: i32, %arg1: i32, %arg2: i32, %arg3: i32, %arg4: memref<16x32xbf16, #tpu.memory_space<vmem>>, %arg5: memref<1x32x64xbf16, #tpu.memory_space<vmem>>, %arg6: memref<1x1x64xf32, #tpu.memory_space<vmem>>, %arg7: memref<1x16x64xbf16, #tpu.memory_space<vmem>>, %arg8: memref<16x64xf32, #tpu.memory_space<vmem>>) attributes {dimension_semantics = [#tpu.dimension_semantics<parallel>, #tpu.dimension_semantics<parallel>, #tpu.dimension_semantics<parallel>, #tpu.dimension_semantics<arbitrary>], iteration_bounds = array<i64: 1, 1, 1, 1>, scalar_prefetch = 0 : i64, scratch_operands = 1 : i64, tpu.core_type = #tpu.core_type<tc>, window_params = [{transform_indices = @transform_0, window_bounds = array<i64: 16, 32>}, {transform_indices = @transform_1, window_bounds = array<i64: 1, 32, 64>}, {transform_indices = @transform_2, window_bounds = array<i64: 1, 1, 64>}, {transform_indices = @transform_3, window_bounds = array<i64: 1, 16, 64>}]} {
    %c0_i32 = arith.constant 0 : i32
    %0 = arith.cmpi eq, %arg3, %c0_i32 : i32
    %1 = arith.extui %0 : i1 to i32
    %c0_i32_0 = arith.constant 0 : i32
    %2 = arith.cmpi ne, %1, %c0_i32_0 : i32
    scf.if %2 {
      %cst_11 = arith.constant 0.000000e+00 : f32
      %13 = vector.broadcast %cst_11 : f32 to vector<16x64xf32>
      %c0_12 = arith.constant 0 : index
      %c0_13 = arith.constant 0 : index
      %14 = vector.load %arg8[%c0_12, %c0_13] : memref<16x64xf32, #tpu.memory_space<vmem>>, vector<16x64xf32>
      tpu.vector_store %arg8[%c0_12, %c0_13], %13 {strides = array<i32>} : memref<16x64xf32, #tpu.memory_space<vmem>>, vector<16x64xf32>,
    } else {
    }
    %c0 = arith.constant 0 : index
    %c0_1 = arith.constant 0 : index
    %3 = vector.load %arg8[%c0, %c0_1] : memref<16x64xf32, #tpu.memory_space<vmem>>, vector<16x64xf32>
    %c0_2 = arith.constant 0 : index
    %c0_3 = arith.constant 0 : index
    %4 = vector.load %arg4[%c0_2, %c0_3] : memref<16x32xbf16, #tpu.memory_space<vmem>>, vector<16x32xbf16>
    %c0_4 = arith.constant 0 : index
    %c0_5 = arith.constant 0 : index
    %c0_6 = arith.constant 0 : index
    %5 = vector.load %arg5[%c0_4, %c0_5, %c0_6] : memref<1x32x64xbf16, #tpu.memory_space<vmem>>, vector<1x32x64xbf16>
    %6 = vector.shape_cast %5 : vector<1x32x64xbf16> to vector<32x64xbf16>
    %cst = arith.constant dense<0.000000e+00> : vector<16x64xf32>
    %7 = tpu.matmul %4, %6, %cst {dimension_numbers = #tpu.dot_dimension_numbers<[1], [0], [0], [1], [0, 0, 1, 1], [], []>} : vector<16x32xbf16>, vector<32x64xbf16>, vector<16x64xf32> -> vector<16x64xf32>
    %8 = arith.addf %3, %7 : vector<16x64xf32>
    %c0_7 = arith.constant 0 : index
    %c0_8 = arith.constant 0 : index
    %9 = vector.load %arg8[%c0_7, %c0_8] : memref<16x64xf32, #tpu.memory_space<vmem>>, vector<16x64xf32>
    tpu.vector_store %arg8[%c0_7, %c0_8], %8 {strides = array<i32>} : memref<16x64xf32, #tpu.memory_space<vmem>>, vector<16x64xf32>,
    %c0_i32_9 = arith.constant 0 : i32
    %10 = arith.cmpi eq, %arg3, %c0_i32_9 : i32
    %11 = arith.extui %10 : i1 to i32
    %c0_i32_10 = arith.constant 0 : i32
    %12 = arith.cmpi ne, %11, %c0_i32_10 : i32
    scf.if %12 {
      %c0_11 = arith.constant 0 : index
      %c0_12 = arith.constant 0 : index
      %13 = vector.load %arg8[%c0_11, %c0_12] : memref<16x64xf32, #tpu.memory_space<vmem>>, vector<16x64xf32>
      %c0_13 = arith.constant 0 : index
      %c0_14 = arith.constant 0 : index
      %c0_15 = arith.constant 0 : index
      %14 = vector.load %arg6[%c0_13, %c0_14, %c0_15] : memref<1x1x64xf32, #tpu.memory_space<vmem>>, vector<1x1x64xf32>
      %15 = vector.shape_cast %14 : vector<1x1x64xf32> to vector<1x64xf32>
      %16 = vector.broadcast %15 : vector<1x64xf32> to vector<16x64xf32>
      %17 = arith.addf %13, %16 : vector<16x64xf32>
      %cst_16 = arith.constant 0.000000e+00 : f32
      %18 = vector.broadcast %cst_16 : f32 to vector<16x64xf32>
      %19 = arith.maximumf %17, %18 : vector<16x64xf32>
      %20 = arith.truncf %19 : vector<16x64xf32> to vector<16x64xbf16>
      %c0_17 = arith.constant 0 : index
      %c0_18 = arith.constant 0 : index
      %c0_19 = arith.constant 0 : index
      %21 = vector.load %arg7[%c0_17, %c0_18, %c0_19] : memref<1x16x64xbf16, #tpu.memory_space<vmem>>, vector<1x16x64xbf16>
      %22 = vector.shape_cast %21 : vector<1x16x64xbf16> to vector<16x64xbf16>
      %23 = vector.shape_cast %20 : vector<16x64xbf16> to vector<1x16x64xbf16>
      tpu.vector_store %arg7[%c0_17, %c0_18, %c0_19], %23 {strides = array<i32>} : memref<1x16x64xbf16, #tpu.memory_space<vmem>>, vector<1x16x64xbf16>,
    } else {
    }
    return
  }
  func.func @transform_0(%arg0: i32, %arg1: i32, %arg2: i32, %arg3: i32) -> (i32, i32) {
    %c0_i32 = arith.constant 0 : i32
    return %arg1, %arg3 : i32, i32
  }
  func.func @transform_1(%arg0: i32, %arg1: i32, %arg2: i32, %arg3: i32) -> (i32, i32, i32) {
    %c0_i32 = arith.constant 0 : i32
    return %arg0, %arg3, %arg2 : i32, i32, i32
  }
  func.func @transform_2(%arg0: i32, %arg1: i32, %arg2: i32, %arg3: i32) -> (i32, i32, i32) {
    %c0_i32 = arith.constant 0 : i32
    %c0_i32_0 = arith.constant 0 : i32
    return %arg0, %c0_i32, %arg2 : i32, i32, i32
  }
  func.func @transform_3(%arg0: i32, %arg1: i32, %arg2: i32, %arg3: i32) -> (i32, i32, i32) {
    %c0_i32 = arith.constant 0 : i32
    return %arg0, %arg1, %arg2 : i32, i32, i32
  }
}

module attributes {stable_mosaic.version = 11 : i64} {
  func.func @_linear_kernel(%arg0: i32, %arg1: i32, %arg2: i32, %arg3: i32, %arg4: memref<16x64xbf16, #tpu.memory_space<vmem>>, %arg5: memref<1x64x32xbf16, #tpu.memory_space<vmem>>, %arg6: memref<1x1x32xf32, #tpu.memory_space<vmem>>, %arg7: memref<16x32xbf16, #tpu.memory_space<vmem>>, %arg8: memref<1x16x32xbf16, #tpu.memory_space<vmem>>, %arg9: memref<16x32xf32, #tpu.memory_space<vmem>>) attributes {dimension_semantics = [#tpu.dimension_semantics<parallel>, #tpu.dimension_semantics<parallel>, #tpu.dimension_semantics<parallel>, #tpu.dimension_semantics<arbitrary>], iteration_bounds = array<i64: 1, 1, 1, 1>, scalar_prefetch = 0 : i64, scratch_operands = 1 : i64, tpu.core_type = #tpu.core_type<tc>, window_params = [{transform_indices = @transform_0, window_bounds = array<i64: 16, 64>}, {transform_indices = @transform_1, window_bounds = array<i64: 1, 64, 32>}, {transform_indices = @transform_2, window_bounds = array<i64: 1, 1, 32>}, {transform_indices = @transform_3, window_bounds = array<i64: 16, 32>}, {transform_indices = @transform_4, window_bounds = array<i64: 1, 16, 32>}]} {
    %c0_i32 = arith.constant 0 : i32
    %0 = arith.cmpi eq, %arg3, %c0_i32 : i32
    %1 = arith.extui %0 : i1 to i32
    %c0_i32_0 = arith.constant 0 : i32
    %2 = arith.cmpi ne, %1, %c0_i32_0 : i32
    scf.if %2 {
      %cst_11 = arith.constant 0.000000e+00 : f32
      %13 = vector.broadcast %cst_11 : f32 to vector<16x32xf32>
      %c0_12 = arith.constant 0 : index
      %c0_13 = arith.constant 0 : index
      %14 = vector.load %arg9[%c0_12, %c0_13] : memref<16x32xf32, #tpu.memory_space<vmem>>, vector<16x32xf32>
      tpu.vector_store %arg9[%c0_12, %c0_13], %13 {strides = array<i32>} : memref<16x32xf32, #tpu.memory_space<vmem>>, vector<16x32xf32>,
    } else {
    }
    %c0 = arith.constant 0 : index
    %c0_1 = arith.constant 0 : index
    %3 = vector.load %arg9[%c0, %c0_1] : memref<16x32xf32, #tpu.memory_space<vmem>>, vector<16x32xf32>
    %c0_2 = arith.constant 0 : index
    %c0_3 = arith.constant 0 : index
    %4 = vector.load %arg4[%c0_2, %c0_3] : memref<16x64xbf16, #tpu.memory_space<vmem>>, vector<16x64xbf16>
    %c0_4 = arith.constant 0 : index
    %c0_5 = arith.constant 0 : index
    %c0_6 = arith.constant 0 : index
    %5 = vector.load %arg5[%c0_4, %c0_5, %c0_6] : memref<1x64x32xbf16, #tpu.memory_space<vmem>>, vector<1x64x32xbf16>
    %6 = vector.shape_cast %5 : vector<1x64x32xbf16> to vector<64x32xbf16>
    %cst = arith.constant dense<0.000000e+00> : vector<16x32xf32>
    %7 = tpu.matmul %4, %6, %cst {dimension_numbers = #tpu.dot_dimension_numbers<[1], [0], [0], [1], [0, 0, 1, 1], [], []>} : vector<16x64xbf16>, vector<64x32xbf16>, vector<16x32xf32> -> vector<16x32xf32>
    %8 = arith.addf %3, %7 : vector<16x32xf32>
    %c0_7 = arith.constant 0 : index
    %c0_8 = arith.constant 0 : index
    %9 = vector.load %arg9[%c0_7, %c0_8] : memref<16x32xf32, #tpu.memory_space<vmem>>, vector<16x32xf32>
    tpu.vector_store %arg9[%c0_7, %c0_8], %8 {strides = array<i32>} : memref<16x32xf32, #tpu.memory_space<vmem>>, vector<16x32xf32>,
    %c0_i32_9 = arith.constant 0 : i32
    %10 = arith.cmpi eq, %arg3, %c0_i32_9 : i32
    %11 = arith.extui %10 : i1 to i32
    %c0_i32_10 = arith.constant 0 : i32
    %12 = arith.cmpi ne, %11, %c0_i32_10 : i32
    scf.if %12 {
      %c0_11 = arith.constant 0 : index
      %c0_12 = arith.constant 0 : index
      %13 = vector.load %arg9[%c0_11, %c0_12] : memref<16x32xf32, #tpu.memory_space<vmem>>, vector<16x32xf32>
      %c0_13 = arith.constant 0 : index
      %c0_14 = arith.constant 0 : index
      %c0_15 = arith.constant 0 : index
      %14 = vector.load %arg6[%c0_13, %c0_14, %c0_15] : memref<1x1x32xf32, #tpu.memory_space<vmem>>, vector<1x1x32xf32>
      %15 = vector.shape_cast %14 : vector<1x1x32xf32> to vector<1x32xf32>
      %16 = vector.broadcast %15 : vector<1x32xf32> to vector<16x32xf32>
      %17 = arith.addf %13, %16 : vector<16x32xf32>
      %c0_16 = arith.constant 0 : index
      %c0_17 = arith.constant 0 : index
      %18 = vector.load %arg7[%c0_16, %c0_17] : memref<16x32xbf16, #tpu.memory_space<vmem>>, vector<16x32xbf16>
      %19 = arith.extf %18 : vector<16x32xbf16> to vector<16x32xf32>
      %20 = arith.addf %17, %19 : vector<16x32xf32>
      %21 = arith.truncf %20 : vector<16x32xf32> to vector<16x32xbf16>
      %c0_18 = arith.constant 0 : index
      %c0_19 = arith.constant 0 : index
      %c0_20 = arith.constant 0 : index
      %22 = vector.load %arg8[%c0_18, %c0_19, %c0_20] : memref<1x16x32xbf16, #tpu.memory_space<vmem>>, vector<1x16x32xbf16>
      %23 = vector.shape_cast %22 : vector<1x16x32xbf16> to vector<16x32xbf16>
      %24 = vector.shape_cast %21 : vector<16x32xbf16> to vector<1x16x32xbf16>
      tpu.vector_store %arg8[%c0_18, %c0_19, %c0_20], %24 {strides = array<i32>} : memref<1x16x32xbf16, #tpu.memory_space<vmem>>, vector<1x16x32xbf16>,
    } else {
    }
    return
  }
  func.func @transform_0(%arg0: i32, %arg1: i32, %arg2: i32, %arg3: i32) -> (i32, i32) {
    %c0_i32 = arith.constant 0 : i32
    return %arg1, %arg3 : i32, i32
  }
  func.func @transform_1(%arg0: i32, %arg1: i32, %arg2: i32, %arg3: i32) -> (i32, i32, i32) {
    %c0_i32 = arith.constant 0 : i32
    return %arg0, %arg3, %arg2 : i32, i32, i32
  }
  func.func @transform_2(%arg0: i32, %arg1: i32, %arg2: i32, %arg3: i32) -> (i32, i32, i32) {
    %c0_i32 = arith.constant 0 : i32
    %c0_i32_0 = arith.constant 0 : i32
    return %arg0, %c0_i32, %arg2 : i32, i32, i32
  }
  func.func @transform_3(%arg0: i32, %arg1: i32, %arg2: i32, %arg3: i32) -> (i32, i32) {
    %c0_i32 = arith.constant 0 : i32
    return %arg1, %arg2 : i32, i32
  }
  func.func @transform_4(%arg0: i32, %arg1: i32, %arg2: i32, %arg3: i32) -> (i32, i32, i32) {
    %c0_i32 = arith.constant 0 : i32
    return %arg0, %arg1, %arg2 : i32, i32, i32
  }
}

module attributes {stable_mosaic.version = 11 : i64} {
  func.func @_linear_kernel(%arg0: i32, %arg1: i32, %arg2: i32, %arg3: i32, %arg4: memref<16x32xbf16, #tpu.memory_space<vmem>>, %arg5: memref<1x32x32xbf16, #tpu.memory_space<vmem>>, %arg6: memref<1x1x32xf32, #tpu.memory_space<vmem>>, %arg7: memref<1x16x32xbf16, #tpu.memory_space<vmem>>, %arg8: memref<16x32xf32, #tpu.memory_space<vmem>>) attributes {dimension_semantics = [#tpu.dimension_semantics<parallel>, #tpu.dimension_semantics<parallel>, #tpu.dimension_semantics<parallel>, #tpu.dimension_semantics<arbitrary>], iteration_bounds = array<i64: 2, 1, 1, 1>, scalar_prefetch = 0 : i64, scratch_operands = 1 : i64, tpu.core_type = #tpu.core_type<tc>, window_params = [{transform_indices = @transform_0, window_bounds = array<i64: 16, 32>}, {transform_indices = @transform_1, window_bounds = array<i64: 1, 32, 32>}, {transform_indices = @transform_2, window_bounds = array<i64: 1, 1, 32>}, {transform_indices = @transform_3, window_bounds = array<i64: 1, 16, 32>}]} {
    %c0_i32 = arith.constant 0 : i32
    %0 = arith.cmpi eq, %arg3, %c0_i32 : i32
    %1 = arith.extui %0 : i1 to i32
    %c0_i32_0 = arith.constant 0 : i32
    %2 = arith.cmpi ne, %1, %c0_i32_0 : i32
    scf.if %2 {
      %cst_11 = arith.constant 0.000000e+00 : f32
      %13 = vector.broadcast %cst_11 : f32 to vector<16x32xf32>
      %c0_12 = arith.constant 0 : index
      %c0_13 = arith.constant 0 : index
      %14 = vector.load %arg8[%c0_12, %c0_13] : memref<16x32xf32, #tpu.memory_space<vmem>>, vector<16x32xf32>
      tpu.vector_store %arg8[%c0_12, %c0_13], %13 {strides = array<i32>} : memref<16x32xf32, #tpu.memory_space<vmem>>, vector<16x32xf32>,
    } else {
    }
    %c0 = arith.constant 0 : index
    %c0_1 = arith.constant 0 : index
    %3 = vector.load %arg8[%c0, %c0_1] : memref<16x32xf32, #tpu.memory_space<vmem>>, vector<16x32xf32>
    %c0_2 = arith.constant 0 : index
    %c0_3 = arith.constant 0 : index
    %4 = vector.load %arg4[%c0_2, %c0_3] : memref<16x32xbf16, #tpu.memory_space<vmem>>, vector<16x32xbf16>
    %c0_4 = arith.constant 0 : index
    %c0_5 = arith.constant 0 : index
    %c0_6 = arith.constant 0 : index
    %5 = vector.load %arg5[%c0_4, %c0_5, %c0_6] : memref<1x32x32xbf16, #tpu.memory_space<vmem>>, vector<1x32x32xbf16>
    %6 = vector.shape_cast %5 : vector<1x32x32xbf16> to vector<32x32xbf16>
    %cst = arith.constant dense<0.000000e+00> : vector<16x32xf32>
    %7 = tpu.matmul %4, %6, %cst {dimension_numbers = #tpu.dot_dimension_numbers<[1], [0], [0], [1], [0, 0, 1, 1], [], []>} : vector<16x32xbf16>, vector<32x32xbf16>, vector<16x32xf32> -> vector<16x32xf32>
    %8 = arith.addf %3, %7 : vector<16x32xf32>
    %c0_7 = arith.constant 0 : index
    %c0_8 = arith.constant 0 : index
    %9 = vector.load %arg8[%c0_7, %c0_8] : memref<16x32xf32, #tpu.memory_space<vmem>>, vector<16x32xf32>
    tpu.vector_store %arg8[%c0_7, %c0_8], %8 {strides = array<i32>} : memref<16x32xf32, #tpu.memory_space<vmem>>, vector<16x32xf32>,
    %c0_i32_9 = arith.constant 0 : i32
    %10 = arith.cmpi eq, %arg3, %c0_i32_9 : i32
    %11 = arith.extui %10 : i1 to i32
    %c0_i32_10 = arith.constant 0 : i32
    %12 = arith.cmpi ne, %11, %c0_i32_10 : i32
    scf.if %12 {
      %c0_11 = arith.constant 0 : index
      %c0_12 = arith.constant 0 : index
      %13 = vector.load %arg8[%c0_11, %c0_12] : memref<16x32xf32, #tpu.memory_space<vmem>>, vector<16x32xf32>
      %c0_13 = arith.constant 0 : index
      %c0_14 = arith.constant 0 : index
      %c0_15 = arith.constant 0 : index
      %14 = vector.load %arg6[%c0_13, %c0_14, %c0_15] : memref<1x1x32xf32, #tpu.memory_space<vmem>>, vector<1x1x32xf32>
      %15 = vector.shape_cast %14 : vector<1x1x32xf32> to vector<1x32xf32>
      %16 = vector.broadcast %15 : vector<1x32xf32> to vector<16x32xf32>
      %17 = arith.addf %13, %16 : vector<16x32xf32>
      %18 = arith.truncf %17 : vector<16x32xf32> to vector<16x32xbf16>
      %c0_16 = arith.constant 0 : index
      %c0_17 = arith.constant 0 : index
      %c0_18 = arith.constant 0 : index
      %19 = vector.load %arg7[%c0_16, %c0_17, %c0_18] : memref<1x16x32xbf16, #tpu.memory_space<vmem>>, vector<1x16x32xbf16>
      %20 = vector.shape_cast %19 : vector<1x16x32xbf16> to vector<16x32xbf16>
      %21 = vector.shape_cast %18 : vector<16x32xbf16> to vector<1x16x32xbf16>
      tpu.vector_store %arg7[%c0_16, %c0_17, %c0_18], %21 {strides = array<i32>} : memref<1x16x32xbf16, #tpu.memory_space<vmem>>, vector<1x16x32xbf16>,
    } else {
    }
    return
  }
  func.func @transform_0(%arg0: i32, %arg1: i32, %arg2: i32, %arg3: i32) -> (i32, i32) {
    %c0_i32 = arith.constant 0 : i32
    return %arg1, %arg3 : i32, i32
  }
  func.func @transform_1(%arg0: i32, %arg1: i32, %arg2: i32, %arg3: i32) -> (i32, i32, i32) {
    %c0_i32 = arith.constant 0 : i32
    return %arg0, %arg3, %arg2 : i32, i32, i32
  }
  func.func @transform_2(%arg0: i32, %arg1: i32, %arg2: i32, %arg3: i32) -> (i32, i32, i32) {
    %c0_i32 = arith.constant 0 : i32
    %c0_i32_0 = arith.constant 0 : i32
    return %arg0, %c0_i32, %arg2 : i32, i32, i32
  }
  func.func @transform_3(%arg0: i32, %arg1: i32, %arg2: i32, %arg3: i32) -> (i32, i32, i32) {
    %c0_i32 = arith.constant 0 : i32
    return %arg0, %arg1, %arg2 : i32, i32, i32
  }
}

module attributes {stable_mosaic.version = 11 : i64} {
  func.func @_mha_kernel(%arg0: i32, %arg1: i32, %arg2: memref<1x1x8x32xbf16, #tpu.memory_space<vmem>>, %arg3: memref<1x1x8x32xbf16, #tpu.memory_space<vmem>>, %arg4: memref<1x1x8x32xbf16, #tpu.memory_space<vmem>>, %arg5: memref<1x1x8xf32, #tpu.memory_space<vmem>>, %arg6: memref<1x8x32xbf16, #tpu.memory_space<vmem>>, %arg7: memref<8x32xf32, #tpu.memory_space<vmem>>) attributes {dimension_semantics = [#tpu.dimension_semantics<parallel>, #tpu.dimension_semantics<parallel>], iteration_bounds = array<i64: 2, 1>, scalar_prefetch = 0 : i64, scratch_operands = 1 : i64, tpu.core_type = #tpu.core_type<tc>, window_params = [{transform_indices = @transform_0, window_bounds = array<i64: 1, 1, 8, 32>}, {transform_indices = @transform_1, window_bounds = array<i64: 1, 1, 8, 32>}, {transform_indices = @transform_2, window_bounds = array<i64: 1, 1, 8, 32>}, {transform_indices = @transform_3, window_bounds = array<i64: 1, 1, 8>}, {transform_indices = @transform_4, window_bounds = array<i64: 1, 8, 32>}]} {
    %c0 = arith.constant 0 : index
    %c0_0 = arith.constant 0 : index
    %c0_1 = arith.constant 0 : index
    %c0_2 = arith.constant 0 : index
    %0 = vector.load %arg2[%c0, %c0_0, %c0_1, %c0_2] : memref<1x1x8x32xbf16, #tpu.memory_space<vmem>>, vector<1x1x8x32xbf16>
    %1 = vector.shape_cast %0 : vector<1x1x8x32xbf16> to vector<8x32xbf16>
    %cst = arith.constant 3.535160e-01 : bf16
    %2 = vector.broadcast %cst : bf16 to vector<8x32xbf16>
    %3 = arith.mulf %1, %2 : vector<8x32xbf16>
    %c0_3 = arith.constant 0 : index
    %c0_4 = arith.constant 0 : index
    %c0_5 = arith.constant 0 : index
    %c0_6 = arith.constant 0 : index
    %4 = vector.load %arg3[%c0_3, %c0_4, %c0_5, %c0_6] : memref<1x1x8x32xbf16, #tpu.memory_space<vmem>>, vector<1x1x8x32xbf16>
    %5 = vector.shape_cast %4 : vector<1x1x8x32xbf16> to vector<8x32xbf16>
    %c0_7 = arith.constant 0 : index
    %c0_8 = arith.constant 0 : index
    %c0_9 = arith.constant 0 : index
    %c0_10 = arith.constant 0 : index
    %6 = vector.load %arg4[%c0_7, %c0_8, %c0_9, %c0_10] : memref<1x1x8x32xbf16, #tpu.memory_space<vmem>>, vector<1x1x8x32xbf16>
    %7 = vector.shape_cast %6 : vector<1x1x8x32xbf16> to vector<8x32xbf16>
    %c0_11 = arith.constant 0 : index
    %c0_12 = arith.constant 0 : index
    %c0_13 = arith.constant 0 : index
    %8 = vector.load %arg5[%c0_11, %c0_12, %c0_13] : memref<1x1x8xf32, #tpu.memory_space<vmem>>, vector<1x1x8xf32>
    %9 = vector.shape_cast %8 : vector<1x1x8xf32> to vector<1x8xf32>
    %c8_i32 = arith.constant 8 : i32
    %10 = arith.muli %arg1, %c8_i32 : i32
    %11 = tpu.iota {dimensions = array<i32: 0>} : vector<8x8xi32>
    %12 = vector.broadcast %10 : i32 to vector<8x8xi32>
    %13 = arith.addi %11, %12 : vector<8x8xi32>
    %14 = tpu.iota {dimensions = array<i32: 1>} : vector<8x8xi32>
    %15 = arith.cmpi sge, %13, %14 : vector<8x8xi32>
    %cst_14 = arith.constant 0.000000e+00 : f32
    %cst_15 = arith.constant -1.000000e+09 : f32
    %16 = vector.broadcast %cst_14 : f32 to vector<8x8xf32>
    %17 = vector.broadcast %cst_15 : f32 to vector<8x8xf32>
    %18 = arith.select %15, %16, %17 : vector<8x8xi1>, vector<8x8xf32>
    %19 = vector.broadcast %9 : vector<1x8xf32> to vector<8x8xf32>
    %20 = arith.addf %19, %18 : vector<8x8xf32>
    %21 = vector.extract_strided_slice %3 {offsets = [0, 0], sizes = [8, 8], strides = [1, 1]} : vector<8x32xbf16> to vector<8x8xbf16>
    %22 = vector.extract_strided_slice %5 {offsets = [0, 0], sizes = [8, 8], strides = [1, 1]} : vector<8x32xbf16> to vector<8x8xbf16>
    %23 = vector.extract_strided_slice %7 {offsets = [0, 0], sizes = [8, 8], strides = [1, 1]} : vector<8x32xbf16> to vector<8x8xbf16>
    %cst_16 = arith.constant dense<0.000000e+00> : vector<8x8xf32>
    %24 = tpu.matmul %21, %22, %cst_16 {dimension_numbers = #tpu.dot_dimension_numbers<[1], [1], [0], [0], [0, 0, 1, 0], [], []>} : vector<8x8xbf16>, vector<8x8xbf16>, vector<8x8xf32> -> vector<8x8xf32>
    %25 = arith.addf %24, %20 : vector<8x8xf32>
    %cst_17 = arith.constant dense<0xFF800000> : vector<8xf32>
    %26 = vector.multi_reduction <maximumf>, %25, %cst_17 [1] : vector<8x8xf32> to vector<8xf32>
    %27 = vector.shape_cast %26 : vector<8xf32> to vector<8x1xf32>
    %28 = vector.broadcast %27 : vector<8x1xf32> to vector<8x8xf32>
    %29 = arith.subf %25, %28 : vector<8x8xf32>
    %30 = math.exp %29 : vector<8x8xf32>
    %cst_18 = arith.constant dense<0.000000e+00> : vector<8xf32>
    %31 = vector.multi_reduction <add>, %30, %cst_18 [1] : vector<8x8xf32> to vector<8xf32>
    %32 = vector.shape_cast %31 : vector<8xf32> to vector<8x1xf32>
    %33 = tpu.reciprocal %32 {approx = true} : vector<8x1xf32> -> vector<8x1xf32>
    %34 = vector.broadcast %33 : vector<8x1xf32> to vector<8x8xf32>
    %35 = arith.mulf %30, %34 : vector<8x8xf32>
    %36 = arith.truncf %35 : vector<8x8xf32> to vector<8x8xbf16>
    %cst_19 = arith.constant dense<0.000000e+00> : vector<8x8xf32>
    %37 = tpu.matmul %36, %23, %cst_19 {dimension_numbers = #tpu.dot_dimension_numbers<[1], [0], [0], [1], [0, 0, 1, 1], [], []>} : vector<8x8xbf16>, vector<8x8xbf16>, vector<8x8xf32> -> vector<8x8xf32>
    %c0_20 = arith.constant 0 : index
    %c0_21 = arith.constant 0 : index
    %38 = vector.load %arg7[%c0_20, %c0_21] : memref<8x32xf32, #tpu.memory_space<vmem>>, vector<8x8xf32>
    tpu.vector_store %arg7[%c0_20, %c0_21], %37 {strides = array<i32>} : memref<8x32xf32, #tpu.memory_space<vmem>>, vector<8x8xf32>,
    %39 = vector.extract_strided_slice %3 {offsets = [0, 8], sizes = [8, 8], strides = [1, 1]} : vector<8x32xbf16> to vector<8x8xbf16>
    %40 = vector.extract_strided_slice %5 {offsets = [0, 8], sizes = [8, 8], strides = [1, 1]} : vector<8x32xbf16> to vector<8x8xbf16>
    %41 = vector.extract_strided_slice %7 {offsets = [0, 8], sizes = [8, 8], strides = [1, 1]} : vector<8x32xbf16> to vector<8x8xbf16>
    %cst_22 = arith.constant dense<0.000000e+00> : vector<8x8xf32>
    %42 = tpu.matmul %39, %40, %cst_22 {dimension_numbers = #tpu.dot_dimension_numbers<[1], [1], [0], [0], [0, 0, 1, 0], [], []>} : vector<8x8xbf16>, vector<8x8xbf16>, vector<8x8xf32> -> vector<8x8xf32>
    %43 = arith.addf %42, %20 : vector<8x8xf32>
    %cst_23 = arith.constant dense<0xFF800000> : vector<8xf32>
    %44 = vector.multi_reduction <maximumf>, %43, %cst_23 [1] : vector<8x8xf32> to vector<8xf32>
    %45 = vector.shape_cast %44 : vector<8xf32> to vector<8x1xf32>
    %46 = vector.broadcast %45 : vector<8x1xf32> to vector<8x8xf32>
    %47 = arith.subf %43, %46 : vector<8x8xf32>
    %48 = math.exp %47 : vector<8x8xf32>
    %cst_24 = arith.constant dense<0.000000e+00> : vector<8xf32>
    %49 = vector.multi_reduction <add>, %48, %cst_24 [1] : vector<8x8xf32> to vector<8xf32>
    %50 = vector.shape_cast %49 : vector<8xf32> to vector<8x1xf32>
    %51 = tpu.reciprocal %50 {approx = true} : vector<8x1xf32> -> vector<8x1xf32>
    %52 = vector.broadcast %51 : vector<8x1xf32> to vector<8x8xf32>
    %53 = arith.mulf %48, %52 : vector<8x8xf32>
    %54 = arith.truncf %53 : vector<8x8xf32> to vector<8x8xbf16>
    %cst_25 = arith.constant dense<0.000000e+00> : vector<8x8xf32>
    %55 = tpu.matmul %54, %41, %cst_25 {dimension_numbers = #tpu.dot_dimension_numbers<[1], [0], [0], [1], [0, 0, 1, 1], [], []>} : vector<8x8xbf16>, vector<8x8xbf16>, vector<8x8xf32> -> vector<8x8xf32>
    %c0_26 = arith.constant 0 : index
    %c8 = arith.constant 8 : index
    %56 = vector.load %arg7[%c0_26, %c8] : memref<8x32xf32, #tpu.memory_space<vmem>>, vector<8x8xf32>
    tpu.vector_store %arg7[%c0_26, %c8], %55 {strides = array<i32>} : memref<8x32xf32, #tpu.memory_space<vmem>>, vector<8x8xf32>,
    %57 = vector.extract_strided_slice %3 {offsets = [0, 16], sizes = [8, 8], strides = [1, 1]} : vector<8x32xbf16> to vector<8x8xbf16>
    %58 = vector.extract_strided_slice %5 {offsets = [0, 16], sizes = [8, 8], strides = [1, 1]} : vector<8x32xbf16> to vector<8x8xbf16>
    %59 = vector.extract_strided_slice %7 {offsets = [0, 16], sizes = [8, 8], strides = [1, 1]} : vector<8x32xbf16> to vector<8x8xbf16>
    %cst_27 = arith.constant dense<0.000000e+00> : vector<8x8xf32>
    %60 = tpu.matmul %57, %58, %cst_27 {dimension_numbers = #tpu.dot_dimension_numbers<[1], [1], [0], [0], [0, 0, 1, 0], [], []>} : vector<8x8xbf16>, vector<8x8xbf16>, vector<8x8xf32> -> vector<8x8xf32>
    %61 = arith.addf %60, %20 : vector<8x8xf32>
    %cst_28 = arith.constant dense<0xFF800000> : vector<8xf32>
    %62 = vector.multi_reduction <maximumf>, %61, %cst_28 [1] : vector<8x8xf32> to vector<8xf32>
    %63 = vector.shape_cast %62 : vector<8xf32> to vector<8x1xf32>
    %64 = vector.broadcast %63 : vector<8x1xf32> to vector<8x8xf32>
    %65 = arith.subf %61, %64 : vector<8x8xf32>
    %66 = math.exp %65 : vector<8x8xf32>
    %cst_29 = arith.constant dense<0.000000e+00> : vector<8xf32>
    %67 = vector.multi_reduction <add>, %66, %cst_29 [1] : vector<8x8xf32> to vector<8xf32>
    %68 = vector.shape_cast %67 : vector<8xf32> to vector<8x1xf32>
    %69 = tpu.reciprocal %68 {approx = true} : vector<8x1xf32> -> vector<8x1xf32>
    %70 = vector.broadcast %69 : vector<8x1xf32> to vector<8x8xf32>
    %71 = arith.mulf %66, %70 : vector<8x8xf32>
    %72 = arith.truncf %71 : vector<8x8xf32> to vector<8x8xbf16>
    %cst_30 = arith.constant dense<0.000000e+00> : vector<8x8xf32>
    %73 = tpu.matmul %72, %59, %cst_30 {dimension_numbers = #tpu.dot_dimension_numbers<[1], [0], [0], [1], [0, 0, 1, 1], [], []>} : vector<8x8xbf16>, vector<8x8xbf16>, vector<8x8xf32> -> vector<8x8xf32>
    %c0_31 = arith.constant 0 : index
    %c16 = arith.constant 16 : index
    %74 = vector.load %arg7[%c0_31, %c16] : memref<8x32xf32, #tpu.memory_space<vmem>>, vector<8x8xf32>
    tpu.vector_store %arg7[%c0_31, %c16], %73 {strides = array<i32>} : memref<8x32xf32, #tpu.memory_space<vmem>>, vector<8x8xf32>,
    %75 = vector.extract_strided_slice %3 {offsets = [0, 24], sizes = [8, 8], strides = [1, 1]} : vector<8x32xbf16> to vector<8x8xbf16>
    %76 = vector.extract_strided_slice %5 {offsets = [0, 24], sizes = [8, 8], strides = [1, 1]} : vector<8x32xbf16> to vector<8x8xbf16>
    %77 = vector.extract_strided_slice %7 {offsets = [0, 24], sizes = [8, 8], strides = [1, 1]} : vector<8x32xbf16> to vector<8x8xbf16>
    %cst_32 = arith.constant dense<0.000000e+00> : vector<8x8xf32>
    %78 = tpu.matmul %75, %76, %cst_32 {dimension_numbers = #tpu.dot_dimension_numbers<[1], [1], [0], [0], [0, 0, 1, 0], [], []>} : vector<8x8xbf16>, vector<8x8xbf16>, vector<8x8xf32> -> vector<8x8xf32>
    %79 = arith.addf %78, %20 : vector<8x8xf32>
    %cst_33 = arith.constant dense<0xFF800000> : vector<8xf32>
    %80 = vector.multi_reduction <maximumf>, %79, %cst_33 [1] : vector<8x8xf32> to vector<8xf32>
    %81 = vector.shape_cast %80 : vector<8xf32> to vector<8x1xf32>
    %82 = vector.broadcast %81 : vector<8x1xf32> to vector<8x8xf32>
    %83 = arith.subf %79, %82 : vector<8x8xf32>
    %84 = math.exp %83 : vector<8x8xf32>
    %cst_34 = arith.constant dense<0.000000e+00> : vector<8xf32>
    %85 = vector.multi_reduction <add>, %84, %cst_34 [1] : vector<8x8xf32> to vector<8xf32>
    %86 = vector.shape_cast %85 : vector<8xf32> to vector<8x1xf32>
    %87 = tpu.reciprocal %86 {approx = true} : vector<8x1xf32> -> vector<8x1xf32>
    %88 = vector.broadcast %87 : vector<8x1xf32> to vector<8x8xf32>
    %89 = arith.mulf %84, %88 : vector<8x8xf32>
    %90 = arith.truncf %89 : vector<8x8xf32> to vector<8x8xbf16>
    %cst_35 = arith.constant dense<0.000000e+00> : vector<8x8xf32>
    %91 = tpu.matmul %90, %77, %cst_35 {dimension_numbers = #tpu.dot_dimension_numbers<[1], [0], [0], [1], [0, 0, 1, 1], [], []>} : vector<8x8xbf16>, vector<8x8xbf16>, vector<8x8xf32> -> vector<8x8xf32>
    %c0_36 = arith.constant 0 : index
    %c24 = arith.constant 24 : index
    %92 = vector.load %arg7[%c0_36, %c24] : memref<8x32xf32, #tpu.memory_space<vmem>>, vector<8x8xf32>
    tpu.vector_store %arg7[%c0_36, %c24], %91 {strides = array<i32>} : memref<8x32xf32, #tpu.memory_space<vmem>>, vector<8x8xf32>,
    %c0_37 = arith.constant 0 : index
    %c0_38 = arith.constant 0 : index
    %93 = vector.load %arg7[%c0_37, %c0_38] : memref<8x32xf32, #tpu.memory_space<vmem>>, vector<8x32xf32>
    %94 = arith.truncf %93 : vector<8x32xf32> to vector<8x32xbf16>
    %c0_39 = arith.constant 0 : index
    %c0_40 = arith.constant 0 : index
    %c0_41 = arith.constant 0 : index
    %95 = vector.load %arg6[%c0_39, %c0_40, %c0_41] : memref<1x8x32xbf16, #tpu.memory_space<vmem>>, vector<1x8x32xbf16>
    %96 = vector.shape_cast %95 : vector<1x8x32xbf16> to vector<8x32xbf16>
    %97 = vector.shape_cast %94 : vector<8x32xbf16> to vector<1x8x32xbf16>
    tpu.vector_store %arg6[%c0_39, %c0_40, %c0_41], %97 {strides = array<i32>} : memref<1x8x32xbf16, #tpu.memory_space<vmem>>, vector<1x8x32xbf16>,
    return
  }
  func.func @transform_0(%arg0: i32, %arg1: i32) -> (i32, i32, i32, i32) {
    %c0_i32 = arith.constant 0 : i32
    %c0_i32_0 = arith.constant 0 : i32
    %c0_i32_1 = arith.constant 0 : i32
    return %c0_i32, %arg0, %arg1, %c0_i32_0 : i32, i32, i32, i32
  }
  func.func @transform_1(%arg0: i32, %arg1: i32) -> (i32, i32, i32, i32) {
    %c1_i32 = arith.constant 1 : i32
    %c0_i32 = arith.constant 0 : i32
    %c0_i32_0 = arith.constant 0 : i32
    %c0_i32_1 = arith.constant 0 : i32
    return %c1_i32, %arg0, %c0_i32, %c0_i32_0 : i32, i32, i32, i32
  }
  func.func @transform_2(%arg0: i32, %arg1: i32) -> (i32, i32, i32, i32) {
    %c2_i32 = arith.constant 2 : i32
    %c0_i32 = arith.constant 0 : i32
    %c0_i32_0 = arith.constant 0 : i32
    %c0_i32_1 = arith.constant 0 : i32
    return %c2_i32, %arg0, %c0_i32, %c0_i32_0 : i32, i32, i32, i32
  }
  func.func @transform_3(%arg0: i32, %arg1: i32) -> (i32, i32, i32) {
    %c0_i32 = arith.constant 0 : i32
    %c0_i32_0 = arith.constant 0 : i32
    %c0_i32_1 = arith.constant 0 : i32
    return %arg0, %c0_i32, %c0_i32_0 : i32, i32, i32
  }
  func.func @transform_4(%arg0: i32, %arg1: i32) -> (i32, i32, i32) {
    %c0_i32 = arith.constant 0 : i32
    %c0_i32_0 = arith.constant 0 : i32
    return %arg0, %arg1, %c0_i32 : i32, i32, i32
  }
}

module attributes {stable_mosaic.version = 11 : i64} {
  func.func @_linear_kernel(%arg0: i32, %arg1: i32, %arg2: i32, %arg3: i32, %arg4: memref<16x32xbf16, #tpu.memory_space<vmem>>, %arg5: memref<1x32x32xbf16, #tpu.memory_space<vmem>>, %arg6: memref<1x1x32xf32, #tpu.memory_space<vmem>>, %arg7: memref<1x16x32xbf16, #tpu.memory_space<vmem>>, %arg8: memref<16x32xf32, #tpu.memory_space<vmem>>) attributes {dimension_semantics = [#tpu.dimension_semantics<parallel>, #tpu.dimension_semantics<parallel>, #tpu.dimension_semantics<parallel>, #tpu.dimension_semantics<arbitrary>], iteration_bounds = array<i64: 1, 1, 1, 1>, scalar_prefetch = 0 : i64, scratch_operands = 1 : i64, tpu.core_type = #tpu.core_type<tc>, window_params = [{transform_indices = @transform_0, window_bounds = array<i64: 16, 32>}, {transform_indices = @transform_1, window_bounds = array<i64: 1, 32, 32>}, {transform_indices = @transform_2, window_bounds = array<i64: 1, 1, 32>}, {transform_indices = @transform_3, window_bounds = array<i64: 1, 16, 32>}]} {
    %c0_i32 = arith.constant 0 : i32
    %0 = arith.cmpi eq, %arg3, %c0_i32 : i32
    %1 = arith.extui %0 : i1 to i32
    %c0_i32_0 = arith.constant 0 : i32
    %2 = arith.cmpi ne, %1, %c0_i32_0 : i32
    scf.if %2 {
      %cst_11 = arith.constant 0.000000e+00 : f32
      %13 = vector.broadcast %cst_11 : f32 to vector<16x32xf32>
      %c0_12 = arith.constant 0 : index
      %c0_13 = arith.constant 0 : index
      %14 = vector.load %arg8[%c0_12, %c0_13] : memref<16x32xf32, #tpu.memory_space<vmem>>, vector<16x32xf32>
      tpu.vector_store %arg8[%c0_12, %c0_13], %13 {strides = array<i32>} : memref<16x32xf32, #tpu.memory_space<vmem>>, vector<16x32xf32>,
    } else {
    }
    %c0 = arith.constant 0 : index
    %c0_1 = arith.constant 0 : index
    %3 = vector.load %arg8[%c0, %c0_1] : memref<16x32xf32, #tpu.memory_space<vmem>>, vector<16x32xf32>
    %c0_2 = arith.constant 0 : index
    %c0_3 = arith.constant 0 : index
    %4 = vector.load %arg4[%c0_2, %c0_3] : memref<16x32xbf16, #tpu.memory_space<vmem>>, vector<16x32xbf16>
    %c0_4 = arith.constant 0 : index
    %c0_5 = arith.constant 0 : index
    %c0_6 = arith.constant 0 : index
    %5 = vector.load %arg5[%c0_4, %c0_5, %c0_6] : memref<1x32x32xbf16, #tpu.memory_space<vmem>>, vector<1x32x32xbf16>
    %6 = vector.shape_cast %5 : vector<1x32x32xbf16> to vector<32x32xbf16>
    %cst = arith.constant dense<0.000000e+00> : vector<16x32xf32>
    %7 = tpu.matmul %4, %6, %cst {dimension_numbers = #tpu.dot_dimension_numbers<[1], [0], [0], [1], [0, 0, 1, 1], [], []>} : vector<16x32xbf16>, vector<32x32xbf16>, vector<16x32xf32> -> vector<16x32xf32>
    %8 = arith.addf %3, %7 : vector<16x32xf32>
    %c0_7 = arith.constant 0 : index
    %c0_8 = arith.constant 0 : index
    %9 = vector.load %arg8[%c0_7, %c0_8] : memref<16x32xf32, #tpu.memory_space<vmem>>, vector<16x32xf32>
    tpu.vector_store %arg8[%c0_7, %c0_8], %8 {strides = array<i32>} : memref<16x32xf32, #tpu.memory_space<vmem>>, vector<16x32xf32>,
    %c0_i32_9 = arith.constant 0 : i32
    %10 = arith.cmpi eq, %arg3, %c0_i32_9 : i32
    %11 = arith.extui %10 : i1 to i32
    %c0_i32_10 = arith.constant 0 : i32
    %12 = arith.cmpi ne, %11, %c0_i32_10 : i32
    scf.if %12 {
      %c0_11 = arith.constant 0 : index
      %c0_12 = arith.constant 0 : index
      %13 = vector.load %arg8[%c0_11, %c0_12] : memref<16x32xf32, #tpu.memory_space<vmem>>, vector<16x32xf32>
      %c0_13 = arith.constant 0 : index
      %c0_14 = arith.constant 0 : index
      %c0_15 = arith.constant 0 : index
      %14 = vector.load %arg6[%c0_13, %c0_14, %c0_15] : memref<1x1x32xf32, #tpu.memory_space<vmem>>, vector<1x1x32xf32>
      %15 = vector.shape_cast %14 : vector<1x1x32xf32> to vector<1x32xf32>
      %16 = vector.broadcast %15 : vector<1x32xf32> to vector<16x32xf32>
      %17 = arith.addf %13, %16 : vector<16x32xf32>
      %18 = arith.truncf %17 : vector<16x32xf32> to vector<16x32xbf16>
      %c0_16 = arith.constant 0 : index
      %c0_17 = arith.constant 0 : index
      %c0_18 = arith.constant 0 : index
      %19 = vector.load %arg7[%c0_16, %c0_17, %c0_18] : memref<1x16x32xbf16, #tpu.memory_space<vmem>>, vector<1x16x32xbf16>
      %20 = vector.shape_cast %19 : vector<1x16x32xbf16> to vector<16x32xbf16>
      %21 = vector.shape_cast %18 : vector<16x32xbf16> to vector<1x16x32xbf16>
      tpu.vector_store %arg7[%c0_16, %c0_17, %c0_18], %21 {strides = array<i32>} : memref<1x16x32xbf16, #tpu.memory_space<vmem>>, vector<1x16x32xbf16>,
    } else {
    }
    return
  }
  func.func @transform_0(%arg0: i32, %arg1: i32, %arg2: i32, %arg3: i32) -> (i32, i32) {
    %c0_i32 = arith.constant 0 : i32
    return %arg1, %arg3 : i32, i32
  }
  func.func @transform_1(%arg0: i32, %arg1: i32, %arg2: i32, %arg3: i32) -> (i32, i32, i32) {
    %c0_i32 = arith.constant 0 : i32
    return %arg0, %arg3, %arg2 : i32, i32, i32
  }
  func.func @transform_2(%arg0: i32, %arg1: i32, %arg2: i32, %arg3: i32) -> (i32, i32, i32) {
    %c0_i32 = arith.constant 0 : i32
    %c0_i32_0 = arith.constant 0 : i32
    return %arg0, %c0_i32, %arg2 : i32, i32, i32
  }
  func.func @transform_3(%arg0: i32, %arg1: i32, %arg2: i32, %arg3: i32) -> (i32, i32, i32) {
    %c0_i32 = arith.constant 0 : i32
    return %arg0, %arg1, %arg2 : i32, i32, i32
  }
}

module attributes {stable_mosaic.version = 11 : i64} {
  func.func @_mha_kernel(%arg0: i32, %arg1: i32, %arg2: memref<1x1x8x32xbf16, #tpu.memory_space<vmem>>, %arg3: memref<1x1x8x32xbf16, #tpu.memory_space<vmem>>, %arg4: memref<1x1x8x32xbf16, #tpu.memory_space<vmem>>, %arg5: memref<1x1x8xf32, #tpu.memory_space<vmem>>, %arg6: memref<1x8x32xbf16, #tpu.memory_space<vmem>>, %arg7: memref<8x32xf32, #tpu.memory_space<vmem>>) attributes {dimension_semantics = [#tpu.dimension_semantics<parallel>, #tpu.dimension_semantics<parallel>], iteration_bounds = array<i64: 2, 1>, scalar_prefetch = 0 : i64, scratch_operands = 1 : i64, tpu.core_type = #tpu.core_type<tc>, window_params = [{transform_indices = @transform_0, window_bounds = array<i64: 1, 1, 8, 32>}, {transform_indices = @transform_1, window_bounds = array<i64: 1, 1, 8, 32>}, {transform_indices = @transform_2, window_bounds = array<i64: 1, 1, 8, 32>}, {transform_indices = @transform_3, window_bounds = array<i64: 1, 1, 8>}, {transform_indices = @transform_4, window_bounds = array<i64: 1, 8, 32>}]} {
    %c0 = arith.constant 0 : index
    %c0_0 = arith.constant 0 : index
    %c0_1 = arith.constant 0 : index
    %c0_2 = arith.constant 0 : index
    %0 = vector.load %arg2[%c0, %c0_0, %c0_1, %c0_2] : memref<1x1x8x32xbf16, #tpu.memory_space<vmem>>, vector<1x1x8x32xbf16>
    %1 = vector.shape_cast %0 : vector<1x1x8x32xbf16> to vector<8x32xbf16>
    %cst = arith.constant 3.535160e-01 : bf16
    %2 = vector.broadcast %cst : bf16 to vector<8x32xbf16>
    %3 = arith.mulf %1, %2 : vector<8x32xbf16>
    %c0_3 = arith.constant 0 : index
    %c0_4 = arith.constant 0 : index
    %c0_5 = arith.constant 0 : index
    %c0_6 = arith.constant 0 : index
    %4 = vector.load %arg3[%c0_3, %c0_4, %c0_5, %c0_6] : memref<1x1x8x32xbf16, #tpu.memory_space<vmem>>, vector<1x1x8x32xbf16>
    %5 = vector.shape_cast %4 : vector<1x1x8x32xbf16> to vector<8x32xbf16>
    %c0_7 = arith.constant 0 : index
    %c0_8 = arith.constant 0 : index
    %c0_9 = arith.constant 0 : index
    %c0_10 = arith.constant 0 : index
    %6 = vector.load %arg4[%c0_7, %c0_8, %c0_9, %c0_10] : memref<1x1x8x32xbf16, #tpu.memory_space<vmem>>, vector<1x1x8x32xbf16>
    %7 = vector.shape_cast %6 : vector<1x1x8x32xbf16> to vector<8x32xbf16>
    %c0_11 = arith.constant 0 : index
    %c0_12 = arith.constant 0 : index
    %c0_13 = arith.constant 0 : index
    %8 = vector.load %arg5[%c0_11, %c0_12, %c0_13] : memref<1x1x8xf32, #tpu.memory_space<vmem>>, vector<1x1x8xf32>
    %9 = vector.shape_cast %8 : vector<1x1x8xf32> to vector<1x8xf32>
    %10 = vector.extract_strided_slice %3 {offsets = [0, 0], sizes = [8, 8], strides = [1, 1]} : vector<8x32xbf16> to vector<8x8xbf16>
    %11 = vector.extract_strided_slice %5 {offsets = [0, 0], sizes = [8, 8], strides = [1, 1]} : vector<8x32xbf16> to vector<8x8xbf16>
    %12 = vector.extract_strided_slice %7 {offsets = [0, 0], sizes = [8, 8], strides = [1, 1]} : vector<8x32xbf16> to vector<8x8xbf16>
    %cst_14 = arith.constant dense<0.000000e+00> : vector<8x8xf32>
    %13 = tpu.matmul %10, %11, %cst_14 {dimension_numbers = #tpu.dot_dimension_numbers<[1], [1], [0], [0], [0, 0, 1, 0], [], []>} : vector<8x8xbf16>, vector<8x8xbf16>, vector<8x8xf32> -> vector<8x8xf32>
    %14 = vector.broadcast %9 : vector<1x8xf32> to vector<8x8xf32>
    %15 = arith.addf %13, %14 : vector<8x8xf32>
    %cst_15 = arith.constant dense<0xFF800000> : vector<8xf32>
    %16 = vector.multi_reduction <maximumf>, %15, %cst_15 [1] : vector<8x8xf32> to vector<8xf32>
    %17 = vector.shape_cast %16 : vector<8xf32> to vector<8x1xf32>
    %18 = vector.broadcast %17 : vector<8x1xf32> to vector<8x8xf32>
    %19 = arith.subf %15, %18 : vector<8x8xf32>
    %20 = math.exp %19 : vector<8x8xf32>
    %cst_16 = arith.constant dense<0.000000e+00> : vector<8xf32>
    %21 = vector.multi_reduction <add>, %20, %cst_16 [1] : vector<8x8xf32> to vector<8xf32>
    %22 = vector.shape_cast %21 : vector<8xf32> to vector<8x1xf32>
    %23 = tpu.reciprocal %22 {approx = true} : vector<8x1xf32> -> vector<8x1xf32>
    %24 = vector.broadcast %23 : vector<8x1xf32> to vector<8x8xf32>
    %25 = arith.mulf %20, %24 : vector<8x8xf32>
    %26 = arith.truncf %25 : vector<8x8xf32> to vector<8x8xbf16>
    %cst_17 = arith.constant dense<0.000000e+00> : vector<8x8xf32>
    %27 = tpu.matmul %26, %12, %cst_17 {dimension_numbers = #tpu.dot_dimension_numbers<[1], [0], [0], [1], [0, 0, 1, 1], [], []>} : vector<8x8xbf16>, vector<8x8xbf16>, vector<8x8xf32> -> vector<8x8xf32>
    %c0_18 = arith.constant 0 : index
    %c0_19 = arith.constant 0 : index
    %28 = vector.load %arg7[%c0_18, %c0_19] : memref<8x32xf32, #tpu.memory_space<vmem>>, vector<8x8xf32>
    tpu.vector_store %arg7[%c0_18, %c0_19], %27 {strides = array<i32>} : memref<8x32xf32, #tpu.memory_space<vmem>>, vector<8x8xf32>,
    %29 = vector.extract_strided_slice %3 {offsets = [0, 8], sizes = [8, 8], strides = [1, 1]} : vector<8x32xbf16> to vector<8x8xbf16>
    %30 = vector.extract_strided_slice %5 {offsets = [0, 8], sizes = [8, 8], strides = [1, 1]} : vector<8x32xbf16> to vector<8x8xbf16>
    %31 = vector.extract_strided_slice %7 {offsets = [0, 8], sizes = [8, 8], strides = [1, 1]} : vector<8x32xbf16> to vector<8x8xbf16>
    %cst_20 = arith.constant dense<0.000000e+00> : vector<8x8xf32>
    %32 = tpu.matmul %29, %30, %cst_20 {dimension_numbers = #tpu.dot_dimension_numbers<[1], [1], [0], [0], [0, 0, 1, 0], [], []>} : vector<8x8xbf16>, vector<8x8xbf16>, vector<8x8xf32> -> vector<8x8xf32>
    %33 = vector.broadcast %9 : vector<1x8xf32> to vector<8x8xf32>
    %34 = arith.addf %32, %33 : vector<8x8xf32>
    %cst_21 = arith.constant dense<0xFF800000> : vector<8xf32>
    %35 = vector.multi_reduction <maximumf>, %34, %cst_21 [1] : vector<8x8xf32> to vector<8xf32>
    %36 = vector.shape_cast %35 : vector<8xf32> to vector<8x1xf32>
    %37 = vector.broadcast %36 : vector<8x1xf32> to vector<8x8xf32>
    %38 = arith.subf %34, %37 : vector<8x8xf32>
    %39 = math.exp %38 : vector<8x8xf32>
    %cst_22 = arith.constant dense<0.000000e+00> : vector<8xf32>
    %40 = vector.multi_reduction <add>, %39, %cst_22 [1] : vector<8x8xf32> to vector<8xf32>
    %41 = vector.shape_cast %40 : vector<8xf32> to vector<8x1xf32>
    %42 = tpu.reciprocal %41 {approx = true} : vector<8x1xf32> -> vector<8x1xf32>
    %43 = vector.broadcast %42 : vector<8x1xf32> to vector<8x8xf32>
    %44 = arith.mulf %39, %43 : vector<8x8xf32>
    %45 = arith.truncf %44 : vector<8x8xf32> to vector<8x8xbf16>
    %cst_23 = arith.constant dense<0.000000e+00> : vector<8x8xf32>
    %46 = tpu.matmul %45, %31, %cst_23 {dimension_numbers = #tpu.dot_dimension_numbers<[1], [0], [0], [1], [0, 0, 1, 1], [], []>} : vector<8x8xbf16>, vector<8x8xbf16>, vector<8x8xf32> -> vector<8x8xf32>
    %c0_24 = arith.constant 0 : index
    %c8 = arith.constant 8 : index
    %47 = vector.load %arg7[%c0_24, %c8] : memref<8x32xf32, #tpu.memory_space<vmem>>, vector<8x8xf32>
    tpu.vector_store %arg7[%c0_24, %c8], %46 {strides = array<i32>} : memref<8x32xf32, #tpu.memory_space<vmem>>, vector<8x8xf32>,
    %48 = vector.extract_strided_slice %3 {offsets = [0, 16], sizes = [8, 8], strides = [1, 1]} : vector<8x32xbf16> to vector<8x8xbf16>
    %49 = vector.extract_strided_slice %5 {offsets = [0, 16], sizes = [8, 8], strides = [1, 1]} : vector<8x32xbf16> to vector<8x8xbf16>
    %50 = vector.extract_strided_slice %7 {offsets = [0, 16], sizes = [8, 8], strides = [1, 1]} : vector<8x32xbf16> to vector<8x8xbf16>
    %cst_25 = arith.constant dense<0.000000e+00> : vector<8x8xf32>
    %51 = tpu.matmul %48, %49, %cst_25 {dimension_numbers = #tpu.dot_dimension_numbers<[1], [1], [0], [0], [0, 0, 1, 0], [], []>} : vector<8x8xbf16>, vector<8x8xbf16>, vector<8x8xf32> -> vector<8x8xf32>
    %52 = vector.broadcast %9 : vector<1x8xf32> to vector<8x8xf32>
    %53 = arith.addf %51, %52 : vector<8x8xf32>
    %cst_26 = arith.constant dense<0xFF800000> : vector<8xf32>
    %54 = vector.multi_reduction <maximumf>, %53, %cst_26 [1] : vector<8x8xf32> to vector<8xf32>
    %55 = vector.shape_cast %54 : vector<8xf32> to vector<8x1xf32>
    %56 = vector.broadcast %55 : vector<8x1xf32> to vector<8x8xf32>
    %57 = arith.subf %53, %56 : vector<8x8xf32>
    %58 = math.exp %57 : vector<8x8xf32>
    %cst_27 = arith.constant dense<0.000000e+00> : vector<8xf32>
    %59 = vector.multi_reduction <add>, %58, %cst_27 [1] : vector<8x8xf32> to vector<8xf32>
    %60 = vector.shape_cast %59 : vector<8xf32> to vector<8x1xf32>
    %61 = tpu.reciprocal %60 {approx = true} : vector<8x1xf32> -> vector<8x1xf32>
    %62 = vector.broadcast %61 : vector<8x1xf32> to vector<8x8xf32>
    %63 = arith.mulf %58, %62 : vector<8x8xf32>
    %64 = arith.truncf %63 : vector<8x8xf32> to vector<8x8xbf16>
    %cst_28 = arith.constant dense<0.000000e+00> : vector<8x8xf32>
    %65 = tpu.matmul %64, %50, %cst_28 {dimension_numbers = #tpu.dot_dimension_numbers<[1], [0], [0], [1], [0, 0, 1, 1], [], []>} : vector<8x8xbf16>, vector<8x8xbf16>, vector<8x8xf32> -> vector<8x8xf32>
    %c0_29 = arith.constant 0 : index
    %c16 = arith.constant 16 : index
    %66 = vector.load %arg7[%c0_29, %c16] : memref<8x32xf32, #tpu.memory_space<vmem>>, vector<8x8xf32>
    tpu.vector_store %arg7[%c0_29, %c16], %65 {strides = array<i32>} : memref<8x32xf32, #tpu.memory_space<vmem>>, vector<8x8xf32>,
    %67 = vector.extract_strided_slice %3 {offsets = [0, 24], sizes = [8, 8], strides = [1, 1]} : vector<8x32xbf16> to vector<8x8xbf16>
    %68 = vector.extract_strided_slice %5 {offsets = [0, 24], sizes = [8, 8], strides = [1, 1]} : vector<8x32xbf16> to vector<8x8xbf16>
    %69 = vector.extract_strided_slice %7 {offsets = [0, 24], sizes = [8, 8], strides = [1, 1]} : vector<8x32xbf16> to vector<8x8xbf16>
    %cst_30 = arith.constant dense<0.000000e+00> : vector<8x8xf32>
    %70 = tpu.matmul %67, %68, %cst_30 {dimension_numbers = #tpu.dot_dimension_numbers<[1], [1], [0], [0], [0, 0, 1, 0], [], []>} : vector<8x8xbf16>, vector<8x8xbf16>, vector<8x8xf32> -> vector<8x8xf32>
    %71 = vector.broadcast %9 : vector<1x8xf32> to vector<8x8xf32>
    %72 = arith.addf %70, %71 : vector<8x8xf32>
    %cst_31 = arith.constant dense<0xFF800000> : vector<8xf32>
    %73 = vector.multi_reduction <maximumf>, %72, %cst_31 [1] : vector<8x8xf32> to vector<8xf32>
    %74 = vector.shape_cast %73 : vector<8xf32> to vector<8x1xf32>
    %75 = vector.broadcast %74 : vector<8x1xf32> to vector<8x8xf32>
    %76 = arith.subf %72, %75 : vector<8x8xf32>
    %77 = math.exp %76 : vector<8x8xf32>
    %cst_32 = arith.constant dense<0.000000e+00> : vector<8xf32>
    %78 = vector.multi_reduction <add>, %77, %cst_32 [1] : vector<8x8xf32> to vector<8xf32>
    %79 = vector.shape_cast %78 : vector<8xf32> to vector<8x1xf32>
    %80 = tpu.reciprocal %79 {approx = true} : vector<8x1xf32> -> vector<8x1xf32>
    %81 = vector.broadcast %80 : vector<8x1xf32> to vector<8x8xf32>
    %82 = arith.mulf %77, %81 : vector<8x8xf32>
    %83 = arith.truncf %82 : vector<8x8xf32> to vector<8x8xbf16>
    %cst_33 = arith.constant dense<0.000000e+00> : vector<8x8xf32>
    %84 = tpu.matmul %83, %69, %cst_33 {dimension_numbers = #tpu.dot_dimension_numbers<[1], [0], [0], [1], [0, 0, 1, 1], [], []>} : vector<8x8xbf16>, vector<8x8xbf16>, vector<8x8xf32> -> vector<8x8xf32>
    %c0_34 = arith.constant 0 : index
    %c24 = arith.constant 24 : index
    %85 = vector.load %arg7[%c0_34, %c24] : memref<8x32xf32, #tpu.memory_space<vmem>>, vector<8x8xf32>
    tpu.vector_store %arg7[%c0_34, %c24], %84 {strides = array<i32>} : memref<8x32xf32, #tpu.memory_space<vmem>>, vector<8x8xf32>,
    %c0_35 = arith.constant 0 : index
    %c0_36 = arith.constant 0 : index
    %86 = vector.load %arg7[%c0_35, %c0_36] : memref<8x32xf32, #tpu.memory_space<vmem>>, vector<8x32xf32>
    %87 = arith.truncf %86 : vector<8x32xf32> to vector<8x32xbf16>
    %c0_37 = arith.constant 0 : index
    %c0_38 = arith.constant 0 : index
    %c0_39 = arith.constant 0 : index
    %88 = vector.load %arg6[%c0_37, %c0_38, %c0_39] : memref<1x8x32xbf16, #tpu.memory_space<vmem>>, vector<1x8x32xbf16>
    %89 = vector.shape_cast %88 : vector<1x8x32xbf16> to vector<8x32xbf16>
    %90 = vector.shape_cast %87 : vector<8x32xbf16> to vector<1x8x32xbf16>
    tpu.vector_store %arg6[%c0_37, %c0_38, %c0_39], %90 {strides = array<i32>} : memref<1x8x32xbf16, #tpu.memory_space<vmem>>, vector<1x8x32xbf16>,
    return
  }
  func.func @transform_0(%arg0: i32, %arg1: i32) -> (i32, i32, i32, i32) {
    %c0_i32 = arith.constant 0 : i32
    %c0_i32_0 = arith.constant 0 : i32
    %c0_i32_1 = arith.constant 0 : i32
    return %c0_i32, %arg0, %arg1, %c0_i32_0 : i32, i32, i32, i32
  }
  func.func @transform_1(%arg0: i32, %arg1: i32) -> (i32, i32, i32, i32) {
    %c0_i32 = arith.constant 0 : i32
    %c0_i32_0 = arith.constant 0 : i32
    %c0_i32_1 = arith.constant 0 : i32
    %c0_i32_2 = arith.constant 0 : i32
    return %c0_i32, %arg0, %c0_i32_0, %c0_i32_1 : i32, i32, i32, i32
  }
  func.func @transform_2(%arg0: i32, %arg1: i32) -> (i32, i32, i32, i32) {
    %c1_i32 = arith.constant 1 : i32
    %c0_i32 = arith.constant 0 : i32
    %c0_i32_0 = arith.constant 0 : i32
    %c0_i32_1 = arith.constant 0 : i32
    return %c1_i32, %arg0, %c0_i32, %c0_i32_0 : i32, i32, i32, i32
  }
  func.func @transform_3(%arg0: i32, %arg1: i32) -> (i32, i32, i32) {
    %c0_i32 = arith.constant 0 : i32
    %c0_i32_0 = arith.constant 0 : i32
    %c0_i32_1 = arith.constant 0 : i32
    return %arg0, %c0_i32, %c0_i32_0 : i32, i32, i32
  }
  func.func @transform_4(%arg0: i32, %arg1: i32) -> (i32, i32, i32) {
    %c0_i32 = arith.constant 0 : i32
    %c0_i32_0 = arith.constant 0 : i32
    return %arg0, %arg1, %c0_i32 : i32, i32, i32
  }
}

module attributes {stable_mosaic.version = 11 : i64} {
  func.func @_linear_kernel(%arg0: i32, %arg1: i32, %arg2: i32, %arg3: i32, %arg4: memref<16x32xbf16, #tpu.memory_space<vmem>>, %arg5: memref<1x32x64xbf16, #tpu.memory_space<vmem>>, %arg6: memref<1x1x64xf32, #tpu.memory_space<vmem>>, %arg7: memref<1x16x64xf32, #tpu.memory_space<vmem>>, %arg8: memref<16x64xf32, #tpu.memory_space<vmem>>) attributes {dimension_semantics = [#tpu.dimension_semantics<parallel>, #tpu.dimension_semantics<parallel>, #tpu.dimension_semantics<parallel>, #tpu.dimension_semantics<arbitrary>], iteration_bounds = array<i64: 1, 1, 1, 1>, scalar_prefetch = 0 : i64, scratch_operands = 1 : i64, tpu.core_type = #tpu.core_type<tc>, window_params = [{transform_indices = @transform_0, window_bounds = array<i64: 16, 32>}, {transform_indices = @transform_1, window_bounds = array<i64: 1, 32, 64>}, {transform_indices = @transform_2, window_bounds = array<i64: 1, 1, 64>}, {transform_indices = @transform_3, window_bounds = array<i64: 1, 16, 64>}]} {
    %c0_i32 = arith.constant 0 : i32
    %0 = arith.cmpi eq, %arg3, %c0_i32 : i32
    %1 = arith.extui %0 : i1 to i32
    %c0_i32_0 = arith.constant 0 : i32
    %2 = arith.cmpi ne, %1, %c0_i32_0 : i32
    scf.if %2 {
      %cst_11 = arith.constant 0.000000e+00 : f32
      %13 = vector.broadcast %cst_11 : f32 to vector<16x64xf32>
      %c0_12 = arith.constant 0 : index
      %c0_13 = arith.constant 0 : index
      %14 = vector.load %arg8[%c0_12, %c0_13] : memref<16x64xf32, #tpu.memory_space<vmem>>, vector<16x64xf32>
      tpu.vector_store %arg8[%c0_12, %c0_13], %13 {strides = array<i32>} : memref<16x64xf32, #tpu.memory_space<vmem>>, vector<16x64xf32>,
    } else {
    }
    %c0 = arith.constant 0 : index
    %c0_1 = arith.constant 0 : index
    %3 = vector.load %arg8[%c0, %c0_1] : memref<16x64xf32, #tpu.memory_space<vmem>>, vector<16x64xf32>
    %c0_2 = arith.constant 0 : index
    %c0_3 = arith.constant 0 : index
    %4 = vector.load %arg4[%c0_2, %c0_3] : memref<16x32xbf16, #tpu.memory_space<vmem>>, vector<16x32xbf16>
    %c0_4 = arith.constant 0 : index
    %c0_5 = arith.constant 0 : index
    %c0_6 = arith.constant 0 : index
    %5 = vector.load %arg5[%c0_4, %c0_5, %c0_6] : memref<1x32x64xbf16, #tpu.memory_space<vmem>>, vector<1x32x64xbf16>
    %6 = vector.shape_cast %5 : vector<1x32x64xbf16> to vector<32x64xbf16>
    %cst = arith.constant dense<0.000000e+00> : vector<16x64xf32>
    %7 = tpu.matmul %4, %6, %cst {dimension_numbers = #tpu.dot_dimension_numbers<[1], [0], [0], [1], [0, 0, 1, 1], [], []>} : vector<16x32xbf16>, vector<32x64xbf16>, vector<16x64xf32> -> vector<16x64xf32>
    %8 = arith.addf %3, %7 : vector<16x64xf32>
    %c0_7 = arith.constant 0 : index
    %c0_8 = arith.constant 0 : index
    %9 = vector.load %arg8[%c0_7, %c0_8] : memref<16x64xf32, #tpu.memory_space<vmem>>, vector<16x64xf32>
    tpu.vector_store %arg8[%c0_7, %c0_8], %8 {strides = array<i32>} : memref<16x64xf32, #tpu.memory_space<vmem>>, vector<16x64xf32>,
    %c0_i32_9 = arith.constant 0 : i32
    %10 = arith.cmpi eq, %arg3, %c0_i32_9 : i32
    %11 = arith.extui %10 : i1 to i32
    %c0_i32_10 = arith.constant 0 : i32
    %12 = arith.cmpi ne, %11, %c0_i32_10 : i32
    scf.if %12 {
      %c0_11 = arith.constant 0 : index
      %c0_12 = arith.constant 0 : index
      %13 = vector.load %arg8[%c0_11, %c0_12] : memref<16x64xf32, #tpu.memory_space<vmem>>, vector<16x64xf32>
      %c0_13 = arith.constant 0 : index
      %c0_14 = arith.constant 0 : index
      %c0_15 = arith.constant 0 : index
      %14 = vector.load %arg6[%c0_13, %c0_14, %c0_15] : memref<1x1x64xf32, #tpu.memory_space<vmem>>, vector<1x1x64xf32>
      %15 = vector.shape_cast %14 : vector<1x1x64xf32> to vector<1x64xf32>
      %16 = vector.broadcast %15 : vector<1x64xf32> to vector<16x64xf32>
      %17 = arith.addf %13, %16 : vector<16x64xf32>
      %c0_16 = arith.constant 0 : index
      %c0_17 = arith.constant 0 : index
      %c0_18 = arith.constant 0 : index
      %18 = vector.load %arg7[%c0_16, %c0_17, %c0_18] : memref<1x16x64xf32, #tpu.memory_space<vmem>>, vector<1x16x64xf32>
      %19 = vector.shape_cast %18 : vector<1x16x64xf32> to vector<16x64xf32>
      %20 = vector.shape_cast %17 : vector<16x64xf32> to vector<1x16x64xf32>
      tpu.vector_store %arg7[%c0_16, %c0_17, %c0_18], %20 {strides = array<i32>} : memref<1x16x64xf32, #tpu.memory_space<vmem>>, vector<1x16x64xf32>,
    } else {
    }
    return
  }
  func.func @transform_0(%arg0: i32, %arg1: i32, %arg2: i32, %arg3: i32) -> (i32, i32) {
    %c0_i32 = arith.constant 0 : i32
    return %arg1, %arg3 : i32, i32
  }
  func.func @transform_1(%arg0: i32, %arg1: i32, %arg2: i32, %arg3: i32) -> (i32, i32, i32) {
    %c0_i32 = arith.constant 0 : i32
    return %arg0, %arg3, %arg2 : i32, i32, i32
  }
  func.func @transform_2(%arg0: i32, %arg1: i32, %arg2: i32, %arg3: i32) -> (i32, i32, i32) {
    %c0_i32 = arith.constant 0 : i32
    %c0_i32_0 = arith.constant 0 : i32
    return %arg0, %c0_i32, %arg2 : i32, i32, i32
  }
  func.func @transform_3(%arg0: i32, %arg1: i32, %arg2: i32, %arg3: i32) -> (i32, i32, i32) {
    %c0_i32 = arith.constant 0 : i32
    return %arg0, %arg1, %arg2 : i32, i32, i32
  }
}

</mosaic_0001>

<bundles_post_ra>
// kernel: unified_transformer_forward.42
= control target key start
LH: loop header
LB: loop body
LE: loop exit
PB: predicated region body
PF: predicated region fallthrough
CT: control target
= control target key end

     0   :  { %s653_s12 = smov 0   ;;  %s655_s13 = smov 0   ;;  %s697_s0 = inlined_call_operand.vmem [shape: bf16[16,32], index: 0, kind: input, shape index: {}]   ;;  %s698_s1 = inlined_call_operand.vmem [shape: bf16[3,32,32], index: 1, kind: input, shape index: {}]   ;;  %s699_s2 = inlined_call_operand.vmem [shape: f32[3,1,32], index: 2, kind: input, shape index: {}]   ;;  %s700_s3 = inlined_call_operand.vmem [shape: bf16[3,16,32], index: 3, kind: output, shape index: {}]  }
   0x1   :  { %s657_s14 = smov 0  }
   0x2 LB: > { %s39_s15 = sadd.s32 1, %s625_s13  ;;  %p549_p0 = scmp.ge.s32.totalorder %s629_s14, 1  ;;  %s629_s14 = sphi %s657_s14, %s13_s14   ;;  %s625_s13 = sphi %s655_s13, %s702_s13   ;;  %s621_s12 = sphi %s653_s12, %s701_s12  }
   0x3   : > { %p41_p1 = scmp.ge.s32.totalorder %s39_s15, 3  ;;  %p208_p2 = scmp.lt.s32.totalorder %s629_s14, 4 }
   0x5   : > { %s704_s15 = smov (%p41_p1, %s39_s15), 0  ;;  %p209_p3 = pnand %p549_p0, %p208_p2 }
   0x6   : > { %p270_p4 = scmp.lt.s32.totalorder (!%p209_p3), %s621_s12, 2 }
   0x7   : > { %212 = sbr.rel (%p209_p3) target bundleno = 235 (0xeb), region = 32 }
   0xc   : > { %vm306_vm0 = vcmask 261120   ;;  %v631_v0 = vmov 0.0   ;;  %vm632_vm1 = vmmov 0   ;;  %s706_s12 = smov (!%p270_p4, %s621_s12), 2  ;;  %v606_v3 = vld [vmem:[%s697_s0] sm:$0xff]   ;;  %vm405_vm2 = vcmask 257024  }
   0xd   : > { %570 = vmatprep.subr.bf16.mxu0 %v631_v0  ;;  %574 = vmatprep.mubr.msk.bf16.mxu0 %vm632_vm1, %v631_v0  ;;  %307 = vst.msk [vmem:[#allocation2] sm:$0xff] %vm306_vm0, %v631_v0  ;;  %308 = vst.msk [vmem:[#allocation2 + $0x8] sm:$0xff] %vm306_vm0, %v631_v0  ;;  %s563_s16 = sshll.u32 %s706_s12, 4  ;;  %s287_s24 = scalar_lea.vmem %s699_s2, %s706_s12 }
   0xe   : > { %s280_s19 = scalar_lea.vmem %s698_s1, %s563_s16  ;;  %v558_v12 = vld [vmem:[%s287_s24] ss:$0 sm:$0xff]  ;;  %s564_s25 = sshll.u32 %s706_s12, 3 }
   0xf   : > { %v604_v1 = vld [vmem:[%s280_s19 + $0x8] sm:$0xff]   ;;  %v605_v2 = vld [vmem:[%s280_s19] sm:$0xff]   ;;  %s299_s28 = scalar_lea.vmem %s700_s3, %s564_s25 }
  0x10   : > { %571 = vmatpush3.bf16.msra.mxu0 %v604_v1 }
  0x11   : > { %572 = vmatprep.subr.bf16.mxu0 %v631_v0 }
  0x14   : > { %573 = vmatpush3.bf16.msra.mxu0 %v605_v2  ;;  %v309_v4 = vld [vmem:[#allocation2] sm:$0xff]  ;;  %v310_v8 = vld [vmem:[#allocation2 + $0x8] sm:$0xff] }
  0x17   : > { %575 = vmatmul.mubr.msk.bf16.vlgmr.msra.gmra.mxu0 %vm306_vm0, %v606_v3 }
  0xd7   : > { %v372_v5 = vpop.f32.mrf.mxu0 }
  0xd8   : > { %v379_v6 = vadd.f32 %v372_v5, %v309_v4 }
  0xd9   : > { %v576_v7 = vpop.f32.mrf.mxu0 }
  0xda   : > { %381 = vst.msk [vmem:[#allocation2] sm:$0xff] %vm306_vm0, %v379_v6 }
  0xdb   : > { %v375_v9 = vpop.f32.mrf.mxu0 }
  0xdc   : > { %v380_v10 = vadd.f32 %v375_v9, %v310_v8 }
  0xdd   : > { %v577_v11 = vpop.f32.mrf.mxu0 }
  0xde   : > { %382 = vst.msk [vmem:[#allocation2 + $0x8] sm:$0xff] %vm306_vm0, %v380_v10 }
  0xe1   : > { %v386_v13 = vld [vmem:[#allocation2] sm:$0xff] }
  0xe2   : > { %v395_v14 = vadd.f32 %v558_v12, %v386_v13 }
  0xe4   : > { %v565_v15 = vpack.c.bf16 %v395_v14, %v395_v14 }
  0xe5   : > { %v387_v16 = vld [vmem:[#allocation2 + $0x8] sm:$0xff] }
  0xe6   : > { %406 = vst.msk [vmem:[%s299_s28] sm:$0xf] %vm405_vm2, %v565_v15  ;;  %v396_v17 = vadd.f32 %v558_v12, %v387_v16 }
  0xe8   : > { %v566_v18 = vpack.c.bf16 %v396_v17, %v396_v17 }
  0xea   : > { %407 = vst.msk [vmem:[%s299_s28 + $0x4] sm:$0xf] %vm405_vm2, %v566_v18 }
  0xeb PF: > { %s13_s14 = sadd.s32 1, %s629_s14   ;;  %s701_s12 = smov %s625_s13 }
  0xec   : > { %p10_p5 = scmp.ge.s32.totalorder %s13_s14, 5   ;;  %s702_s13 = smov %s704_s15 }
  0xee   :  { %12 = sbr.rel (!%p10_p5) target bundleno = 2 (0x2), region = 76 }

// kernel: unified_transformer_forward.41
= control target key start
LH: loop header
LB: loop body
LE: loop exit
PB: predicated region body
PF: predicated region fallthrough
CT: control target
= control target key end

     0   :  { %vm18_vm0 = vcmask 261120   ;;  %vm72_vm1 = vcmask 257024   ;;  %s132_s0 = inlined_call_operand.vmem [shape: bf16[16,32], index: 0, kind: input, shape index: {}]   ;;  %s133_s1 = inlined_call_operand.vmem [shape: f32[1,32], index: 1, kind: input, shape index: {}]   ;;  %s134_s2 = inlined_call_operand.vmem [shape: f32[1,32], index: 2, kind: input, shape index: {}]   ;;  %s135_s3 = inlined_call_operand.vmem [shape: bf16[16,32], index: 3, kind: output, shape index: {}]  }
   0x1   :  { %v86_v0 = vld [vmem:[%s132_s0] sm:$0xff]  }
   0x2   :  { %v87_v1 = vunpack.c.l.bf16 %v86_v0  ;;  %v88_v2 = vunpack.c.h.bf16 %v86_v0  ;;  %v79_v22 = vld [vmem:[%s133_s1] ss:$0 sm:$0xff] }
   0x3   :  { %v80_v24 = vld [vmem:[%s134_s2] ss:$0 sm:$0xff] }
   0x4   :  { %v19_v3 = vsel %vm18_vm0, %v87_v1, 0.0  ;;  %v22_v4 = vsel %vm18_vm0, %v88_v2, 0.0 }
   0x5   :  { %20 = vadd.xlane.f32.xlu0 %v19_v3 }
   0x9   :  { %23 = vadd.xlane.f32.xlu0 %v22_v4 }
  0x8e   :  { %v21_v5 = vpop.xlane.xlu0 %20 }
  0x8f   :  { %v26_v6 = vmul.f32 0.03125, %v21_v5 }
  0x91   :  { %v28_v7 = vsub.f32 %v87_v1, %v26_v6 }
  0x92   :  { %v24_v8 = vpop.xlane.xlu0 %23 }
  0x93   :  { %v27_v9 = vmul.f32 0.03125, %v24_v8  ;;  %v30_v10 = vmul.f32 %v28_v7, %v28_v7 }
  0x95   :  { %v29_v11 = vsub.f32 %v88_v2, %v27_v9  ;;  %v32_v12 = vsel %vm18_vm0, %v30_v10, 0.0 }
  0x96   :  { %33 = vadd.xlane.f32.xlu1 %v32_v12 }
  0x97   :  { %v31_v13 = vmul.f32 %v29_v11, %v29_v11 }
  0x99   :  { %v35_v14 = vsel %vm18_vm0, %v31_v13, 0.0 }
  0x9a   :  { %36 = vadd.xlane.f32.xlu1 %v35_v14 }
 0x11f   :  { %v34_v15 = vpop.xlane.xlu1 %33 }
 0x120   :  { %v38_v16 = vmul.f32 0.03125, %v34_v15 }
 0x122   :  { %v40_v17 = vadd.f32 1e-05, %v38_v16 }
 0x123   :  { %v37_v18 = vpop.xlane.xlu1 %36 }
 0x124   :  { %89 = vrsqrt.f32 %v40_v17  ;;  %v39_v19 = vmul.f32 0.03125, %v37_v18 }
 0x126   :  { %v41_v20 = vadd.f32 1e-05, %v39_v19 }
 0x128   :  { %91 = vrsqrt.f32 %v41_v20 }
 0x131   :  { %v90_v21 = vpop.eup %89 }
 0x132   :  { %v44_v23 = vmul.f32 %v90_v21, %v28_v7 }
 0x134   :  { %v53_v25 = vmul.f32 %v79_v22, %v44_v23 }
 0x135   :  { %v92_v26 = vpop.eup %91 }
 0x136   :  { %v62_v27 = vadd.f32 %v80_v24, %v53_v25  ;;  %v45_v28 = vmul.f32 %v92_v26, %v29_v11 }
 0x138   :  { %v83_v29 = vpack.c.bf16 %v62_v27, %v62_v27  ;;  %v54_v30 = vmul.f32 %v79_v22, %v45_v28 }
 0x13a   :  { %73 = vst.msk [vmem:[%s135_s3] sm:$0xf] %vm72_vm1, %v83_v29  ;;  %v63_v31 = vadd.f32 %v80_v24, %v54_v30 }
 0x13c   :  { %v84_v32 = vpack.c.bf16 %v63_v31, %v63_v31 }
 0x13e   :  { %74 = vst.msk [vmem:[%s135_s3 + $0x4] sm:$0xf] %vm72_vm1, %v84_v32 }

// kernel: unified_transformer_forward.44
= control target key start
LH: loop header
LB: loop body
LE: loop exit
PB: predicated region body
PF: predicated region fallthrough
CT: control target
= control target key end

     0   :  { %vm22_vm0 = vcmask 261120   ;;  %v163_v0 = vmov 0.0   ;;  %vm164_vm1 = vmmov 0   ;;  %vm127_vm2 = vcmask 257024   ;;  %s216_s1 = inlined_call_operand.vmem [shape: bf16[1,32,32], index: 1, kind: input, shape index: {}]   ;;  %s217_s0 = inlined_call_operand.vmem [shape: bf16[16,32], index: 0, kind: input, shape index: {}]   ;;  %s218_s3 = inlined_call_operand.vmem [shape: bf16[16,32], index: 3, kind: input, shape index: {}]   ;;  %s219_s2 = inlined_call_operand.vmem [shape: f32[1,1,32], index: 2, kind: input, shape index: {}]   ;;  %s220_s4 = inlined_call_operand.vmem [shape: bf16[1,16,32], index: 4, kind: output, shape index: {}]  }
   0x1   :  { %150 = vmatprep.subr.bf16.mxu0 %v163_v0  ;;  %v160_v1 = vld [vmem:[%s216_s1 + $0x8] sm:$0xff]   ;;  %154 = vmatprep.mubr.msk.bf16.mxu0 %vm164_vm1, %v163_v0  ;;  %23 = vst.msk [vmem:[#allocation2] sm:$0xff] %vm22_vm0, %v163_v0  ;;  %24 = vst.msk [vmem:[#allocation2 + $0x8] sm:$0xff] %vm22_vm0, %v163_v0  ;;  %v161_v2 = vld [vmem:[%s216_s1] sm:$0xff]  }
   0x2   :  { %151 = vmatpush3.bf16.msra.mxu0 %v160_v1  ;;  %v162_v3 = vld [vmem:[%s217_s0] sm:$0xff]  }
   0x3   :  { %152 = vmatprep.subr.bf16.mxu0 %v163_v0  ;;  %v144_v11 = vld [vmem:[%s218_s3] sm:$0xff]  }
   0x4   :  { %v138_v13 = vld [vmem:[%s219_s2] ss:$0 sm:$0xff]  ;;  %v145_v14 = vunpack.c.l.bf16 %v144_v11  ;;  %v146_v18 = vunpack.c.h.bf16 %v144_v11 }
   0x6   :  { %153 = vmatpush3.bf16.msra.mxu0 %v161_v2 }
   0x8   :  { %v25_v4 = vld [vmem:[#allocation2] sm:$0xff]  ;;  %v26_v8 = vld [vmem:[#allocation2 + $0x8] sm:$0xff] }
   0x9   :  { %155 = vmatmul.mubr.msk.bf16.vlgmr.msra.gmra.mxu0 %vm22_vm0, %v162_v3 }
  0xc9   :  { %v88_v5 = vpop.f32.mrf.mxu0 }
  0xca   :  { %v95_v6 = vadd.f32 %v88_v5, %v25_v4 }
  0xcb   :  { %v156_v7 = vpop.f32.mrf.mxu0 }
  0xcc   :  { %97 = vst.msk [vmem:[#allocation2] sm:$0xff] %vm22_vm0, %v95_v6 }
  0xcd   :  { %v91_v9 = vpop.f32.mrf.mxu0 }
  0xce   :  { %v96_v10 = vadd.f32 %v91_v9, %v26_v8 }
  0xcf   :  { %v157_v12 = vpop.f32.mrf.mxu0 }
  0xd0   :  { %98 = vst.msk [vmem:[#allocation2 + $0x8] sm:$0xff] %vm22_vm0, %v96_v10 }
  0xd3   :  { %v102_v15 = vld [vmem:[#allocation2] sm:$0xff] }
  0xd4   :  { %v111_v16 = vadd.f32 %v138_v13, %v102_v15 }
  0xd6   :  { %v117_v17 = vadd.f32 %v145_v14, %v111_v16 }
  0xd7   :  { %v103_v19 = vld [vmem:[#allocation2 + $0x8] sm:$0xff] }
  0xd8   :  { %v141_v20 = vpack.c.bf16 %v117_v17, %v117_v17  ;;  %v112_v21 = vadd.f32 %v138_v13, %v103_v19 }
  0xda   :  { %128 = vst.msk [vmem:[%s220_s4] sm:$0xf] %vm127_vm2, %v141_v20  ;;  %v118_v22 = vadd.f32 %v146_v18, %v112_v21 }
  0xdc   :  { %v142_v23 = vpack.c.bf16 %v118_v22, %v118_v22 }
  0xde   :  { %129 = vst.msk [vmem:[%s220_s4 + $0x4] sm:$0xf] %vm127_vm2, %v142_v23 }

// kernel: unified_transformer_forward.43
= control target key start
LH: loop header
LB: loop body
LE: loop exit
PB: predicated region body
PF: predicated region fallthrough
CT: control target
= control target key end

     0   :  { %s1068_s15 = smov 0   ;;  %s1070_s16 = smov 0   ;;  %s1185_s0 = inlined_call_operand.vmem [shape: bf16[3,2,8,32], index: 0, kind: input, shape index: {}, may-alias: {0,1,2}]   ;;  %s1186_s1 = inlined_call_operand.vmem [shape: bf16[3,2,8,32], index: 1, kind: input, shape index: {}, may-alias: {0,1,2}]   ;;  %s1187_s2 = inlined_call_operand.vmem [shape: bf16[3,2,8,32], index: 2, kind: input, shape index: {}, may-alias: {0,1,2}]   ;;  %s1188_s3 = inlined_call_operand.vmem [shape: f32[2,1,8], index: 3, kind: input, shape index: {}]   ;;  %s1189_s4 = inlined_call_operand.vmem [shape: bf16[2,8,32], index: 4, kind: output, shape index: {}]  }
   0x1   :  { %s1072_s17 = smov 0  }
   0x2 LB: > { %s26_s18 = sadd.s32 1, %s1029_s16  ;;  %p876_p0 = scmp.ge.s32.totalorder %s1033_s17, 1  ;;  %s1033_s17 = sphi %s1072_s17, %s14_s17   ;;  %s1029_s16 = sphi %s1070_s16, %s1191_s16   ;;  %s1025_s15 = sphi %s1068_s15, %s1190_s15  }
   0x3   : > { %p28_p1 = scmp.ge.s32.totalorder %s26_s18, 2  ;;  %p208_p2 = scmp.lt.s32.totalorder %s1033_s17, 3 }
   0x5   : > { %s1193_s18 = smov (%p28_p1, %s26_s18), 0  ;;  %p209_p3 = pnand %p876_p0, %p208_p2 }
   0x6   : > { %p251_p4 = scmp.lt.s32.totalorder (!%p209_p3), %s1025_s15, 1  ;;  %s1037_s29 = smov (!%p209_p3), 120  }
   0x7   : > { %212 = sbr.rel (%p209_p3) target bundleno = 1422 (0x58e), region = 36  ;;  %s1038_s30 = smov (!%p209_p3), 112  }
   0x8   : > { %s1039_s5 = smov (!%p209_p3), 104   ;;  %s1040_s9 = smov (!%p209_p3), 8  }
   0x9   : > { %s1041_s10 = smov (!%p209_p3), 16   ;;  %s1042_s11 = smov (!%p209_p3), 24  }
   0xc   : > { %v1035_v0 = vmov 0.0   ;;  %vm1036_vm0 = vmmov 0   ;;  %s1195_s15 = smov (!%p251_p4, %s1025_s15), 1  ;;  %vm291_vm1 = vcmask 64512   ;;  %vm353_vm2 = vcmask 1043456  }
   0xd   : > { %913 = vmatprep.subr.bf16.mxu0 %v1035_v0  ;;  %915 = vmatprep.mubr.msk.bf16.mxu0 %vm1036_vm0, %v1035_v0  ;;  %s1092_s19 = sshll.u32 %s1195_s15, 2  ;;  %s270_s28 = scalar_lea.vmem %s1188_s3, %s1195_s15  ;;  %vm521_vm3 = vcmask 130112   ;;  %vm637_vm4 = vcmask 195712   ;;  %vm753_vm5 = vcmask 261312   ;;  %vm757_vm6 = vcmask 257024  }
   0xe   : > { %919 = vmatprep.subr.bf16.mxu1 %v1035_v0  ;;  %921 = vmatprep.mubr.msk.bf16.mxu1 %vm1036_vm0, %v1035_v0  ;;  %s811_s22 = scalar_lea.vmem %s1186_s1, %s1092_s19  ;;  %s257_s25 = scalar_lea.vmem %s1185_s0, %s1092_s19  ;;  %v1110_v5 = vld [vmem:[%s270_s28] ss:$0 sm:$0xff] }
   0xf   : > { %v881_v1 = vld [vmem:[%s811_s22 + $0x8] sm:$0xf]  ;;  %v280_v3 = vld [vmem:[%s257_s25] sm:$0xf]  ;;  %s814_s8 = scalar_lea.vmem %s1187_s2, %s1092_s19  ;;  %s277_s14 = scalar_lea.vmem %s1189_s4, %s1092_s19 }
  0x10   : > { %v296_v2 = vsel %vm291_vm1, %v881_v1, 0  ;;  %v281_v4 = vmul.bf16 1052065461, %v280_v3  ;;  %v887_v12 = vcombine.low %v881_v1, %v881_v1  ;;  %v1124_v19 = vld [vmem:[%s814_s8 + $0x10] sm:$0xf] }
  0x11   : > { %914 = vmatpush3.bf16.xpose.msra.mxu0 %v296_v2  ;;  %v355_v20 = vsel %vm353_vm2, %v1124_v19, 0  ;;  %v889_v3 = vcombine.low %v1124_v19, %v1124_v19 }
  0x12   : > { %931 = vmatprep.subr.bf16.mxu0 %v1035_v0  ;;  %406 = vrot.lane.b32.xlu1 %v887_v12, %s1037_s29  ;;  %v886_v13 = vcombine.low %v281_v4, %v281_v4 }
  0x13   : > { %920 = vmatpush3.bf16.msra.mxu1 %v355_v20 }
  0x14   : > { %925 = vmatprep.subr.bf16.mxu1 %v1035_v0 }
  0x16   : > { %401 = vrot.lane.b32.xlu1 %v886_v13, %s1037_s29 }
  0x18   : > { %916 = vmatmul.mubr.msk.bf16.vlgmr.msra.gmra.mxu0 %vm291_vm1, %v281_v4 }
  0x19   : > { %933 = vmatprep.mubr.msk.bf16.mxu0 %vm1036_vm0, %v1035_v0 }
  0x1a   : > { %523 = vrot.lane.b32.xlu1 %v886_v13, %s1038_s30 }
  0x1e   : > { %641 = vrot.lane.b32.xlu1 %v887_v12, %s1039_s5 }
  0x22   : > { %639 = vrot.lane.b32.xlu1 %v886_v13, %s1039_s5 }
  0x84   : > { %v407_v23 = vpop.permute.xlu1 %406 }
  0x85   : > { %v412_v25 = vsel %vm291_vm1, %v407_v23, 0 }
  0x88   : > { %v402_v27 = vpop.permute.xlu1 %401 }
  0x8c   : > { %v524_v29 = vpop.permute.xlu1 %523 }
  0x90   : > { %v642_v31 = vpop.permute.xlu1 %641 }
  0x91   : > { %v647_v32 = vsel %vm291_vm1, %v642_v31, 0 }
  0x94   : > { %v640_v33 = vpop.permute.xlu1 %639 }
  0xd8   : > { %v332_v6 = vpop.f32.mrf.mxu0 }
  0xd9   : > { %v333_v7 = vadd.f32 %v1110_v5, %v332_v6 }
  0xda   : > { %v917_v8 = vpop.f32.mrf.mxu0 }
  0xdb   : > { %v338_v9 = vsel %vm291_vm1, %v333_v7, -inf }
  0xdc   : > { %339 = vmax.xlane.f32.xlu0 %v338_v9  ;;  %v335_v10 = vpop.f32.mrf.mxu0 }
  0xde   : > { %v918_v11 = vpop.f32.mrf.mxu0 }
 0x165   : > { %v340_v14 = vpop.xlane.xlu0 %339 }
 0x166   : > { %v341_v15 = vsub.f32 %v333_v7, %v340_v14 }
 0x168   : > { %v342_v16 = vmul.f32 1.442695, %v341_v15 }
 0x16a   : > { %995 = vpow2.f32 %v342_v16 }
 0x177   : > { %v996_v17 = vpop.eup %995 }
 0x178   : > { %v344_v18 = vsel %vm291_vm1, %v996_v17, 0.0 }
 0x179   : > { %345 = vadd.xlane.f32.xlu0 %v344_v18 }
 0x18f   : > { %525 = vrot.lane.b32.xlu0 %v887_v12, %s1038_s30 }
 0x202   : > { %v346_v21 = vpop.xlane.xlu0 %345 }
 0x203   : > { %997 = vrcp.f32 %v346_v21 }
 0x206   : > { %v526_v28 = vpop.permute.xlu0 %525 }
 0x207   : > { %v531_v30 = vsel %vm291_vm1, %v526_v28, 0 }
 0x210   : > { %v998_v22 = vpop.eup %997 }
 0x211   : > { %v348_v24 = vmul.f32 %v998_v22, %v996_v17 }
 0x213   : > { %v349_v26 = vpack.c.bf16 %v348_v24, %v348_v24 }
 0x215   : > { %922 = vmatmul.mubr.msk.bf16.vlgmr.msra.gmra.mxu1 %vm291_vm1, %v349_v26 }
 0x216   : > { %926 = vmatpush3.bf16.xpose.msra.mxu1 %v412_v25  ;;  %927 = vmatprep.mubr.msk.bf16.mxu1 %vm1036_vm0, %v1035_v0 }
 0x217   : > { %937 = vmatprep.subr.bf16.mxu1 %v1035_v0 }
 0x21d   : > { %928 = vmatmul.mubr.msk.bf16.vlgmr.msra.gmra.mxu1 %vm291_vm1, %v402_v27 }
 0x21e   : > { %938 = vmatpush3.bf16.xpose.msra.mxu1 %v531_v30  ;;  %939 = vmatprep.mubr.msk.bf16.mxu1 %vm1036_vm0, %v1035_v0 }
 0x21f   : > { %949 = vmatprep.subr.bf16.mxu1 %v1035_v0 }
 0x225   : > { %940 = vmatmul.mubr.msk.bf16.vlgmr.msra.gmra.mxu1 %vm291_vm1, %v524_v29 }
 0x226   : > { %950 = vmatpush3.bf16.xpose.msra.mxu1 %v647_v32  ;;  %951 = vmatprep.mubr.msk.bf16.mxu1 %vm1036_vm0, %v1035_v0 }
 0x22d   : > { %952 = vmatmul.mubr.msk.bf16.vlgmr.msra.gmra.mxu1 %vm291_vm1, %v640_v33 }
 0x2d5   : > { %v391_v34 = vpop.f32.mrf.mxu1 }
 0x2d6   : > { %397 = vst.msk [vmem:[#allocation2] sm:$0xff] %vm291_vm1, %v391_v34 }
 0x2d7   : > { %v923_v35 = vpop.f32.mrf.mxu1 }
 0x2d9   : > { %v394_v36 = vpop.f32.mrf.mxu1 }
 0x2db   : > { %v924_v37 = vpop.f32.mrf.mxu1 }
 0x2dd   : > { %v448_v38 = vpop.f32.mrf.mxu1 }
 0x2de   : > { %v449_v39 = vadd.f32 %v1110_v5, %v448_v38 }
 0x2df   : > { %v929_v40 = vpop.f32.mrf.mxu1 }
 0x2e0   : > { %v454_v41 = vsel %vm291_vm1, %v449_v39, -inf }
 0x2e1   : > { %455 = vmax.xlane.f32.xlu1 %v454_v41  ;;  %v451_v42 = vpop.f32.mrf.mxu1 }
 0x2e3   : > { %v930_v43 = vpop.f32.mrf.mxu1 }
 0x2e5   : > { %v567_v44 = vpop.f32.mrf.mxu1 }
 0x2e6   : > { %v568_v45 = vadd.f32 %v1110_v5, %v567_v44 }
 0x2e7   : > { %v941_v46 = vpop.f32.mrf.mxu1 }
 0x2e8   : > { %v573_v47 = vsel %vm291_vm1, %v568_v45, -inf }
 0x2e9   : > { %574 = vmax.xlane.f32.xlu0 %v573_v47  ;;  %v570_v48 = vpop.f32.mrf.mxu1 }
 0x2eb   : > { %v942_v49 = vpop.f32.mrf.mxu1 }
 0x2ed   : > { %v683_v50 = vpop.f32.mrf.mxu1 }
 0x2ee   : > { %v684_v51 = vadd.f32 %v1110_v5, %v683_v50 }
 0x2ef   : > { %v953_v52 = vpop.f32.mrf.mxu1 }
 0x2f0   : > { %v689_v53 = vsel %vm291_vm1, %v684_v51, -inf }
 0x2f1   : > { %690 = vmax.xlane.f32.xlu1 %v689_v53  ;;  %v686_v54 = vpop.f32.mrf.mxu1 }
 0x2f3   : > { %v954_v55 = vpop.f32.mrf.mxu1 }
 0x36a   : > { %v456_v56 = vpop.xlane.xlu1 %455 }
 0x36b   : > { %v457_v57 = vsub.f32 %v449_v39, %v456_v56 }
 0x36d   : > { %v458_v58 = vmul.f32 1.442695, %v457_v57 }
 0x36f   : > { %999 = vpow2.f32 %v458_v58 }
 0x372   : > { %v575_v59 = vpop.xlane.xlu0 %574 }
 0x373   : > { %v576_v60 = vsub.f32 %v568_v45, %v575_v59 }
 0x375   : > { %v577_v61 = vmul.f32 1.442695, %v576_v60 }
 0x377   : > { %1001 = vpow2.f32 %v577_v61 }
 0x37a   : > { %v691_v4 = vpop.xlane.xlu1 %690 }
 0x37b   : > { %v692_v5 = vsub.f32 %v684_v51, %v691_v4 }
 0x37c   : > { %v1000_v62 = vpop.eup %999 }
 0x37d   : > { %v460_v63 = vsel %vm291_vm1, %v1000_v62, 0.0  ;;  %v693_v6 = vmul.f32 1.442695, %v692_v5 }
 0x37e   : > { %461 = vadd.xlane.f32.xlu1 %v460_v63 }
 0x37f   : > { %1003 = vpow2.f32 %v693_v6 }
 0x384   : > { %v1002_v1 = vpop.eup %1001 }
 0x385   : > { %v579_v2 = vsel %vm291_vm1, %v1002_v1, 0.0 }
 0x386   : > { %580 = vadd.xlane.f32.xlu0 %v579_v2 }
 0x38c   : > { %v1004_v7 = vpop.eup %1003 }
 0x38d   : > { %v695_v8 = vsel %vm291_vm1, %v1004_v7, 0.0 }
 0x38f   : > { %585 = vrot.lane.b32.xlu1 %v889_v3, %s1038_s30 }
 0x39c   : > { %469 = vrot.lane.b32.xlu0 %v889_v3, %s1037_s29 }
 0x3b3   : > { %696 = vadd.xlane.f32.xlu1 %v695_v8 }
 0x3c4   : > { %701 = vrot.lane.b32.xlu1 %v889_v3, %s1039_s5 }
 0x407   : > { %v462_v9 = vpop.xlane.xlu1 %461 }
 0x408   : > { %1005 = vrcp.f32 %v462_v9 }
 0x40b   : > { %v586_v15 = vpop.permute.xlu1 %585 }
 0x40c   : > { %v591_v17 = vsel %vm353_vm2, %v586_v15, 0 }
 0x40f   : > { %v581_v10 = vpop.xlane.xlu0 %580 }
 0x410   : > { %1007 = vrcp.f32 %v581_v10 }
 0x413   : > { %v470_v11 = vpop.permute.xlu0 %469 }
 0x414   : > { %v475_v12 = vsel %vm353_vm2, %v470_v11, 0 }
 0x415   : > { %v1006_v13 = vpop.eup %1005  ;;  %932 = vmatpush3.bf16.msra.mxu0 %v475_v12 }
 0x416   : > { %943 = vmatprep.subr.bf16.mxu0 %v1035_v0  ;;  %v464_v14 = vmul.f32 %v1006_v13, %v1000_v62 }
 0x418   : > { %v465_v16 = vpack.c.bf16 %v464_v14, %v464_v14 }
 0x41a   : > { %934 = vmatmul.mubr.msk.bf16.vlgmr.msra.gmra.mxu0 %vm291_vm1, %v465_v16 }
 0x41b   : > { %944 = vmatpush3.bf16.msra.mxu0 %v591_v17  ;;  %945 = vmatprep.mubr.msk.bf16.mxu0 %vm1036_vm0, %v1035_v0 }
 0x41c   : > { %955 = vmatprep.subr.bf16.mxu0 %v1035_v0 }
 0x41d   : > { %v1008_v18 = vpop.eup %1007 }
 0x41e   : > { %v583_v19 = vmul.f32 %v1008_v18, %v1002_v1 }
 0x420   : > { %v584_v20 = vpack.c.bf16 %v583_v19, %v583_v19 }
 0x422   : > { %946 = vmatmul.mubr.msk.bf16.vlgmr.msra.gmra.mxu0 %vm291_vm1, %v584_v20 }
 0x423   : > { %957 = vmatprep.mubr.msk.bf16.mxu0 %vm1036_vm0, %v1035_v0 }
 0x43c   : > { %v697_v21 = vpop.xlane.xlu1 %696 }
 0x43d   : > { %1009 = vrcp.f32 %v697_v21 }
 0x440   : > { %v702_v22 = vpop.permute.xlu1 %701 }
 0x441   : > { %v707_v23 = vsel %vm353_vm2, %v702_v22, 0 }
 0x442   : > { %956 = vmatpush3.bf16.msra.mxu0 %v707_v23 }
 0x44a   : > { %v1010_v24 = vpop.eup %1009 }
 0x44b   : > { %v699_v25 = vmul.f32 %v1010_v24, %v1004_v7 }
 0x44d   : > { %v700_v26 = vpack.c.bf16 %v699_v25, %v699_v25 }
 0x44f   : > { %958 = vmatmul.mubr.msk.bf16.vlgmr.msra.gmra.mxu0 %vm291_vm1, %v700_v26 }
 0x4da   : > { %v511_v27 = vpop.f32.mrf.mxu0 }
 0x4db   : > { %518 = vrot.lane.b32.xlu0 %v511_v27, %s1040_s9 }
 0x4dc   : > { %v935_v28 = vpop.f32.mrf.mxu0 }
 0x4de   : > { %v514_v29 = vpop.f32.mrf.mxu0 }
 0x4e0   : > { %v936_v30 = vpop.f32.mrf.mxu0 }
 0x4e2   : > { %v627_v31 = vpop.f32.mrf.mxu0 }
 0x4e3   : > { %634 = vrot.lane.b32.xlu1 %v627_v31, %s1041_s10 }
 0x4e4   : > { %v947_v0 = vpop.f32.mrf.mxu0 }
 0x4e6   : > { %v630_v32 = vpop.f32.mrf.mxu0 }
 0x4e8   : > { %v948_v33 = vpop.f32.mrf.mxu0 }
 0x50f   : > { %v743_v34 = vpop.f32.mrf.mxu0 }
 0x510   : > { %750 = vrot.lane.b32.xlu0 %v743_v34, %s1042_s11 }
 0x511   : > { %v959_v35 = vpop.f32.mrf.mxu0 }
 0x513   : > { %v746_v36 = vpop.f32.mrf.mxu0 }
 0x515   : > { %v960_v37 = vpop.f32.mrf.mxu0 }
 0x54d   : > { %v519_v38 = vpop.permute.xlu0 %518 }
 0x54e   : > { %522 = vst.msk [vmem:[#allocation2] sm:$0xff] %vm521_vm3, %v519_v38 }
 0x555   : > { %v635_v39 = vpop.permute.xlu1 %634 }
 0x556   : > { %638 = vst.msk [vmem:[#allocation2] sm:$0xff] %vm637_vm4, %v635_v39 }
 0x582   : > { %v751_v40 = vpop.permute.xlu0 %750 }
 0x583   : > { %754 = vst.msk [vmem:[#allocation2] sm:$0xff] %vm753_vm5, %v751_v40 }
 0x58a   : > { %v755_v41 = vld [vmem:[#allocation2] sm:$0xff] }
 0x58b   : > { %v756_v42 = vpack.c.bf16 %v755_v41, %v755_v41 }
 0x58d   : > { %758 = vst.msk [vmem:[%s277_s14] sm:$0xf] %vm757_vm6, %v756_v42 }
 0x58e PF: > { %s14_s17 = sadd.s32 1, %s1033_s17   ;;  %s1190_s15 = smov %s1029_s16 }
 0x58f   : > { %p11_p5 = scmp.ge.s32.totalorder %s14_s17, 4   ;;  %s1191_s16 = smov %s1193_s18 }
 0x591   :  { %13 = sbr.rel (!%p11_p5) target bundleno = 2 (0x2), region = 75 }

// kernel: unified_transformer_forward.46
= control target key start
LH: loop header
LB: loop body
LE: loop exit
PB: predicated region body
PF: predicated region fallthrough
CT: control target
= control target key end

     0   :  { %vm19_vm0 = vcmask 523264   ;;  %v153_v0 = vmov 0.0   ;;  %vm154_vm1 = vmmov 0   ;;  %vm47_vm2 = vcmask 261120   ;;  %s197_s1 = inlined_call_operand.vmem [shape: bf16[1,32,64], index: 1, kind: input, shape index: {}]   ;;  %s198_s0 = inlined_call_operand.vmem [shape: bf16[16,32], index: 0, kind: input, shape index: {}]   ;;  %s199_s2 = inlined_call_operand.vmem [shape: f32[1,1,64], index: 2, kind: input, shape index: {}]   ;;  %s200_s3 = inlined_call_operand.vmem [shape: bf16[1,16,64], index: 3, kind: output, shape index: {}]  }
   0x1   :  { %140 = vmatprep.subr.bf16.mxu0 %v153_v0  ;;  %v150_v1 = vld [vmem:[%s197_s1 + $0x8] sm:$0xff]   ;;  %144 = vmatprep.mubr.msk.bf16.mxu0 %vm154_vm1, %v153_v0  ;;  %20 = vst.msk [vmem:[#allocation2] sm:$0xff] %vm19_vm0, %v153_v0  ;;  %21 = vst.msk [vmem:[#allocation2 + $0x8] sm:$0xff] %vm19_vm0, %v153_v0  ;;  %v151_v2 = vld [vmem:[%s197_s1] sm:$0xff]   ;;  %vm121_vm3 = vcmask 519168  }
   0x2   :  { %141 = vmatpush3.bf16.msra.mxu0 %v150_v1  ;;  %v152_v3 = vld [vmem:[%s198_s0] sm:$0xff]  }
   0x3   :  { %142 = vmatprep.subr.bf16.mxu0 %v153_v0  ;;  %v132_v12 = vld [vmem:[%s199_s2] ss:$0 sm:$0xff] }
   0x6   :  { %143 = vmatpush3.bf16.msra.mxu0 %v151_v2 }
   0x8   :  { %v22_v4 = vld [vmem:[#allocation2] sm:$0xff]  ;;  %v23_v8 = vld [vmem:[#allocation2 + $0x8] sm:$0xff] }
   0x9   :  { %145 = vmatmul.mubr.msk.bf16.vlgmr.msra.gmra.mxu0 %vm47_vm2, %v152_v3 }
  0xc9   :  { %v85_v5 = vpop.f32.mrf.mxu0 }
  0xca   :  { %v92_v6 = vadd.f32 %v85_v5, %v22_v4 }
  0xcb   :  { %v146_v7 = vpop.f32.mrf.mxu0 }
  0xcc   :  { %95 = vst.msk [vmem:[#allocation2] sm:$0xff] %vm19_vm0, %v92_v6 }
  0xcd   :  { %v88_v9 = vpop.f32.mrf.mxu0 }
  0xce   :  { %v93_v10 = vadd.f32 %v88_v9, %v23_v8 }
  0xcf   :  { %v147_v11 = vpop.f32.mrf.mxu0 }
  0xd0   :  { %96 = vst.msk [vmem:[#allocation2 + $0x8] sm:$0xff] %vm19_vm0, %v93_v10 }
  0xd3   :  { %v100_v13 = vld [vmem:[#allocation2] sm:$0xff] }
  0xd4   :  { %v109_v14 = vadd.f32 %v132_v12, %v100_v13 }
  0xd6   :  { %v111_v15 = vmax.f32 %v109_v14, 0.0 }
  0xd7   :  { %v101_v16 = vld [vmem:[#allocation2 + $0x8] sm:$0xff] }
  0xd8   :  { %v135_v17 = vpack.c.bf16 %v111_v15, %v111_v15  ;;  %v110_v18 = vadd.f32 %v132_v12, %v101_v16 }
  0xda   :  { %122 = vst.msk [vmem:[%s200_s3] sm:$0xf] %vm121_vm3, %v135_v17  ;;  %v112_v19 = vmax.f32 %v110_v18, 0.0 }
  0xdc   :  { %v136_v20 = vpack.c.bf16 %v112_v19, %v112_v19 }
  0xde   :  { %123 = vst.msk [vmem:[%s200_s3 + $0x4] sm:$0xf] %vm121_vm3, %v136_v20 }

// kernel: unified_transformer_forward.47
= control target key start
LH: loop header
LB: loop body
LE: loop exit
PB: predicated region body
PF: predicated region fallthrough
CT: control target
= control target key end

     0   :  { %vm22_vm0 = vcmask 261120   ;;  %v190_v0 = vmov 0.0   ;;  %vm191_vm1 = vmmov 0   ;;  %vm66_vm2 = vcmask 523264   ;;  %s248_s1 = inlined_call_operand.vmem [shape: bf16[1,64,32], index: 1, kind: input, shape index: {}]   ;;  %s249_s0 = inlined_call_operand.vmem [shape: bf16[16,64], index: 0, kind: input, shape index: {}]   ;;  %s250_s3 = inlined_call_operand.vmem [shape: bf16[16,32], index: 3, kind: input, shape index: {}]   ;;  %s251_s2 = inlined_call_operand.vmem [shape: f32[1,1,32], index: 2, kind: input, shape index: {}]   ;;  %s252_s4 = inlined_call_operand.vmem [shape: bf16[1,16,32], index: 4, kind: output, shape index: {}]  }
   0x1   :  { %171 = vmatprep.subr.bf16.mxu0 %v190_v0  ;;  %v185_v1 = vld [vmem:[%s248_s1 + $0x18] sm:$0xff]   ;;  %179 = vmatprep.mubr.msk.bf16.mxu0 %vm191_vm1, %v190_v0  ;;  %23 = vst.msk [vmem:[#allocation2] sm:$0xff] %vm22_vm0, %v190_v0  ;;  %24 = vst.msk [vmem:[#allocation2 + $0x8] sm:$0xff] %vm22_vm0, %v190_v0  ;;  %v186_v2 = vld [vmem:[%s248_s1 + $0x10] sm:$0xff]   ;;  %vm144_vm3 = vcmask 257024  }
   0x2   :  { %172 = vmatpush3.bf16.msra.mxu0 %v185_v1  ;;  %v187_v3 = vld [vmem:[%s248_s1 + $0x8] sm:$0xff]   ;;  %v188_v4 = vld [vmem:[%s248_s1] sm:$0xff]  }
   0x3   :  { %173 = vmatprep.subr.bf16.mxu0 %v190_v0  ;;  %v189_v5 = vld [vmem:[%s249_s0] sm:$0xff]  }
   0x4   :  { %v163_v13 = vld [vmem:[%s250_s3] sm:$0xff]  }
   0x5   :  { %v157_v15 = vld [vmem:[%s251_s2] ss:$0 sm:$0xff]  ;;  %v164_v16 = vunpack.c.l.bf16 %v163_v13  ;;  %v165_v20 = vunpack.c.h.bf16 %v163_v13 }
   0x6   :  { %174 = vmatpush3.bf16.msra.mxu0 %v186_v2 }
   0x7   :  { %175 = vmatprep.subr.bf16.mxu0 %v190_v0 }
   0x8   :  { %v25_v6 = vld [vmem:[#allocation2] sm:$0xff]  ;;  %v26_v10 = vld [vmem:[#allocation2 + $0x8] sm:$0xff] }
   0xa   :  { %176 = vmatpush3.bf16.msra.mxu0 %v187_v3 }
   0xb   :  { %177 = vmatprep.subr.bf16.mxu0 %v190_v0 }
   0xe   :  { %178 = vmatpush3.bf16.msra.mxu0 %v188_v4 }
  0x11   :  { %180 = vmatmul.mubr.msk.bf16.vlgmr.msra.gmra.mxu0 %vm66_vm2, %v189_v5 }
  0xd1   :  { %v104_v7 = vpop.f32.mrf.mxu0 }
  0xd2   :  { %v111_v8 = vadd.f32 %v104_v7, %v25_v6 }
  0xd3   :  { %v181_v9 = vpop.f32.mrf.mxu0 }
  0xd4   :  { %114 = vst.msk [vmem:[#allocation2] sm:$0xff] %vm22_vm0, %v111_v8 }
  0xd5   :  { %v107_v11 = vpop.f32.mrf.mxu0 }
  0xd6   :  { %v112_v12 = vadd.f32 %v107_v11, %v26_v10 }
  0xd7   :  { %v182_v14 = vpop.f32.mrf.mxu0 }
  0xd8   :  { %115 = vst.msk [vmem:[#allocation2 + $0x8] sm:$0xff] %vm22_vm0, %v112_v12 }
  0xdb   :  { %v119_v17 = vld [vmem:[#allocation2] sm:$0xff] }
  0xdc   :  { %v128_v18 = vadd.f32 %v157_v15, %v119_v17 }
  0xde   :  { %v134_v19 = vadd.f32 %v164_v16, %v128_v18 }
  0xdf   :  { %v120_v21 = vld [vmem:[#allocation2 + $0x8] sm:$0xff] }
  0xe0   :  { %v160_v22 = vpack.c.bf16 %v134_v19, %v134_v19  ;;  %v129_v23 = vadd.f32 %v157_v15, %v120_v21 }
  0xe2   :  { %145 = vst.msk [vmem:[%s252_s4] sm:$0xf] %vm144_vm3, %v160_v22  ;;  %v135_v24 = vadd.f32 %v165_v20, %v129_v23 }
  0xe4   :  { %v161_v25 = vpack.c.bf16 %v135_v24, %v135_v24 }
  0xe6   :  { %146 = vst.msk [vmem:[%s252_s4 + $0x4] sm:$0xf] %vm144_vm3, %v161_v25 }

// kernel: unified_transformer_forward.62
= control target key start
LH: loop header
LB: loop body
LE: loop exit
PB: predicated region body
PF: predicated region fallthrough
CT: control target
= control target key end

     0   :  { %s653_s12 = smov 0   ;;  %s655_s13 = smov 0   ;;  %s697_s0 = inlined_call_operand.vmem [shape: bf16[16,32], index: 0, kind: input, shape index: {}]   ;;  %s698_s1 = inlined_call_operand.vmem [shape: bf16[2,32,32], index: 1, kind: input, shape index: {}]   ;;  %s699_s2 = inlined_call_operand.vmem [shape: f32[2,1,32], index: 2, kind: input, shape index: {}]   ;;  %s700_s3 = inlined_call_operand.vmem [shape: bf16[2,16,32], index: 3, kind: output, shape index: {}]  }
   0x1   :  { %s657_s14 = smov 0  }
   0x2 LB: > { %s39_s15 = sadd.s32 1, %s625_s13  ;;  %p549_p0 = scmp.ge.s32.totalorder %s629_s14, 1  ;;  %s629_s14 = sphi %s657_s14, %s13_s14   ;;  %s625_s13 = sphi %s655_s13, %s702_s13   ;;  %s621_s12 = sphi %s653_s12, %s701_s12  }
   0x3   : > { %p41_p1 = scmp.ge.s32.totalorder %s39_s15, 2  ;;  %p208_p2 = scmp.lt.s32.totalorder %s629_s14, 3 }
   0x5   : > { %s704_s15 = smov (%p41_p1, %s39_s15), 0  ;;  %p209_p3 = pnand %p549_p0, %p208_p2 }
   0x6   : > { %p270_p4 = scmp.lt.s32.totalorder (!%p209_p3), %s621_s12, 1 }
   0x7   : > { %212 = sbr.rel (%p209_p3) target bundleno = 235 (0xeb), region = 32 }
   0xc   : > { %vm306_vm0 = vcmask 261120   ;;  %v631_v0 = vmov 0.0   ;;  %vm632_vm1 = vmmov 0   ;;  %s706_s12 = smov (!%p270_p4, %s621_s12), 1  ;;  %v606_v3 = vld [vmem:[%s697_s0] sm:$0xff]   ;;  %vm405_vm2 = vcmask 257024  }
   0xd   : > { %570 = vmatprep.subr.bf16.mxu0 %v631_v0  ;;  %574 = vmatprep.mubr.msk.bf16.mxu0 %vm632_vm1, %v631_v0  ;;  %307 = vst.msk [vmem:[#allocation2] sm:$0xff] %vm306_vm0, %v631_v0  ;;  %308 = vst.msk [vmem:[#allocation2 + $0x8] sm:$0xff] %vm306_vm0, %v631_v0  ;;  %s563_s16 = sshll.u32 %s706_s12, 4  ;;  %s287_s24 = scalar_lea.vmem %s699_s2, %s706_s12 }
   0xe   : > { %s280_s19 = scalar_lea.vmem %s698_s1, %s563_s16  ;;  %v558_v12 = vld [vmem:[%s287_s24] ss:$0 sm:$0xff]  ;;  %s564_s25 = sshll.u32 %s706_s12, 3 }
   0xf   : > { %v604_v1 = vld [vmem:[%s280_s19 + $0x8] sm:$0xff]   ;;  %v605_v2 = vld [vmem:[%s280_s19] sm:$0xff]   ;;  %s299_s28 = scalar_lea.vmem %s700_s3, %s564_s25 }
  0x10   : > { %571 = vmatpush3.bf16.msra.mxu0 %v604_v1 }
  0x11   : > { %572 = vmatprep.subr.bf16.mxu0 %v631_v0 }
  0x14   : > { %573 = vmatpush3.bf16.msra.mxu0 %v605_v2  ;;  %v309_v4 = vld [vmem:[#allocation2] sm:$0xff]  ;;  %v310_v8 = vld [vmem:[#allocation2 + $0x8] sm:$0xff] }
  0x17   : > { %575 = vmatmul.mubr.msk.bf16.vlgmr.msra.gmra.mxu0 %vm306_vm0, %v606_v3 }
  0xd7   : > { %v372_v5 = vpop.f32.mrf.mxu0 }
  0xd8   : > { %v379_v6 = vadd.f32 %v372_v5, %v309_v4 }
  0xd9   : > { %v576_v7 = vpop.f32.mrf.mxu0 }
  0xda   : > { %381 = vst.msk [vmem:[#allocation2] sm:$0xff] %vm306_vm0, %v379_v6 }
  0xdb   : > { %v375_v9 = vpop.f32.mrf.mxu0 }
  0xdc   : > { %v380_v10 = vadd.f32 %v375_v9, %v310_v8 }
  0xdd   : > { %v577_v11 = vpop.f32.mrf.mxu0 }
  0xde   : > { %382 = vst.msk [vmem:[#allocation2 + $0x8] sm:$0xff] %vm306_vm0, %v380_v10 }
  0xe1   : > { %v386_v13 = vld [vmem:[#allocation2] sm:$0xff] }
  0xe2   : > { %v395_v14 = vadd.f32 %v558_v12, %v386_v13 }
  0xe4   : > { %v565_v15 = vpack.c.bf16 %v395_v14, %v395_v14 }
  0xe5   : > { %v387_v16 = vld [vmem:[#allocation2 + $0x8] sm:$0xff] }
  0xe6   : > { %406 = vst.msk [vmem:[%s299_s28] sm:$0xf] %vm405_vm2, %v565_v15  ;;  %v396_v17 = vadd.f32 %v558_v12, %v387_v16 }
  0xe8   : > { %v566_v18 = vpack.c.bf16 %v396_v17, %v396_v17 }
  0xea   : > { %407 = vst.msk [vmem:[%s299_s28 + $0x4] sm:$0xf] %vm405_vm2, %v566_v18 }
  0xeb PF: > { %s13_s14 = sadd.s32 1, %s629_s14   ;;  %s701_s12 = smov %s625_s13 }
  0xec   : > { %p10_p5 = scmp.ge.s32.totalorder %s13_s14, 4   ;;  %s702_s13 = smov %s704_s15 }
  0xee   :  { %12 = sbr.rel (!%p10_p5) target bundleno = 2 (0x2), region = 76 }

// kernel: unified_transformer_forward.58
= control target key start
LH: loop header
LB: loop body
LE: loop exit
PB: predicated region body
PF: predicated region fallthrough
CT: control target
= control target key end

     0   :  { %s1080_s15 = smov 0   ;;  %s1082_s16 = smov 0   ;;  %s1197_s0 = inlined_call_operand.vmem [shape: bf16[3,2,8,32], index: 0, kind: input, shape index: {}, may-alias: {0,1,2}]   ;;  %s1198_s1 = inlined_call_operand.vmem [shape: bf16[3,2,8,32], index: 1, kind: input, shape index: {}, may-alias: {0,1,2}]   ;;  %s1199_s2 = inlined_call_operand.vmem [shape: bf16[3,2,8,32], index: 2, kind: input, shape index: {}, may-alias: {0,1,2}]   ;;  %s1200_s3 = inlined_call_operand.vmem [shape: f32[2,1,8], index: 3, kind: input, shape index: {}]   ;;  %s1201_s4 = inlined_call_operand.vmem [shape: bf16[2,8,32], index: 4, kind: output, shape index: {}]  }
   0x1   :  { %s1084_s17 = smov 0  }
   0x2 LB: > { %s26_s18 = sadd.s32 1, %s1040_s16  ;;  %p886_p0 = scmp.ge.s32.totalorder %s1044_s17, 1  ;;  %s1044_s17 = sphi %s1084_s17, %s14_s17   ;;  %s1040_s16 = sphi %s1082_s16, %s1203_s16   ;;  %s1036_s15 = sphi %s1080_s15, %s1202_s15  }
   0x3   : > { %p28_p1 = scmp.ge.s32.totalorder %s26_s18, 2  ;;  %p208_p2 = scmp.lt.s32.totalorder %s1044_s17, 3 }
   0x5   : > { %s1205_s18 = smov (%p28_p1, %s26_s18), 0  ;;  %p209_p3 = pnand %p886_p0, %p208_p2 }
   0x6   : > { %p251_p4 = scmp.lt.s32.totalorder (!%p209_p3), %s1036_s15, 1  ;;  %s1049_s29 = smov (!%p209_p3), 120  }
   0x7   : > { %212 = sbr.rel (%p209_p3) target bundleno = 1422 (0x58e), region = 36  ;;  %s1050_s30 = smov (!%p209_p3), 112  }
   0x8   : > { %s1051_s5 = smov (!%p209_p3), 104   ;;  %s1052_s9 = smov (!%p209_p3), 8  }
   0x9   : > { %s1053_s10 = smov (!%p209_p3), 16   ;;  %s1054_s11 = smov (!%p209_p3), 24  }
   0xc   : > { %v1046_v0 = vmov 0.0   ;;  %vm1047_vm0 = vmmov 0   ;;  %s1207_s15 = smov (!%p251_p4, %s1036_s15), 1  ;;  %vm301_vm1 = vcmask 64512   ;;  %v286_v5 = vlaneseq }
   0xd   : > { %923 = vmatprep.subr.bf16.mxu0 %v1046_v0  ;;  %925 = vmatprep.mubr.msk.bf16.mxu0 %vm1047_vm0, %v1046_v0  ;;  %s1104_s19 = sshll.u32 %s1207_s15, 2  ;;  %s270_s28 = scalar_lea.vmem %s1200_s3, %s1207_s15  ;;  %v1048_v9 = vmov -1e+09   ;;  %vm363_vm3 = vcmask 1043456   ;;  %vm531_vm4 = vcmask 130112   ;;  %vm647_vm5 = vcmask 195712  }
   0xe   : > { %929 = vmatprep.subr.bf16.mxu1 %v1046_v0  ;;  %931 = vmatprep.mubr.msk.bf16.mxu1 %vm1047_vm0, %v1046_v0  ;;  %s821_s22 = scalar_lea.vmem %s1198_s1, %s1104_s19  ;;  %s257_s25 = scalar_lea.vmem %s1197_s0, %s1104_s19  ;;  %v287_v6 = vshrl.u32 %v286_v5, 7  ;;  %v291_v7 = vand.u32 127, %v286_v5  ;;  %v893_v8 = vld [vmem:[%s270_s28] ss:$0 sm:$0xff]  ;;  %vm763_vm6 = vcmask 261312   ;;  %vm767_vm7 = vcmask 257024  }
   0xf   : > { %v891_v1 = vld [vmem:[%s821_s22 + $0x8] sm:$0xf]  ;;  %v280_v3 = vld [vmem:[%s257_s25] sm:$0xf]  ;;  %s824_s8 = scalar_lea.vmem %s1199_s2, %s1104_s19  ;;  %s277_s14 = scalar_lea.vmem %s1201_s4, %s1104_s19 }
  0x10   : > { %v306_v2 = vsel %vm301_vm1, %v891_v1, 0  ;;  %v281_v4 = vmul.bf16 1052065461, %v280_v3  ;;  %vm292_vm2 = vcmp.ge.s32.totalorder %v287_v6, %v291_v7  ;;  %v897_v18 = vcombine.low %v891_v1, %v891_v1  ;;  %v1136_v25 = vld [vmem:[%s824_s8 + $0x10] sm:$0xf] }
  0x11   : > { %924 = vmatpush3.bf16.xpose.msra.mxu0 %v306_v2  ;;  %v293_v10 = vsel %vm292_vm2, 0.0, %v1048_v9  ;;  %v365_v26 = vsel %vm363_vm3, %v1136_v25, 0  ;;  %v899_v9 = vcombine.low %v1136_v25, %v1136_v25 }
  0x12   : > { %941 = vmatprep.subr.bf16.mxu0 %v1046_v0  ;;  %v1122_v11 = vadd.f32 %v893_v8, %v293_v10  ;;  %416 = vrot.lane.b32.xlu1 %v897_v18, %s1049_s29  ;;  %v896_v19 = vcombine.low %v281_v4, %v281_v4 }
  0x13   : > { %930 = vmatpush3.bf16.msra.mxu1 %v365_v26 }
  0x14   : > { %935 = vmatprep.subr.bf16.mxu1 %v1046_v0 }
  0x16   : > { %411 = vrot.lane.b32.xlu1 %v896_v19, %s1049_s29 }
  0x18   : > { %926 = vmatmul.mubr.msk.bf16.vlgmr.msra.gmra.mxu0 %vm301_vm1, %v281_v4 }
  0x19   : > { %943 = vmatprep.mubr.msk.bf16.mxu0 %vm1047_vm0, %v1046_v0 }
  0x1a   : > { %533 = vrot.lane.b32.xlu1 %v896_v19, %s1050_s30 }
  0x1e   : > { %651 = vrot.lane.b32.xlu1 %v897_v18, %s1051_s5 }
  0x22   : > { %649 = vrot.lane.b32.xlu1 %v896_v19, %s1051_s5 }
  0x84   : > { %v417_v29 = vpop.permute.xlu1 %416 }
  0x85   : > { %v422_v31 = vsel %vm301_vm1, %v417_v29, 0 }
  0x88   : > { %v412_v33 = vpop.permute.xlu1 %411 }
  0x8c   : > { %v534_v35 = vpop.permute.xlu1 %533 }
  0x90   : > { %v652_v37 = vpop.permute.xlu1 %651 }
  0x91   : > { %v657_v38 = vsel %vm301_vm1, %v652_v37, 0 }
  0x94   : > { %v650_v39 = vpop.permute.xlu1 %649 }
  0xd8   : > { %v342_v12 = vpop.f32.mrf.mxu0 }
  0xd9   : > { %v343_v13 = vadd.f32 %v342_v12, %v1122_v11 }
  0xda   : > { %v927_v14 = vpop.f32.mrf.mxu0 }
  0xdb   : > { %v348_v15 = vsel %vm301_vm1, %v343_v13, -inf }
  0xdc   : > { %349 = vmax.xlane.f32.xlu0 %v348_v15  ;;  %v345_v16 = vpop.f32.mrf.mxu0 }
  0xde   : > { %v928_v17 = vpop.f32.mrf.mxu0 }
 0x165   : > { %v350_v20 = vpop.xlane.xlu0 %349 }
 0x166   : > { %v351_v21 = vsub.f32 %v343_v13, %v350_v20 }
 0x168   : > { %v352_v22 = vmul.f32 1.442695, %v351_v21 }
 0x16a   : > { %1006 = vpow2.f32 %v352_v22 }
 0x177   : > { %v1007_v23 = vpop.eup %1006 }
 0x178   : > { %v354_v24 = vsel %vm301_vm1, %v1007_v23, 0.0 }
 0x179   : > { %355 = vadd.xlane.f32.xlu0 %v354_v24 }
 0x18f   : > { %535 = vrot.lane.b32.xlu0 %v897_v18, %s1050_s30 }
 0x202   : > { %v356_v27 = vpop.xlane.xlu0 %355 }
 0x203   : > { %1008 = vrcp.f32 %v356_v27 }
 0x206   : > { %v536_v34 = vpop.permute.xlu0 %535 }
 0x207   : > { %v541_v36 = vsel %vm301_vm1, %v536_v34, 0 }
 0x210   : > { %v1009_v28 = vpop.eup %1008 }
 0x211   : > { %v358_v30 = vmul.f32 %v1009_v28, %v1007_v23 }
 0x213   : > { %v359_v32 = vpack.c.bf16 %v358_v30, %v358_v30 }
 0x215   : > { %932 = vmatmul.mubr.msk.bf16.vlgmr.msra.gmra.mxu1 %vm301_vm1, %v359_v32 }
 0x216   : > { %936 = vmatpush3.bf16.xpose.msra.mxu1 %v422_v31  ;;  %937 = vmatprep.mubr.msk.bf16.mxu1 %vm1047_vm0, %v1046_v0 }
 0x217   : > { %947 = vmatprep.subr.bf16.mxu1 %v1046_v0 }
 0x21d   : > { %938 = vmatmul.mubr.msk.bf16.vlgmr.msra.gmra.mxu1 %vm301_vm1, %v412_v33 }
 0x21e   : > { %948 = vmatpush3.bf16.xpose.msra.mxu1 %v541_v36  ;;  %949 = vmatprep.mubr.msk.bf16.mxu1 %vm1047_vm0, %v1046_v0 }
 0x21f   : > { %959 = vmatprep.subr.bf16.mxu1 %v1046_v0 }
 0x225   : > { %950 = vmatmul.mubr.msk.bf16.vlgmr.msra.gmra.mxu1 %vm301_vm1, %v534_v35 }
 0x226   : > { %960 = vmatpush3.bf16.xpose.msra.mxu1 %v657_v38  ;;  %961 = vmatprep.mubr.msk.bf16.mxu1 %vm1047_vm0, %v1046_v0 }
 0x22d   : > { %962 = vmatmul.mubr.msk.bf16.vlgmr.msra.gmra.mxu1 %vm301_vm1, %v650_v39 }
 0x2d5   : > { %v401_v40 = vpop.f32.mrf.mxu1 }
 0x2d6   : > { %407 = vst.msk [vmem:[#allocation2] sm:$0xff] %vm301_vm1, %v401_v40 }
 0x2d7   : > { %v933_v41 = vpop.f32.mrf.mxu1 }
 0x2d9   : > { %v404_v42 = vpop.f32.mrf.mxu1 }
 0x2db   : > { %v934_v43 = vpop.f32.mrf.mxu1 }
 0x2dd   : > { %v458_v44 = vpop.f32.mrf.mxu1 }
 0x2de   : > { %v459_v45 = vadd.f32 %v458_v44, %v1122_v11 }
 0x2df   : > { %v939_v46 = vpop.f32.mrf.mxu1 }
 0x2e0   : > { %v464_v47 = vsel %vm301_vm1, %v459_v45, -inf }
 0x2e1   : > { %465 = vmax.xlane.f32.xlu1 %v464_v47  ;;  %v461_v48 = vpop.f32.mrf.mxu1 }
 0x2e3   : > { %v940_v49 = vpop.f32.mrf.mxu1 }
 0x2e5   : > { %v577_v50 = vpop.f32.mrf.mxu1 }
 0x2e6   : > { %v578_v51 = vadd.f32 %v577_v50, %v1122_v11 }
 0x2e7   : > { %v951_v52 = vpop.f32.mrf.mxu1 }
 0x2e8   : > { %v583_v53 = vsel %vm301_vm1, %v578_v51, -inf }
 0x2e9   : > { %584 = vmax.xlane.f32.xlu0 %v583_v53  ;;  %v580_v54 = vpop.f32.mrf.mxu1 }
 0x2eb   : > { %v952_v55 = vpop.f32.mrf.mxu1 }
 0x2ed   : > { %v693_v56 = vpop.f32.mrf.mxu1 }
 0x2ee   : > { %v694_v57 = vadd.f32 %v693_v56, %v1122_v11 }
 0x2ef   : > { %v963_v58 = vpop.f32.mrf.mxu1 }
 0x2f0   : > { %v699_v59 = vsel %vm301_vm1, %v694_v57, -inf }
 0x2f1   : > { %700 = vmax.xlane.f32.xlu1 %v699_v59  ;;  %v696_v60 = vpop.f32.mrf.mxu1 }
 0x2f3   : > { %v964_v61 = vpop.f32.mrf.mxu1 }
 0x36a   : > { %v466_v62 = vpop.xlane.xlu1 %465 }
 0x36b   : > { %v467_v63 = vsub.f32 %v459_v45, %v466_v62 }
 0x36d   : > { %v468_v1 = vmul.f32 1.442695, %v467_v63 }
 0x36f   : > { %1010 = vpow2.f32 %v468_v1 }
 0x372   : > { %v585_v2 = vpop.xlane.xlu0 %584 }
 0x373   : > { %v586_v3 = vsub.f32 %v578_v51, %v585_v2 }
 0x375   : > { %v587_v4 = vmul.f32 1.442695, %v586_v3 }
 0x377   : > { %1012 = vpow2.f32 %v587_v4 }
 0x37a   : > { %v701_v10 = vpop.xlane.xlu1 %700 }
 0x37b   : > { %v702_v11 = vsub.f32 %v694_v57, %v701_v10 }
 0x37c   : > { %v1011_v5 = vpop.eup %1010 }
 0x37d   : > { %v470_v6 = vsel %vm301_vm1, %v1011_v5, 0.0  ;;  %v703_v12 = vmul.f32 1.442695, %v702_v11 }
 0x37e   : > { %471 = vadd.xlane.f32.xlu1 %v470_v6 }
 0x37f   : > { %1014 = vpow2.f32 %v703_v12 }
 0x384   : > { %v1013_v7 = vpop.eup %1012 }
 0x385   : > { %v589_v8 = vsel %vm301_vm1, %v1013_v7, 0.0 }
 0x386   : > { %590 = vadd.xlane.f32.xlu0 %v589_v8 }
 0x38c   : > { %v1015_v13 = vpop.eup %1014 }
 0x38d   : > { %v705_v14 = vsel %vm301_vm1, %v1015_v13, 0.0 }
 0x38f   : > { %595 = vrot.lane.b32.xlu1 %v899_v9, %s1050_s30 }
 0x39c   : > { %479 = vrot.lane.b32.xlu0 %v899_v9, %s1049_s29 }
 0x3b3   : > { %706 = vadd.xlane.f32.xlu1 %v705_v14 }
 0x3c4   : > { %711 = vrot.lane.b32.xlu1 %v899_v9, %s1051_s5 }
 0x407   : > { %v472_v15 = vpop.xlane.xlu1 %471 }
 0x408   : > { %1016 = vrcp.f32 %v472_v15 }
 0x40b   : > { %v596_v21 = vpop.permute.xlu1 %595 }
 0x40c   : > { %v601_v23 = vsel %vm363_vm3, %v596_v21, 0 }
 0x40f   : > { %v591_v16 = vpop.xlane.xlu0 %590 }
 0x410   : > { %1018 = vrcp.f32 %v591_v16 }
 0x413   : > { %v480_v17 = vpop.permute.xlu0 %479 }
 0x414   : > { %v485_v18 = vsel %vm363_vm3, %v480_v17, 0 }
 0x415   : > { %v1017_v19 = vpop.eup %1016  ;;  %942 = vmatpush3.bf16.msra.mxu0 %v485_v18 }
 0x416   : > { %953 = vmatprep.subr.bf16.mxu0 %v1046_v0  ;;  %v474_v20 = vmul.f32 %v1017_v19, %v1011_v5 }
 0x418   : > { %v475_v22 = vpack.c.bf16 %v474_v20, %v474_v20 }
 0x41a   : > { %944 = vmatmul.mubr.msk.bf16.vlgmr.msra.gmra.mxu0 %vm301_vm1, %v475_v22 }
 0x41b   : > { %954 = vmatpush3.bf16.msra.mxu0 %v601_v23  ;;  %955 = vmatprep.mubr.msk.bf16.mxu0 %vm1047_vm0, %v1046_v0 }
 0x41c   : > { %965 = vmatprep.subr.bf16.mxu0 %v1046_v0 }
 0x41d   : > { %v1019_v24 = vpop.eup %1018 }
 0x41e   : > { %v593_v25 = vmul.f32 %v1019_v24, %v1013_v7 }
 0x420   : > { %v594_v26 = vpack.c.bf16 %v593_v25, %v593_v25 }
 0x422   : > { %956 = vmatmul.mubr.msk.bf16.vlgmr.msra.gmra.mxu0 %vm301_vm1, %v594_v26 }
 0x423   : > { %967 = vmatprep.mubr.msk.bf16.mxu0 %vm1047_vm0, %v1046_v0 }
 0x43c   : > { %v707_v27 = vpop.xlane.xlu1 %706 }
 0x43d   : > { %1020 = vrcp.f32 %v707_v27 }
 0x440   : > { %v712_v28 = vpop.permute.xlu1 %711 }
 0x441   : > { %v717_v29 = vsel %vm363_vm3, %v712_v28, 0 }
 0x442   : > { %966 = vmatpush3.bf16.msra.mxu0 %v717_v29 }
 0x44a   : > { %v1021_v30 = vpop.eup %1020 }
 0x44b   : > { %v709_v31 = vmul.f32 %v1021_v30, %v1015_v13 }
 0x44d   : > { %v710_v32 = vpack.c.bf16 %v709_v31, %v709_v31 }
 0x44f   : > { %968 = vmatmul.mubr.msk.bf16.vlgmr.msra.gmra.mxu0 %vm301_vm1, %v710_v32 }
 0x4da   : > { %v521_v33 = vpop.f32.mrf.mxu0 }
 0x4db   : > { %528 = vrot.lane.b32.xlu0 %v521_v33, %s1052_s9 }
 0x4dc   : > { %v945_v34 = vpop.f32.mrf.mxu0 }
 0x4de   : > { %v524_v35 = vpop.f32.mrf.mxu0 }
 0x4e0   : > { %v946_v36 = vpop.f32.mrf.mxu0 }
 0x4e2   : > { %v637_v37 = vpop.f32.mrf.mxu0 }
 0x4e3   : > { %644 = vrot.lane.b32.xlu1 %v637_v37, %s1053_s10 }
 0x4e4   : > { %v957_v0 = vpop.f32.mrf.mxu0 }
 0x4e6   : > { %v640_v38 = vpop.f32.mrf.mxu0 }
 0x4e8   : > { %v958_v39 = vpop.f32.mrf.mxu0 }
 0x50f   : > { %v753_v40 = vpop.f32.mrf.mxu0 }
 0x510   : > { %760 = vrot.lane.b32.xlu0 %v753_v40, %s1054_s11 }
 0x511   : > { %v969_v41 = vpop.f32.mrf.mxu0 }
 0x513   : > { %v756_v42 = vpop.f32.mrf.mxu0 }
 0x515   : > { %v970_v43 = vpop.f32.mrf.mxu0 }
 0x54d   : > { %v529_v44 = vpop.permute.xlu0 %528 }
 0x54e   : > { %532 = vst.msk [vmem:[#allocation2] sm:$0xff] %vm531_vm4, %v529_v44 }
 0x555   : > { %v645_v45 = vpop.permute.xlu1 %644 }
 0x556   : > { %648 = vst.msk [vmem:[#allocation2] sm:$0xff] %vm647_vm5, %v645_v45 }
 0x582   : > { %v761_v46 = vpop.permute.xlu0 %760 }
 0x583   : > { %764 = vst.msk [vmem:[#allocation2] sm:$0xff] %vm763_vm6, %v761_v46 }
 0x58a   : > { %v765_v47 = vld [vmem:[#allocation2] sm:$0xff] }
 0x58b   : > { %v766_v48 = vpack.c.bf16 %v765_v47, %v765_v47 }
 0x58d   : > { %768 = vst.msk [vmem:[%s277_s14] sm:$0xf] %vm767_vm7, %v766_v48 }
 0x58e PF: > { %s14_s17 = sadd.s32 1, %s1044_s17   ;;  %s1202_s15 = smov %s1040_s16 }
 0x58f   : > { %p11_p5 = scmp.ge.s32.totalorder %s14_s17, 4   ;;  %s1203_s16 = smov %s1205_s18 }
 0x591   :  { %13 = sbr.rel (!%p11_p5) target bundleno = 2 (0x2), region = 75 }

// kernel: unified_transformer_forward.61
= control target key start
LH: loop header
LB: loop body
LE: loop exit
PB: predicated region body
PF: predicated region fallthrough
CT: control target
= control target key end

     0   :  { %vm19_vm0 = vcmask 261120   ;;  %v150_v0 = vmov 0.0   ;;  %vm151_vm1 = vmmov 0   ;;  %vm118_vm2 = vcmask 257024   ;;  %s195_s1 = inlined_call_operand.vmem [shape: bf16[1,32,32], index: 1, kind: input, shape index: {}]   ;;  %s196_s0 = inlined_call_operand.vmem [shape: bf16[16,32], index: 0, kind: input, shape index: {}]   ;;  %s197_s2 = inlined_call_operand.vmem [shape: f32[1,1,32], index: 2, kind: input, shape index: {}]   ;;  %s198_s3 = inlined_call_operand.vmem [shape: bf16[1,16,32], index: 3, kind: output, shape index: {}]  }
   0x1   :  { %137 = vmatprep.subr.bf16.mxu0 %v150_v0  ;;  %v147_v1 = vld [vmem:[%s195_s1 + $0x8] sm:$0xff]   ;;  %141 = vmatprep.mubr.msk.bf16.mxu0 %vm151_vm1, %v150_v0  ;;  %20 = vst.msk [vmem:[#allocation2] sm:$0xff] %vm19_vm0, %v150_v0  ;;  %21 = vst.msk [vmem:[#allocation2 + $0x8] sm:$0xff] %vm19_vm0, %v150_v0  ;;  %v148_v2 = vld [vmem:[%s195_s1] sm:$0xff]  }
   0x2   :  { %138 = vmatpush3.bf16.msra.mxu0 %v147_v1  ;;  %v149_v3 = vld [vmem:[%s196_s0] sm:$0xff]  }
   0x3   :  { %139 = vmatprep.subr.bf16.mxu0 %v150_v0  ;;  %v129_v12 = vld [vmem:[%s197_s2] ss:$0 sm:$0xff] }
   0x6   :  { %140 = vmatpush3.bf16.msra.mxu0 %v148_v2 }
   0x8   :  { %v22_v4 = vld [vmem:[#allocation2] sm:$0xff]  ;;  %v23_v8 = vld [vmem:[#allocation2 + $0x8] sm:$0xff] }
   0x9   :  { %142 = vmatmul.mubr.msk.bf16.vlgmr.msra.gmra.mxu0 %vm19_vm0, %v149_v3 }
  0xc9   :  { %v85_v5 = vpop.f32.mrf.mxu0 }
  0xca   :  { %v92_v6 = vadd.f32 %v85_v5, %v22_v4 }
  0xcb   :  { %v143_v7 = vpop.f32.mrf.mxu0 }
  0xcc   :  { %94 = vst.msk [vmem:[#allocation2] sm:$0xff] %vm19_vm0, %v92_v6 }
  0xcd   :  { %v88_v9 = vpop.f32.mrf.mxu0 }
  0xce   :  { %v93_v10 = vadd.f32 %v88_v9, %v23_v8 }
  0xcf   :  { %v144_v11 = vpop.f32.mrf.mxu0 }
  0xd0   :  { %95 = vst.msk [vmem:[#allocation2 + $0x8] sm:$0xff] %vm19_vm0, %v93_v10 }
  0xd3   :  { %v99_v13 = vld [vmem:[#allocation2] sm:$0xff] }
  0xd4   :  { %v108_v14 = vadd.f32 %v129_v12, %v99_v13 }
  0xd6   :  { %v132_v15 = vpack.c.bf16 %v108_v14, %v108_v14 }
  0xd7   :  { %v100_v16 = vld [vmem:[#allocation2 + $0x8] sm:$0xff] }
  0xd8   :  { %119 = vst.msk [vmem:[%s198_s3] sm:$0xf] %vm118_vm2, %v132_v15  ;;  %v109_v17 = vadd.f32 %v129_v12, %v100_v16 }
  0xda   :  { %v133_v18 = vpack.c.bf16 %v109_v17, %v109_v17 }
  0xdc   :  { %120 = vst.msk [vmem:[%s198_s3 + $0x4] sm:$0xf] %vm118_vm2, %v133_v18 }

// kernel: unified_transformer_forward.63
= control target key start
LH: loop header
LB: loop body
LE: loop exit
PB: predicated region body
PF: predicated region fallthrough
CT: control target
= control target key end

     0   :  { %s1061_s15 = smov 0   ;;  %s1063_s16 = smov 0   ;;  %s1178_s0 = inlined_call_operand.vmem [shape: bf16[1,2,8,32], index: 0, kind: input, shape index: {}]   ;;  %s1179_s1 = inlined_call_operand.vmem [shape: bf16[2,2,8,32], index: 1, kind: input, shape index: {}, may-alias: {1,2}]   ;;  %s1180_s2 = inlined_call_operand.vmem [shape: bf16[2,2,8,32], index: 2, kind: input, shape index: {}, may-alias: {1,2}]   ;;  %s1181_s3 = inlined_call_operand.vmem [shape: f32[2,1,8], index: 3, kind: input, shape index: {}]   ;;  %s1182_s4 = inlined_call_operand.vmem [shape: bf16[2,8,32], index: 4, kind: output, shape index: {}]  }
   0x1   :  { %s1065_s17 = smov 0  }
   0x2 LB: > { %s26_s18 = sadd.s32 1, %s1022_s16  ;;  %p870_p0 = scmp.ge.s32.totalorder %s1026_s17, 1  ;;  %s1026_s17 = sphi %s1065_s17, %s14_s17   ;;  %s1022_s16 = sphi %s1063_s16, %s1184_s16   ;;  %s1018_s15 = sphi %s1061_s15, %s1183_s15  }
   0x3   : > { %p28_p1 = scmp.ge.s32.totalorder %s26_s18, 2  ;;  %p207_p2 = scmp.lt.s32.totalorder %s1026_s17, 3 }
   0x5   : > { %s1186_s18 = smov (%p28_p1, %s26_s18), 0  ;;  %p208_p3 = pnand %p870_p0, %p207_p2 }
   0x6   : > { %p249_p4 = scmp.lt.s32.totalorder (!%p208_p3), %s1018_s15, 1  ;;  %s1030_s29 = smov (!%p208_p3), 120  }
   0x7   : > { %211 = sbr.rel (%p208_p3) target bundleno = 1422 (0x58e), region = 36  ;;  %s1031_s30 = smov (!%p208_p3), 112  }
   0x8   : > { %s1032_s5 = smov (!%p208_p3), 104   ;;  %s1033_s9 = smov (!%p208_p3), 8  }
   0x9   : > { %s1034_s10 = smov (!%p208_p3), 16   ;;  %s1035_s11 = smov (!%p208_p3), 24  }
   0xc   : > { %v1028_v0 = vmov 0.0   ;;  %vm1029_vm0 = vmmov 0   ;;  %s1188_s15 = smov (!%p249_p4, %s1018_s15), 1  ;;  %vm288_vm1 = vcmask 64512   ;;  %vm350_vm2 = vcmask 1043456  }
   0xd   : > { %906 = vmatprep.subr.bf16.mxu0 %v1028_v0  ;;  %908 = vmatprep.mubr.msk.bf16.mxu0 %vm1029_vm0, %v1028_v0  ;;  %s1085_s19 = sshll.u32 %s1188_s15, 2  ;;  %s267_s28 = scalar_lea.vmem %s1181_s3, %s1188_s15  ;;  %vm518_vm3 = vcmask 130112   ;;  %vm634_vm4 = vcmask 195712   ;;  %vm750_vm5 = vcmask 261312   ;;  %vm754_vm6 = vcmask 257024  }
   0xe   : > { %912 = vmatprep.subr.bf16.mxu1 %v1028_v0  ;;  %914 = vmatprep.mubr.msk.bf16.mxu1 %vm1029_vm0, %v1028_v0  ;;  %s259_s22 = scalar_lea.vmem %s1179_s1, %s1085_s19  ;;  %s255_s25 = scalar_lea.vmem %s1178_s0, %s1085_s19  ;;  %v1103_v5 = vld [vmem:[%s267_s28] ss:$0 sm:$0xff] }
   0xf   : > { %v279_v1 = vld [vmem:[%s259_s22] sm:$0xf]  ;;  %s808_s8 = scalar_lea.vmem %s1180_s2, %s1085_s19  ;;  %s274_s14 = scalar_lea.vmem %s1182_s4, %s1085_s19 }
  0x10   : > { %v293_v2 = vsel %vm288_vm1, %v279_v1, 0  ;;  %v277_v3 = vld [vmem:[%s255_s25] sm:$0xf]  ;;  %v880_v12 = vcombine.low %v279_v1, %v279_v1  ;;  %v1117_v19 = vld [vmem:[%s808_s8 + $0x8] sm:$0xf] }
  0x11   : > { %907 = vmatpush3.bf16.xpose.msra.mxu0 %v293_v2  ;;  %v278_v4 = vmul.bf16 1052065461, %v277_v3  ;;  %v352_v20 = vsel %vm350_vm2, %v1117_v19, 0  ;;  %v882_v3 = vcombine.low %v1117_v19, %v1117_v19 }
  0x12   : > { %924 = vmatprep.subr.bf16.mxu0 %v1028_v0  ;;  %403 = vrot.lane.b32.xlu1 %v880_v12, %s1030_s29 }
  0x13   : > { %v879_v13 = vcombine.low %v278_v4, %v278_v4  ;;  %913 = vmatpush3.bf16.msra.mxu1 %v352_v20 }
  0x14   : > { %918 = vmatprep.subr.bf16.mxu1 %v1028_v0 }
  0x16   : > { %398 = vrot.lane.b32.xlu1 %v879_v13, %s1030_s29 }
  0x18   : > { %909 = vmatmul.mubr.msk.bf16.vlgmr.msra.gmra.mxu0 %vm288_vm1, %v278_v4 }
  0x19   : > { %926 = vmatprep.mubr.msk.bf16.mxu0 %vm1029_vm0, %v1028_v0 }
  0x1a   : > { %520 = vrot.lane.b32.xlu1 %v879_v13, %s1031_s30 }
  0x1e   : > { %638 = vrot.lane.b32.xlu1 %v880_v12, %s1032_s5 }
  0x22   : > { %636 = vrot.lane.b32.xlu1 %v879_v13, %s1032_s5 }
  0x84   : > { %v404_v23 = vpop.permute.xlu1 %403 }
  0x85   : > { %v409_v25 = vsel %vm288_vm1, %v404_v23, 0 }
  0x88   : > { %v399_v27 = vpop.permute.xlu1 %398 }
  0x8c   : > { %v521_v29 = vpop.permute.xlu1 %520 }
  0x90   : > { %v639_v31 = vpop.permute.xlu1 %638 }
  0x91   : > { %v644_v32 = vsel %vm288_vm1, %v639_v31, 0 }
  0x94   : > { %v637_v33 = vpop.permute.xlu1 %636 }
  0xd8   : > { %v329_v6 = vpop.f32.mrf.mxu0 }
  0xd9   : > { %v330_v7 = vadd.f32 %v1103_v5, %v329_v6 }
  0xda   : > { %v910_v8 = vpop.f32.mrf.mxu0 }
  0xdb   : > { %v335_v9 = vsel %vm288_vm1, %v330_v7, -inf }
  0xdc   : > { %336 = vmax.xlane.f32.xlu0 %v335_v9  ;;  %v332_v10 = vpop.f32.mrf.mxu0 }
  0xde   : > { %v911_v11 = vpop.f32.mrf.mxu0 }
 0x165   : > { %v337_v14 = vpop.xlane.xlu0 %336 }
 0x166   : > { %v338_v15 = vsub.f32 %v330_v7, %v337_v14 }
 0x168   : > { %v339_v16 = vmul.f32 1.442695, %v338_v15 }
 0x16a   : > { %988 = vpow2.f32 %v339_v16 }
 0x177   : > { %v989_v17 = vpop.eup %988 }
 0x178   : > { %v341_v18 = vsel %vm288_vm1, %v989_v17, 0.0 }
 0x179   : > { %342 = vadd.xlane.f32.xlu0 %v341_v18 }
 0x18f   : > { %522 = vrot.lane.b32.xlu0 %v880_v12, %s1031_s30 }
 0x202   : > { %v343_v21 = vpop.xlane.xlu0 %342 }
 0x203   : > { %990 = vrcp.f32 %v343_v21 }
 0x206   : > { %v523_v28 = vpop.permute.xlu0 %522 }
 0x207   : > { %v528_v30 = vsel %vm288_vm1, %v523_v28, 0 }
 0x210   : > { %v991_v22 = vpop.eup %990 }
 0x211   : > { %v345_v24 = vmul.f32 %v991_v22, %v989_v17 }
 0x213   : > { %v346_v26 = vpack.c.bf16 %v345_v24, %v345_v24 }
 0x215   : > { %915 = vmatmul.mubr.msk.bf16.vlgmr.msra.gmra.mxu1 %vm288_vm1, %v346_v26 }
 0x216   : > { %919 = vmatpush3.bf16.xpose.msra.mxu1 %v409_v25  ;;  %920 = vmatprep.mubr.msk.bf16.mxu1 %vm1029_vm0, %v1028_v0 }
 0x217   : > { %930 = vmatprep.subr.bf16.mxu1 %v1028_v0 }
 0x21d   : > { %921 = vmatmul.mubr.msk.bf16.vlgmr.msra.gmra.mxu1 %vm288_vm1, %v399_v27 }
 0x21e   : > { %931 = vmatpush3.bf16.xpose.msra.mxu1 %v528_v30  ;;  %932 = vmatprep.mubr.msk.bf16.mxu1 %vm1029_vm0, %v1028_v0 }
 0x21f   : > { %942 = vmatprep.subr.bf16.mxu1 %v1028_v0 }
 0x225   : > { %933 = vmatmul.mubr.msk.bf16.vlgmr.msra.gmra.mxu1 %vm288_vm1, %v521_v29 }
 0x226   : > { %943 = vmatpush3.bf16.xpose.msra.mxu1 %v644_v32  ;;  %944 = vmatprep.mubr.msk.bf16.mxu1 %vm1029_vm0, %v1028_v0 }
 0x22d   : > { %945 = vmatmul.mubr.msk.bf16.vlgmr.msra.gmra.mxu1 %vm288_vm1, %v637_v33 }
 0x2d5   : > { %v388_v34 = vpop.f32.mrf.mxu1 }
 0x2d6   : > { %394 = vst.msk [vmem:[#allocation2] sm:$0xff] %vm288_vm1, %v388_v34 }
 0x2d7   : > { %v916_v35 = vpop.f32.mrf.mxu1 }
 0x2d9   : > { %v391_v36 = vpop.f32.mrf.mxu1 }
 0x2db   : > { %v917_v37 = vpop.f32.mrf.mxu1 }
 0x2dd   : > { %v445_v38 = vpop.f32.mrf.mxu1 }
 0x2de   : > { %v446_v39 = vadd.f32 %v1103_v5, %v445_v38 }
 0x2df   : > { %v922_v40 = vpop.f32.mrf.mxu1 }
 0x2e0   : > { %v451_v41 = vsel %vm288_vm1, %v446_v39, -inf }
 0x2e1   : > { %452 = vmax.xlane.f32.xlu1 %v451_v41  ;;  %v448_v42 = vpop.f32.mrf.mxu1 }
 0x2e3   : > { %v923_v43 = vpop.f32.mrf.mxu1 }
 0x2e5   : > { %v564_v44 = vpop.f32.mrf.mxu1 }
 0x2e6   : > { %v565_v45 = vadd.f32 %v1103_v5, %v564_v44 }
 0x2e7   : > { %v934_v46 = vpop.f32.mrf.mxu1 }
 0x2e8   : > { %v570_v47 = vsel %vm288_vm1, %v565_v45, -inf }
 0x2e9   : > { %571 = vmax.xlane.f32.xlu0 %v570_v47  ;;  %v567_v48 = vpop.f32.mrf.mxu1 }
 0x2eb   : > { %v935_v49 = vpop.f32.mrf.mxu1 }
 0x2ed   : > { %v680_v50 = vpop.f32.mrf.mxu1 }
 0x2ee   : > { %v681_v51 = vadd.f32 %v1103_v5, %v680_v50 }
 0x2ef   : > { %v946_v52 = vpop.f32.mrf.mxu1 }
 0x2f0   : > { %v686_v53 = vsel %vm288_vm1, %v681_v51, -inf }
 0x2f1   : > { %687 = vmax.xlane.f32.xlu1 %v686_v53  ;;  %v683_v54 = vpop.f32.mrf.mxu1 }
 0x2f3   : > { %v947_v55 = vpop.f32.mrf.mxu1 }
 0x36a   : > { %v453_v56 = vpop.xlane.xlu1 %452 }
 0x36b   : > { %v454_v57 = vsub.f32 %v446_v39, %v453_v56 }
 0x36d   : > { %v455_v58 = vmul.f32 1.442695, %v454_v57 }
 0x36f   : > { %992 = vpow2.f32 %v455_v58 }
 0x372   : > { %v572_v59 = vpop.xlane.xlu0 %571 }
 0x373   : > { %v573_v60 = vsub.f32 %v565_v45, %v572_v59 }
 0x375   : > { %v574_v61 = vmul.f32 1.442695, %v573_v60 }
 0x377   : > { %994 = vpow2.f32 %v574_v61 }
 0x37a   : > { %v688_v4 = vpop.xlane.xlu1 %687 }
 0x37b   : > { %v689_v5 = vsub.f32 %v681_v51, %v688_v4 }
 0x37c   : > { %v993_v62 = vpop.eup %992 }
 0x37d   : > { %v457_v63 = vsel %vm288_vm1, %v993_v62, 0.0  ;;  %v690_v6 = vmul.f32 1.442695, %v689_v5 }
 0x37e   : > { %458 = vadd.xlane.f32.xlu1 %v457_v63 }
 0x37f   : > { %996 = vpow2.f32 %v690_v6 }
 0x384   : > { %v995_v1 = vpop.eup %994 }
 0x385   : > { %v576_v2 = vsel %vm288_vm1, %v995_v1, 0.0 }
 0x386   : > { %577 = vadd.xlane.f32.xlu0 %v576_v2 }
 0x38c   : > { %v997_v7 = vpop.eup %996 }
 0x38d   : > { %v692_v8 = vsel %vm288_vm1, %v997_v7, 0.0 }
 0x38f   : > { %582 = vrot.lane.b32.xlu1 %v882_v3, %s1031_s30 }
 0x39c   : > { %466 = vrot.lane.b32.xlu0 %v882_v3, %s1030_s29 }
 0x3b3   : > { %693 = vadd.xlane.f32.xlu1 %v692_v8 }
 0x3c4   : > { %698 = vrot.lane.b32.xlu1 %v882_v3, %s1032_s5 }
 0x407   : > { %v459_v9 = vpop.xlane.xlu1 %458 }
 0x408   : > { %998 = vrcp.f32 %v459_v9 }
 0x40b   : > { %v583_v15 = vpop.permute.xlu1 %582 }
 0x40c   : > { %v588_v17 = vsel %vm350_vm2, %v583_v15, 0 }
 0x40f   : > { %v578_v10 = vpop.xlane.xlu0 %577 }
 0x410   : > { %1000 = vrcp.f32 %v578_v10 }
 0x413   : > { %v467_v11 = vpop.permute.xlu0 %466 }
 0x414   : > { %v472_v12 = vsel %vm350_vm2, %v467_v11, 0 }
 0x415   : > { %v999_v13 = vpop.eup %998  ;;  %925 = vmatpush3.bf16.msra.mxu0 %v472_v12 }
 0x416   : > { %936 = vmatprep.subr.bf16.mxu0 %v1028_v0  ;;  %v461_v14 = vmul.f32 %v999_v13, %v993_v62 }
 0x418   : > { %v462_v16 = vpack.c.bf16 %v461_v14, %v461_v14 }
 0x41a   : > { %927 = vmatmul.mubr.msk.bf16.vlgmr.msra.gmra.mxu0 %vm288_vm1, %v462_v16 }
 0x41b   : > { %937 = vmatpush3.bf16.msra.mxu0 %v588_v17  ;;  %938 = vmatprep.mubr.msk.bf16.mxu0 %vm1029_vm0, %v1028_v0 }
 0x41c   : > { %948 = vmatprep.subr.bf16.mxu0 %v1028_v0 }
 0x41d   : > { %v1001_v18 = vpop.eup %1000 }
 0x41e   : > { %v580_v19 = vmul.f32 %v1001_v18, %v995_v1 }
 0x420   : > { %v581_v20 = vpack.c.bf16 %v580_v19, %v580_v19 }
 0x422   : > { %939 = vmatmul.mubr.msk.bf16.vlgmr.msra.gmra.mxu0 %vm288_vm1, %v581_v20 }
 0x423   : > { %950 = vmatprep.mubr.msk.bf16.mxu0 %vm1029_vm0, %v1028_v0 }
 0x43c   : > { %v694_v21 = vpop.xlane.xlu1 %693 }
 0x43d   : > { %1002 = vrcp.f32 %v694_v21 }
 0x440   : > { %v699_v22 = vpop.permute.xlu1 %698 }
 0x441   : > { %v704_v23 = vsel %vm350_vm2, %v699_v22, 0 }
 0x442   : > { %949 = vmatpush3.bf16.msra.mxu0 %v704_v23 }
 0x44a   : > { %v1003_v24 = vpop.eup %1002 }
 0x44b   : > { %v696_v25 = vmul.f32 %v1003_v24, %v997_v7 }
 0x44d   : > { %v697_v26 = vpack.c.bf16 %v696_v25, %v696_v25 }
 0x44f   : > { %951 = vmatmul.mubr.msk.bf16.vlgmr.msra.gmra.mxu0 %vm288_vm1, %v697_v26 }
 0x4da   : > { %v508_v27 = vpop.f32.mrf.mxu0 }
 0x4db   : > { %515 = vrot.lane.b32.xlu0 %v508_v27, %s1033_s9 }
 0x4dc   : > { %v928_v28 = vpop.f32.mrf.mxu0 }
 0x4de   : > { %v511_v29 = vpop.f32.mrf.mxu0 }
 0x4e0   : > { %v929_v30 = vpop.f32.mrf.mxu0 }
 0x4e2   : > { %v624_v31 = vpop.f32.mrf.mxu0 }
 0x4e3   : > { %631 = vrot.lane.b32.xlu1 %v624_v31, %s1034_s10 }
 0x4e4   : > { %v940_v0 = vpop.f32.mrf.mxu0 }
 0x4e6   : > { %v627_v32 = vpop.f32.mrf.mxu0 }
 0x4e8   : > { %v941_v33 = vpop.f32.mrf.mxu0 }
 0x50f   : > { %v740_v34 = vpop.f32.mrf.mxu0 }
 0x510   : > { %747 = vrot.lane.b32.xlu0 %v740_v34, %s1035_s11 }
 0x511   : > { %v952_v35 = vpop.f32.mrf.mxu0 }
 0x513   : > { %v743_v36 = vpop.f32.mrf.mxu0 }
 0x515   : > { %v953_v37 = vpop.f32.mrf.mxu0 }
 0x54d   : > { %v516_v38 = vpop.permute.xlu0 %515 }
 0x54e   : > { %519 = vst.msk [vmem:[#allocation2] sm:$0xff] %vm518_vm3, %v516_v38 }
 0x555   : > { %v632_v39 = vpop.permute.xlu1 %631 }
 0x556   : > { %635 = vst.msk [vmem:[#allocation2] sm:$0xff] %vm634_vm4, %v632_v39 }
 0x582   : > { %v748_v40 = vpop.permute.xlu0 %747 }
 0x583   : > { %751 = vst.msk [vmem:[#allocation2] sm:$0xff] %vm750_vm5, %v748_v40 }
 0x58a   : > { %v752_v41 = vld [vmem:[#allocation2] sm:$0xff] }
 0x58b   : > { %v753_v42 = vpack.c.bf16 %v752_v41, %v752_v41 }
 0x58d   : > { %755 = vst.msk [vmem:[%s274_s14] sm:$0xf] %vm754_vm6, %v753_v42 }
 0x58e PF: > { %s14_s17 = sadd.s32 1, %s1026_s17   ;;  %s1183_s15 = smov %s1022_s16 }
 0x58f   : > { %p11_p5 = scmp.ge.s32.totalorder %s14_s17, 4   ;;  %s1184_s16 = smov %s1186_s18 }
 0x591   :  { %13 = sbr.rel (!%p11_p5) target bundleno = 2 (0x2), region = 75 }

// kernel: unified_transformer_forward.81
= control target key start
LH: loop header
LB: loop body
LE: loop exit
PB: predicated region body
PF: predicated region fallthrough
CT: control target
= control target key end

     0   :  { %v176_v1 = vmov 0.0   ;;  %vm177_vm0 = vmmov 0   ;;  %vm20_vm1 = vcmask 523264   ;;  %s222_s0 = inlined_call_operand.vmem [shape: bf16[16,32], index: 0, kind: input, shape index: {}]   ;;  %s223_s1 = inlined_call_operand.vmem [shape: bf16[1,32,64], index: 1, kind: input, shape index: {}]   ;;  %s224_s2 = inlined_call_operand.vmem [shape: f32[1,1,64], index: 2, kind: input, shape index: {}]   ;;  %s225_s3 = inlined_call_operand.hbm [shape: f32[1,16,64], index: 3, kind: output, shape index: {}]  }
   0x1   :  { %v151_v0 = vld [vmem:[%s223_s1 + $0x8] sm:$0xff]   ;;  %138 = vmatprep.subr.bf16.mxu0 %v176_v1  ;;  %v152_v2 = vld [vmem:[%s223_s1] sm:$0xff]   ;;  %142 = vmatprep.mubr.msk.bf16.mxu0 %vm177_vm0, %v176_v1 }
   0x2   :  { %139 = vmatpush3.bf16.msra.mxu0 %v151_v0 }
   0x3   :  { %140 = vmatprep.subr.bf16.mxu0 %v176_v1 }
   0x4   :  { %8 = vsyncpa [#allocation4], 0  ;;  %21 = vst.msk [vmem:[#allocation2] sm:$0xff] %vm20_vm1, %v176_v1  ;;  %v153_v3 = vld [vmem:[%s222_s0] sm:$0xff]   ;;  %vm48_vm2 = vcmask 261120   ;;  %s178_s0 = smov [#allocation3]  }
   0x5   :  { %22 = vst.msk [vmem:[#allocation2 + $0x8] sm:$0xff] %vm20_vm1, %v176_v1  ;;  %v134_v12 = vld [vmem:[%s224_s2] ss:$0 sm:$0xff]  ;;  %s119_s19 = sshll.u32 %s178_s0, 4  ;;  %s120_s19 = int_to_ptr.vmem [resolvable:$true] %s119_s19 }
   0x6   :  { %141 = vmatpush3.bf16.msra.mxu0 %v152_v2  ;;  %s154_s20 = scalar_lea.vmem %s120_s19, 256  ;;  %p159_p1 = scmp.lt.s32.totalorder %s120_s19, %s120_s19 }
   0x7   :  { %p155_p0 = scmp.ne.s32.totalorder %s120_s19, %s154_s20  ;;  %p160_p2 = scmp.lt.s32.totalorder %s154_s20, %s154_s20 }
   0x9   :  { %143 = vmatmul.mubr.msk.bf16.vlgmr.msra.gmra.mxu0 %vm48_vm2, %v153_v3  ;;  %p161_p3 = por %p160_p2, %p159_p1 }
   0xb   :  { %v23_v4 = vld [vmem:[#allocation2] sm:$0xff]  ;;  %p162_p4 = pnand %p161_p3, %p155_p0 }
   0xc   :  { %v24_v8 = vld [vmem:[#allocation2 + $0x8] sm:$0xff] }
  0xc9   :  { %v86_v5 = vpop.f32.mrf.mxu0 }
  0xca   :  { %v93_v6 = vadd.f32 %v86_v5, %v23_v4 }
  0xcb   :  { %v144_v7 = vpop.f32.mrf.mxu0 }
  0xcc   :  { %96 = vst.msk [vmem:[#allocation2] sm:$0xff] %vm20_vm1, %v93_v6 }
  0xcd   :  { %v89_v9 = vpop.f32.mrf.mxu0 }
  0xce   :  { %v94_v10 = vadd.f32 %v89_v9, %v24_v8 }
  0xcf   :  { %v145_v11 = vpop.f32.mrf.mxu0 }
  0xd0   :  { %97 = vst.msk [vmem:[#allocation2 + $0x8] sm:$0xff] %vm20_vm1, %v94_v10 }
  0xd3   :  { %v101_v13 = vld [vmem:[#allocation2] sm:$0xff] }
  0xd4   :  { %v110_v14 = vadd.f32 %v134_v12, %v101_v13 }
  0xd6   :  { %112 = vst.msk [vmem:[#allocation3] sm:$0xff] %vm20_vm1, %v110_v14 }
  0xd7   :  { %v102_v15 = vld [vmem:[#allocation2 + $0x8] sm:$0xff] }
  0xd8   :  { %v111_v16 = vadd.f32 %v134_v12, %v102_v15 }
  0xda   :  { %113 = vst.msk [vmem:[#allocation3 + $0x8] sm:$0xff] %vm20_vm1, %v111_v16 }
  0xdb   :  { %165 = shalt.err (!%p162_p4)
}
  0xdc   :  { %s179_s21 = smov 128   ;;  %s180_s2 = smov 8  }
  0xdd   :  { %125 = dma.vmem_to_hbm [thread:$0]  %s120_s19, 256, %s225_s3, [#allocation4], %s179_s21, %s179_s21, %s180_s2  }
  0xde   :  { %174 = dma.done.wait [#allocation4], 256  }
  0xdf   :  { %175 = vsyncadd [#allocation4], 4294967040 }
  0xe0   :  { %129 = vsyncpa [#allocation4], 1 }

</bundles_post_ra>
